<compile_context>
chip_gen: v5e
topology: v5e:2x2
jax: 0.10.0
libtpu: 0.0.40
codegen_flags: <defaults>
</compile_context>

<pallas_src>
import numpy as np

import jax
import jax.numpy as jnp
from jax import lax
from jax.experimental import pallas as pl
from jax.experimental.pallas import tpu as pltpu


# ---------------------------------------------------------------------------
# Tiling constants.
# ---------------------------------------------------------------------------
BT = 4                        # images per grid step; BT*32 = 128 = one lane tile
_W1 = BT * 32 - 4             # conv1 slab accumulator width  (124)
_PW1 = BT * 14                # pooled width after conv1      (56)
_W2 = _PW1 - 4                # conv2 slab accumulator width  (52)
_PW2 = BT * 5                 # pooled width after conv2      (20)


# ---------------------------------------------------------------------------
# Fused kernel: one grid step == BT images, everything resident in VMEM/vregs.
# ---------------------------------------------------------------------------
def _fused_lenet_kernel(x_ref,
                        m1e_ref, m1o_ref, s1e_ref, s1o_ref, b1_ref,
                        m2e_ref, m2o_ref, s2e_ref, s2o_ref, b2_ref,
                        fc1w_ref, selw_ref, fc1b_ref, fc2w_ref, fc2b_ref,
                        fc3w_ref, fc3b_ref,
                        out_ref):
    f32 = jnp.float32
    X = x_ref[...]                                  # (96, BT*32): rows ic*32+h, cols img*32+w

    # ---- conv1 (5x5 valid) + 2x2 max-pool + ReLU, fused, whole tile at once ----
    acc_e = jnp.zeros((84, _W1), f32)               # rows = oc*14 + pooled_h (even oh)
    acc_o = jnp.zeros((84, _W1), f32)               # rows = oc*14 + pooled_h (odd  oh)
    for kj in range(5):
        xs = X[:, kj:kj + _W1]                      # (96, 124); cross-image cols are discarded later
        acc_e = acc_e + jnp.dot(m1e_ref[kj], xs, preferred_element_type=f32)
        acc_o = acc_o + jnp.dot(m1o_ref[kj], xs, preferred_element_type=f32)
    rmax = jnp.maximum(acc_e, acc_o)                # (84, 124) max over output-row pairs
    cmax = jnp.maximum(                             # (84, 56)  max over output-col pairs
        jnp.dot(rmax, s1e_ref[...], preferred_element_type=f32),
        jnp.dot(rmax, s1o_ref[...], preferred_element_type=f32))
    h1 = jnp.maximum(cmax + b1_ref[...], 0.0)       # (84, 56) rows = c*14+h, cols = img*14+w

    # ---- conv2 (5x5 valid) + 2x2 max-pool + ReLU, same scheme -------------------
    acc2_e = jnp.zeros((80, _W2), f32)
    acc2_o = jnp.zeros((80, _W2), f32)
    for kj in range(5):
        hs = h1[:, kj:kj + _W2]                     # (84, 52)
        acc2_e = acc2_e + jnp.dot(m2e_ref[kj], hs, preferred_element_type=f32)
        acc2_o = acc2_o + jnp.dot(m2o_ref[kj], hs, preferred_element_type=f32)
    rmax2 = jnp.maximum(acc2_e, acc2_o)             # (80, 52)
    cmax2 = jnp.maximum(                            # (80, 20)
        jnp.dot(rmax2, s2e_ref[...], preferred_element_type=f32),
        jnp.dot(rmax2, s2o_ref[...], preferred_element_type=f32))
    h2 = jnp.maximum(cmax2 + b2_ref[...], 0.0)      # (80, 20) rows = c*5+h, cols = img*5+w

    # ---- fc1: the (16,5,5)->400 flatten folded into 5 column-select matmuls -----
    z1 = fc1b_ref[...]                              # (120, 1) -> broadcasts to (120, BT)
    for w in range(5):
        g = jnp.dot(h2, selw_ref[w], preferred_element_type=f32)        # (80, BT)
        z1 = z1 + jnp.dot(fc1w_ref[w], g, preferred_element_type=f32)   # (120, BT)
    h3 = jnp.maximum(z1, 0.0)                       # (120, BT)

    # ---- fc2 (+ReLU), fc3 --------------------------------------------------------
    h4 = jnp.maximum(
        jnp.dot(fc2w_ref[...], h3, preferred_element_type=f32) + fc2b_ref[...], 0.0)  # (84, BT)
    logits = jnp.dot(fc3w_ref[...], h4, preferred_element_type=f32) + fc3b_ref[...]   # (10, BT)

    out_ref[0] = logits


_PREP_ORDER = ("m1e", "m1o", "s1e", "s1o", "b1e",
               "m2e", "m2o", "s2e", "s2o", "b2e",
               "fc1w", "selw", "fc1b", "fc2w", "fc2b", "fc3w", "fc3b")


@jax.jit
def cnn01_forward(prep, x):
    """x: (N, 3, 32, 32) float32 -> logits (N, 10)."""
    n = x.shape[0]
    n_tiles = -(-n // BT)
    n_pad = n_tiles * BT

    xs = x.astype(jnp.float32).reshape(n, 3 * 32, 32)
    if n_pad != n:
        xs = jnp.pad(xs, ((0, n_pad - n), (0, 0), (0, 0)))
    # One lane-dense slab: rows = ic*32 + h, cols = img*32 + w.
    slab = jnp.transpose(xs, (1, 0, 2)).reshape(3 * 32, n_pad * 32)

    def _full_spec(arr):
        return pl.BlockSpec(arr.shape, lambda i, _nd=arr.ndim: (0,) * _nd)

    weight_args = [prep[k] for k in _PREP_ORDER]
    in_specs = [pl.BlockSpec((3 * 32, BT * 32), lambda i: (0, i))]
    in_specs += [_full_spec(a) for a in weight_args]

    out = pl.pallas_call(
        _fused_lenet_kernel,
        out_shape=jax.ShapeDtypeStruct((n_tiles, 10, BT), jnp.float32),
        grid=(n_tiles,),
        in_specs=in_specs,
        out_specs=pl.BlockSpec((1, 10, BT), lambda i: (i, 0, 0)),
        compiler_params=pltpu.CompilerParams(dimension_semantics=("parallel",)),
    )(slab, *weight_args)

    logits = jnp.transpose(out, (0, 2, 1)).reshape(n_pad, 10)
    return logits[:n]


# ---------------------------------------------------------------------------
# One-time, host-side weight preprocessing (PyTorch layout -> kernel layout).
# ---------------------------------------------------------------------------
def prepare_params(params):
    w1 = np.asarray(params["conv1_w"], np.float32)   # (6, 3, 5, 5)
    b1 = np.asarray(params["conv1_b"], np.float32)   # (6,)
    w2 = np.asarray(params["conv2_w"], np.float32)   # (16, 6, 5, 5)
    b2 = np.asarray(params["conv2_b"], np.float32)   # (16,)

    def conv_row_mats(w, h_in, conv_oh, parity):
        # M[kj, oc*HP + hp, ic*h_in + (2*hp + parity) + ki] = w[oc, ic, ki, kj]
        oc_n, ic_n, k, _ = w.shape
        hp_n = conv_oh // 2
        m = np.zeros((k, oc_n * hp_n, ic_n * h_in), np.float32)
        for kj in range(k):
            for oc in range(oc_n):
                for hp in range(hp_n):
                    oh = 2 * hp + parity
                    for ic in range(ic_n):
                        for ki in range(k):
                            m[kj, oc * hp_n + hp, ic * h_in + oh + ki] = w[oc, ic, ki, kj]
        return m

    def pool_col_select(img_w, n_pairs, parity):
        # rows index the conv-slab accumulator columns (img*img_w + ow, width BT*img_w-4),
        # output cols index pooled columns (img*n_pairs + p).  Cross-image (invalid)
        # accumulator columns have all-zero rows, so they never leak into the output.
        rows = BT * img_w - 4
        s = np.zeros((rows, BT * n_pairs), np.float32)
        for img in range(BT):
            for p in range(n_pairs):
                s[img * img_w + 2 * p + parity, img * n_pairs + p] = 1.0
        return s

    # selw[w][img*5 + w, img] = 1 : picks the w-th pooled column of every image.
    selw = np.zeros((5, BT * 5, BT), np.float32)
    for w in range(5):
        for img in range(BT):
            selw[w, img * 5 + w, img] = 1.0

    # fc1 weight folded per output-column w of the (c*5+h, img*5+w) pooled feature map:
    # fc1w[w][j, c*5+h] = fc1_w[j, c*25 + h*5 + w]   (matches torch's .view(-1, 400)).
    fc1_w4 = np.asarray(params["fc1_w"], np.float32).reshape(120, 16, 5, 5)
    fc1w = np.stack([fc1_w4[:, :, :, w].reshape(120, 80) for w in range(5)], axis=0)

    prep = {
        "m1e": conv_row_mats(w1, 32, 28, 0),
        "m1o": conv_row_mats(w1, 32, 28, 1),
        "s1e": pool_col_select(32, 14, 0), "s1o": pool_col_select(32, 14, 1),
        "b1e": np.repeat(b1, 14).reshape(84, 1),
        "m2e": conv_row_mats(w2, 14, 10, 0),
        "m2o": conv_row_mats(w2, 14, 10, 1),
        "s2e": pool_col_select(14, 5, 0), "s2o": pool_col_select(14, 5, 1),
        "b2e": np.repeat(b2, 5).reshape(80, 1),
        "fc1w": fc1w,
        "selw": selw,
        "fc1b": np.asarray(params["fc1_b"], np.float32).reshape(120, 1),
        "fc2w": np.asarray(params["fc2_w"], np.float32),
        "fc2b": np.asarray(params["fc2_b"], np.float32).reshape(84, 1),
        "fc3w": np.asarray(params["fc3_w"], np.float32),
        "fc3b": np.asarray(params["fc3_b"], np.float32).reshape(10, 1),
    }
    return {k: jnp.asarray(v) for k, v in prep.items()}


# ---------------------------------------------------------------------------
# Parameters (PyTorch-default-style init) and a pure-JAX reference for checking.
# ---------------------------------------------------------------------------
def init_params(key):
    def uniform(k, shape, fan_in):
        bound = 1.0 / (float(fan_in) ** 0.5)
        return jax.random.uniform(k, shape, jnp.float32, -bound, bound)

    ks = jax.random.split(key, 10)
    return {
        "conv1_w": uniform(ks[0], (6, 3, 5, 5), 3 * 5 * 5),
        "conv1_b": uniform(ks[1], (6,), 3 * 5 * 5),
        "conv2_w": uniform(ks[2], (16, 6, 5, 5), 6 * 5 * 5),
        "conv2_b": uniform(ks[3], (16,), 6 * 5 * 5),
        "fc1_w": uniform(ks[4], (120, 400), 400),
        "fc1_b": uniform(ks[5], (120,), 400),
        "fc2_w": uniform(ks[6], (84, 120), 120),
        "fc2_b": uniform(ks[7], (84,), 120),
        "fc3_w": uniform(ks[8], (10, 84), 84),
        "fc3_b": uniform(ks[9], (10,), 84),
    }


def cnn01_reference(params, x):
    hi = lax.Precision.HIGHEST

    def conv(h, w, b):
        y = lax.conv_general_dilated(h, w, (1, 1), "VALID",
                                     dimension_numbers=("NCHW", "OIHW", "NCHW"),
                                     precision=hi)
        return y + b.reshape(1, -1, 1, 1)

    def pool(h):
        n, c, hh, ww = h.shape
        return h.reshape(n, c, hh // 2, 2, ww // 2, 2).max(axis=(3, 5))

    h = pool(jax.nn.relu(conv(x, params["conv1_w"], params["conv1_b"])))
    h = pool(jax.nn.relu(conv(h, params["conv2_w"], params["conv2_b"])))
    h = h.reshape(x.shape[0], 400)
    h = jax.nn.relu(jnp.dot(h, params["fc1_w"].T, precision=hi) + params["fc1_b"])
    h = jax.nn.relu(jnp.dot(h, params["fc2_w"].T, precision=hi) + params["fc2_b"])
    return jnp.dot(h, params["fc3_w"].T, precision=hi) + params["fc3_b"]


if __name__ == "__main__":
    key = jax.random.PRNGKey(0)
    k_params, k_x = jax.random.split(key)
    params = init_params(k_params)
    prep = prepare_params(params)            # one-time weight preprocessing

    # Input spatial size must be 32 for the 16*5*5 flatten to hold (CIFAR-like).
    x = jax.random.normal(k_x, (2, 3, 32, 32), jnp.float32)

    out = cnn01_forward(prep, x)
    out = jax.block_until_ready(out)
    assert out.shape == (2, 10), out.shape

    ref = cnn01_reference(params, x)
    max_err = float(jnp.max(jnp.abs(out - ref)))
    assert max_err < 5e-2, f"kernel/reference mismatch, max abs err = {max_err}"

    print("KERNEL_OK")
</pallas_src>

<mosaic_0001>
module attributes {stable_mosaic.version = 11 : i64} {
  func.func @_fused_lenet_kernel(%arg0: i32, %arg1: memref<96x128xf32, #tpu.memory_space<vmem>>, %arg2: memref<5x84x96xf32, #tpu.memory_space<vmem>>, %arg3: memref<5x84x96xf32, #tpu.memory_space<vmem>>, %arg4: memref<124x56xf32, #tpu.memory_space<vmem>>, %arg5: memref<124x56xf32, #tpu.memory_space<vmem>>, %arg6: memref<84x1xf32, #tpu.memory_space<vmem>>, %arg7: memref<5x80x84xf32, #tpu.memory_space<vmem>>, %arg8: memref<5x80x84xf32, #tpu.memory_space<vmem>>, %arg9: memref<52x20xf32, #tpu.memory_space<vmem>>, %arg10: memref<52x20xf32, #tpu.memory_space<vmem>>, %arg11: memref<80x1xf32, #tpu.memory_space<vmem>>, %arg12: memref<5x120x80xf32, #tpu.memory_space<vmem>>, %arg13: memref<5x20x4xf32, #tpu.memory_space<vmem>>, %arg14: memref<120x1xf32, #tpu.memory_space<vmem>>, %arg15: memref<84x120xf32, #tpu.memory_space<vmem>>, %arg16: memref<84x1xf32, #tpu.memory_space<vmem>>, %arg17: memref<10x84xf32, #tpu.memory_space<vmem>>, %arg18: memref<10x1xf32, #tpu.memory_space<vmem>>, %arg19: memref<1x10x4xf32, #tpu.memory_space<vmem>>) attributes {dimension_semantics = [#tpu.dimension_semantics<parallel>], iteration_bounds = array<i64: 1>, scalar_prefetch = 0 : i64, scratch_operands = 0 : i64, tpu.core_type = #tpu.core_type<tc>, window_params = [{transform_indices = @transform_0, window_bounds = array<i64: 96, 128>}, {pipeline_mode = #tpu.pipeline_mode<synchronous>, transform_indices = @transform_1, window_bounds = array<i64: 5, 84, 96>}, {pipeline_mode = #tpu.pipeline_mode<synchronous>, transform_indices = @transform_2, window_bounds = array<i64: 5, 84, 96>}, {pipeline_mode = #tpu.pipeline_mode<synchronous>, transform_indices = @transform_3, window_bounds = array<i64: 124, 56>}, {pipeline_mode = #tpu.pipeline_mode<synchronous>, transform_indices = @transform_4, window_bounds = array<i64: 124, 56>}, {pipeline_mode = #tpu.pipeline_mode<synchronous>, transform_indices = @transform_5, window_bounds = array<i64: 84, 1>}, {pipeline_mode = #tpu.pipeline_mode<synchronous>, transform_indices = @transform_6, window_bounds = array<i64: 5, 80, 84>}, {pipeline_mode = #tpu.pipeline_mode<synchronous>, transform_indices = @transform_7, window_bounds = array<i64: 5, 80, 84>}, {pipeline_mode = #tpu.pipeline_mode<synchronous>, transform_indices = @transform_8, window_bounds = array<i64: 52, 20>}, {pipeline_mode = #tpu.pipeline_mode<synchronous>, transform_indices = @transform_9, window_bounds = array<i64: 52, 20>}, {pipeline_mode = #tpu.pipeline_mode<synchronous>, transform_indices = @transform_10, window_bounds = array<i64: 80, 1>}, {pipeline_mode = #tpu.pipeline_mode<synchronous>, transform_indices = @transform_11, window_bounds = array<i64: 5, 120, 80>}, {pipeline_mode = #tpu.pipeline_mode<synchronous>, transform_indices = @transform_12, window_bounds = array<i64: 5, 20, 4>}, {pipeline_mode = #tpu.pipeline_mode<synchronous>, transform_indices = @transform_13, window_bounds = array<i64: 120, 1>}, {pipeline_mode = #tpu.pipeline_mode<synchronous>, transform_indices = @transform_14, window_bounds = array<i64: 84, 120>}, {pipeline_mode = #tpu.pipeline_mode<synchronous>, transform_indices = @transform_15, window_bounds = array<i64: 84, 1>}, {pipeline_mode = #tpu.pipeline_mode<synchronous>, transform_indices = @transform_16, window_bounds = array<i64: 10, 84>}, {pipeline_mode = #tpu.pipeline_mode<synchronous>, transform_indices = @transform_17, window_bounds = array<i64: 10, 1>}, {transform_indices = @transform_18, window_bounds = array<i64: 1, 10, 4>}]} {
    %c0 = arith.constant 0 : index
    %c0_0 = arith.constant 0 : index
    %0 = vector.load %arg1[%c0, %c0_0] : memref<96x128xf32, #tpu.memory_space<vmem>>, vector<96x128xf32>
    %cst = arith.constant 0.000000e+00 : f32
    %1 = vector.broadcast %cst : f32 to vector<84x124xf32>
    %cst_1 = arith.constant 0.000000e+00 : f32
    %2 = vector.broadcast %cst_1 : f32 to vector<84x124xf32>
    %3 = vector.extract_strided_slice %0 {offsets = [0, 0], sizes = [96, 124], strides = [1, 1]} : vector<96x128xf32> to vector<96x124xf32>
    %c0_2 = arith.constant 0 : index
    %c0_3 = arith.constant 0 : index
    %c0_4 = arith.constant 0 : index
    %4 = vector.load %arg2[%c0_2, %c0_3, %c0_4] : memref<5x84x96xf32, #tpu.memory_space<vmem>>, vector<1x84x96xf32>
    %5 = vector.shape_cast %4 : vector<1x84x96xf32> to vector<84x96xf32>
    %cst_5 = arith.constant dense<0.000000e+00> : vector<84x124xf32>
    %6 = tpu.matmul %5, %3, %cst_5 {dimension_numbers = #tpu.dot_dimension_numbers<[1], [0], [0], [1], [0, 0, 1, 1], [], []>} : vector<84x96xf32>, vector<96x124xf32>, vector<84x124xf32> -> vector<84x124xf32>
    %7 = arith.addf %1, %6 : vector<84x124xf32>
    %c0_6 = arith.constant 0 : index
    %c0_7 = arith.constant 0 : index
    %c0_8 = arith.constant 0 : index
    %8 = vector.load %arg3[%c0_6, %c0_7, %c0_8] : memref<5x84x96xf32, #tpu.memory_space<vmem>>, vector<1x84x96xf32>
    %9 = vector.shape_cast %8 : vector<1x84x96xf32> to vector<84x96xf32>
    %cst_9 = arith.constant dense<0.000000e+00> : vector<84x124xf32>
    %10 = tpu.matmul %9, %3, %cst_9 {dimension_numbers = #tpu.dot_dimension_numbers<[1], [0], [0], [1], [0, 0, 1, 1], [], []>} : vector<84x96xf32>, vector<96x124xf32>, vector<84x124xf32> -> vector<84x124xf32>
    %11 = arith.addf %2, %10 : vector<84x124xf32>
    %12 = vector.extract_strided_slice %0 {offsets = [0, 1], sizes = [96, 124], strides = [1, 1]} : vector<96x128xf32> to vector<96x124xf32>
    %c1 = arith.constant 1 : index
    %c0_10 = arith.constant 0 : index
    %c0_11 = arith.constant 0 : index
    %13 = vector.load %arg2[%c1, %c0_10, %c0_11] : memref<5x84x96xf32, #tpu.memory_space<vmem>>, vector<1x84x96xf32>
    %14 = vector.shape_cast %13 : vector<1x84x96xf32> to vector<84x96xf32>
    %cst_12 = arith.constant dense<0.000000e+00> : vector<84x124xf32>
    %15 = tpu.matmul %14, %12, %cst_12 {dimension_numbers = #tpu.dot_dimension_numbers<[1], [0], [0], [1], [0, 0, 1, 1], [], []>} : vector<84x96xf32>, vector<96x124xf32>, vector<84x124xf32> -> vector<84x124xf32>
    %16 = arith.addf %7, %15 : vector<84x124xf32>
    %c1_13 = arith.constant 1 : index
    %c0_14 = arith.constant 0 : index
    %c0_15 = arith.constant 0 : index
    %17 = vector.load %arg3[%c1_13, %c0_14, %c0_15] : memref<5x84x96xf32, #tpu.memory_space<vmem>>, vector<1x84x96xf32>
    %18 = vector.shape_cast %17 : vector<1x84x96xf32> to vector<84x96xf32>
    %cst_16 = arith.constant dense<0.000000e+00> : vector<84x124xf32>
    %19 = tpu.matmul %18, %12, %cst_16 {dimension_numbers = #tpu.dot_dimension_numbers<[1], [0], [0], [1], [0, 0, 1, 1], [], []>} : vector<84x96xf32>, vector<96x124xf32>, vector<84x124xf32> -> vector<84x124xf32>
    %20 = arith.addf %11, %19 : vector<84x124xf32>
    %21 = vector.extract_strided_slice %0 {offsets = [0, 2], sizes = [96, 124], strides = [1, 1]} : vector<96x128xf32> to vector<96x124xf32>
    %c2 = arith.constant 2 : index
    %c0_17 = arith.constant 0 : index
    %c0_18 = arith.constant 0 : index
    %22 = vector.load %arg2[%c2, %c0_17, %c0_18] : memref<5x84x96xf32, #tpu.memory_space<vmem>>, vector<1x84x96xf32>
    %23 = vector.shape_cast %22 : vector<1x84x96xf32> to vector<84x96xf32>
    %cst_19 = arith.constant dense<0.000000e+00> : vector<84x124xf32>
    %24 = tpu.matmul %23, %21, %cst_19 {dimension_numbers = #tpu.dot_dimension_numbers<[1], [0], [0], [1], [0, 0, 1, 1], [], []>} : vector<84x96xf32>, vector<96x124xf32>, vector<84x124xf32> -> vector<84x124xf32>
    %25 = arith.addf %16, %24 : vector<84x124xf32>
    %c2_20 = arith.constant 2 : index
    %c0_21 = arith.constant 0 : index
    %c0_22 = arith.constant 0 : index
    %26 = vector.load %arg3[%c2_20, %c0_21, %c0_22] : memref<5x84x96xf32, #tpu.memory_space<vmem>>, vector<1x84x96xf32>
    %27 = vector.shape_cast %26 : vector<1x84x96xf32> to vector<84x96xf32>
    %cst_23 = arith.constant dense<0.000000e+00> : vector<84x124xf32>
    %28 = tpu.matmul %27, %21, %cst_23 {dimension_numbers = #tpu.dot_dimension_numbers<[1], [0], [0], [1], [0, 0, 1, 1], [], []>} : vector<84x96xf32>, vector<96x124xf32>, vector<84x124xf32> -> vector<84x124xf32>
    %29 = arith.addf %20, %28 : vector<84x124xf32>
    %30 = vector.extract_strided_slice %0 {offsets = [0, 3], sizes = [96, 124], strides = [1, 1]} : vector<96x128xf32> to vector<96x124xf32>
    %c3 = arith.constant 3 : index
    %c0_24 = arith.constant 0 : index
    %c0_25 = arith.constant 0 : index
    %31 = vector.load %arg2[%c3, %c0_24, %c0_25] : memref<5x84x96xf32, #tpu.memory_space<vmem>>, vector<1x84x96xf32>
    %32 = vector.shape_cast %31 : vector<1x84x96xf32> to vector<84x96xf32>
    %cst_26 = arith.constant dense<0.000000e+00> : vector<84x124xf32>
    %33 = tpu.matmul %32, %30, %cst_26 {dimension_numbers = #tpu.dot_dimension_numbers<[1], [0], [0], [1], [0, 0, 1, 1], [], []>} : vector<84x96xf32>, vector<96x124xf32>, vector<84x124xf32> -> vector<84x124xf32>
    %34 = arith.addf %25, %33 : vector<84x124xf32>
    %c3_27 = arith.constant 3 : index
    %c0_28 = arith.constant 0 : index
    %c0_29 = arith.constant 0 : index
    %35 = vector.load %arg3[%c3_27, %c0_28, %c0_29] : memref<5x84x96xf32, #tpu.memory_space<vmem>>, vector<1x84x96xf32>
    %36 = vector.shape_cast %35 : vector<1x84x96xf32> to vector<84x96xf32>
    %cst_30 = arith.constant dense<0.000000e+00> : vector<84x124xf32>
    %37 = tpu.matmul %36, %30, %cst_30 {dimension_numbers = #tpu.dot_dimension_numbers<[1], [0], [0], [1], [0, 0, 1, 1], [], []>} : vector<84x96xf32>, vector<96x124xf32>, vector<84x124xf32> -> vector<84x124xf32>
    %38 = arith.addf %29, %37 : vector<84x124xf32>
    %39 = vector.extract_strided_slice %0 {offsets = [0, 4], sizes = [96, 124], strides = [1, 1]} : vector<96x128xf32> to vector<96x124xf32>
    %c4 = arith.constant 4 : index
    %c0_31 = arith.constant 0 : index
    %c0_32 = arith.constant 0 : index
    %40 = vector.load %arg2[%c4, %c0_31, %c0_32] : memref<5x84x96xf32, #tpu.memory_space<vmem>>, vector<1x84x96xf32>
    %41 = vector.shape_cast %40 : vector<1x84x96xf32> to vector<84x96xf32>
    %cst_33 = arith.constant dense<0.000000e+00> : vector<84x124xf32>
    %42 = tpu.matmul %41, %39, %cst_33 {dimension_numbers = #tpu.dot_dimension_numbers<[1], [0], [0], [1], [0, 0, 1, 1], [], []>} : vector<84x96xf32>, vector<96x124xf32>, vector<84x124xf32> -> vector<84x124xf32>
    %43 = arith.addf %34, %42 : vector<84x124xf32>
    %c4_34 = arith.constant 4 : index
    %c0_35 = arith.constant 0 : index
    %c0_36 = arith.constant 0 : index
    %44 = vector.load %arg3[%c4_34, %c0_35, %c0_36] : memref<5x84x96xf32, #tpu.memory_space<vmem>>, vector<1x84x96xf32>
    %45 = vector.shape_cast %44 : vector<1x84x96xf32> to vector<84x96xf32>
    %cst_37 = arith.constant dense<0.000000e+00> : vector<84x124xf32>
    %46 = tpu.matmul %45, %39, %cst_37 {dimension_numbers = #tpu.dot_dimension_numbers<[1], [0], [0], [1], [0, 0, 1, 1], [], []>} : vector<84x96xf32>, vector<96x124xf32>, vector<84x124xf32> -> vector<84x124xf32>
    %47 = arith.addf %38, %46 : vector<84x124xf32>
    %48 = arith.maximumf %43, %47 : vector<84x124xf32>
    %c0_38 = arith.constant 0 : index
    %c0_39 = arith.constant 0 : index
    %49 = vector.load %arg4[%c0_38, %c0_39] : memref<124x56xf32, #tpu.memory_space<vmem>>, vector<124x56xf32>
    %cst_40 = arith.constant dense<0.000000e+00> : vector<84x56xf32>
    %50 = tpu.matmul %48, %49, %cst_40 {dimension_numbers = #tpu.dot_dimension_numbers<[1], [0], [0], [1], [0, 0, 1, 1], [], []>} : vector<84x124xf32>, vector<124x56xf32>, vector<84x56xf32> -> vector<84x56xf32>
    %c0_41 = arith.constant 0 : index
    %c0_42 = arith.constant 0 : index
    %51 = vector.load %arg5[%c0_41, %c0_42] : memref<124x56xf32, #tpu.memory_space<vmem>>, vector<124x56xf32>
    %cst_43 = arith.constant dense<0.000000e+00> : vector<84x56xf32>
    %52 = tpu.matmul %48, %51, %cst_43 {dimension_numbers = #tpu.dot_dimension_numbers<[1], [0], [0], [1], [0, 0, 1, 1], [], []>} : vector<84x124xf32>, vector<124x56xf32>, vector<84x56xf32> -> vector<84x56xf32>
    %53 = arith.maximumf %50, %52 : vector<84x56xf32>
    %c0_44 = arith.constant 0 : index
    %c0_45 = arith.constant 0 : index
    %54 = vector.load %arg6[%c0_44, %c0_45] : memref<84x1xf32, #tpu.memory_space<vmem>>, vector<84x1xf32>
    %55 = vector.broadcast %54 : vector<84x1xf32> to vector<84x56xf32>
    %56 = arith.addf %53, %55 : vector<84x56xf32>
    %cst_46 = arith.constant 0.000000e+00 : f32
    %57 = vector.broadcast %cst_46 : f32 to vector<84x56xf32>
    %58 = arith.maximumf %56, %57 : vector<84x56xf32>
    %cst_47 = arith.constant 0.000000e+00 : f32
    %59 = vector.broadcast %cst_47 : f32 to vector<80x52xf32>
    %cst_48 = arith.constant 0.000000e+00 : f32
    %60 = vector.broadcast %cst_48 : f32 to vector<80x52xf32>
    %61 = vector.extract_strided_slice %58 {offsets = [0, 0], sizes = [84, 52], strides = [1, 1]} : vector<84x56xf32> to vector<84x52xf32>
    %c0_49 = arith.constant 0 : index
    %c0_50 = arith.constant 0 : index
    %c0_51 = arith.constant 0 : index
    %62 = vector.load %arg7[%c0_49, %c0_50, %c0_51] : memref<5x80x84xf32, #tpu.memory_space<vmem>>, vector<1x80x84xf32>
    %63 = vector.shape_cast %62 : vector<1x80x84xf32> to vector<80x84xf32>
    %cst_52 = arith.constant dense<0.000000e+00> : vector<80x52xf32>
    %64 = tpu.matmul %63, %61, %cst_52 {dimension_numbers = #tpu.dot_dimension_numbers<[1], [0], [0], [1], [0, 0, 1, 1], [], []>} : vector<80x84xf32>, vector<84x52xf32>, vector<80x52xf32> -> vector<80x52xf32>
    %65 = arith.addf %59, %64 : vector<80x52xf32>
    %c0_53 = arith.constant 0 : index
    %c0_54 = arith.constant 0 : index
    %c0_55 = arith.constant 0 : index
    %66 = vector.load %arg8[%c0_53, %c0_54, %c0_55] : memref<5x80x84xf32, #tpu.memory_space<vmem>>, vector<1x80x84xf32>
    %67 = vector.shape_cast %66 : vector<1x80x84xf32> to vector<80x84xf32>
    %cst_56 = arith.constant dense<0.000000e+00> : vector<80x52xf32>
    %68 = tpu.matmul %67, %61, %cst_56 {dimension_numbers = #tpu.dot_dimension_numbers<[1], [0], [0], [1], [0, 0, 1, 1], [], []>} : vector<80x84xf32>, vector<84x52xf32>, vector<80x52xf32> -> vector<80x52xf32>
    %69 = arith.addf %60, %68 : vector<80x52xf32>
    %70 = vector.extract_strided_slice %58 {offsets = [0, 1], sizes = [84, 52], strides = [1, 1]} : vector<84x56xf32> to vector<84x52xf32>
    %c1_57 = arith.constant 1 : index
    %c0_58 = arith.constant 0 : index
    %c0_59 = arith.constant 0 : index
    %71 = vector.load %arg7[%c1_57, %c0_58, %c0_59] : memref<5x80x84xf32, #tpu.memory_space<vmem>>, vector<1x80x84xf32>
    %72 = vector.shape_cast %71 : vector<1x80x84xf32> to vector<80x84xf32>
    %cst_60 = arith.constant dense<0.000000e+00> : vector<80x52xf32>
    %73 = tpu.matmul %72, %70, %cst_60 {dimension_numbers = #tpu.dot_dimension_numbers<[1], [0], [0], [1], [0, 0, 1, 1], [], []>} : vector<80x84xf32>, vector<84x52xf32>, vector<80x52xf32> -> vector<80x52xf32>
    %74 = arith.addf %65, %73 : vector<80x52xf32>
    %c1_61 = arith.constant 1 : index
    %c0_62 = arith.constant 0 : index
    %c0_63 = arith.constant 0 : index
    %75 = vector.load %arg8[%c1_61, %c0_62, %c0_63] : memref<5x80x84xf32, #tpu.memory_space<vmem>>, vector<1x80x84xf32>
    %76 = vector.shape_cast %75 : vector<1x80x84xf32> to vector<80x84xf32>
    %cst_64 = arith.constant dense<0.000000e+00> : vector<80x52xf32>
    %77 = tpu.matmul %76, %70, %cst_64 {dimension_numbers = #tpu.dot_dimension_numbers<[1], [0], [0], [1], [0, 0, 1, 1], [], []>} : vector<80x84xf32>, vector<84x52xf32>, vector<80x52xf32> -> vector<80x52xf32>
    %78 = arith.addf %69, %77 : vector<80x52xf32>
    %79 = vector.extract_strided_slice %58 {offsets = [0, 2], sizes = [84, 52], strides = [1, 1]} : vector<84x56xf32> to vector<84x52xf32>
    %c2_65 = arith.constant 2 : index
    %c0_66 = arith.constant 0 : index
    %c0_67 = arith.constant 0 : index
    %80 = vector.load %arg7[%c2_65, %c0_66, %c0_67] : memref<5x80x84xf32, #tpu.memory_space<vmem>>, vector<1x80x84xf32>
    %81 = vector.shape_cast %80 : vector<1x80x84xf32> to vector<80x84xf32>
    %cst_68 = arith.constant dense<0.000000e+00> : vector<80x52xf32>
    %82 = tpu.matmul %81, %79, %cst_68 {dimension_numbers = #tpu.dot_dimension_numbers<[1], [0], [0], [1], [0, 0, 1, 1], [], []>} : vector<80x84xf32>, vector<84x52xf32>, vector<80x52xf32> -> vector<80x52xf32>
    %83 = arith.addf %74, %82 : vector<80x52xf32>
    %c2_69 = arith.constant 2 : index
    %c0_70 = arith.constant 0 : index
    %c0_71 = arith.constant 0 : index
    %84 = vector.load %arg8[%c2_69, %c0_70, %c0_71] : memref<5x80x84xf32, #tpu.memory_space<vmem>>, vector<1x80x84xf32>
    %85 = vector.shape_cast %84 : vector<1x80x84xf32> to vector<80x84xf32>
    %cst_72 = arith.constant dense<0.000000e+00> : vector<80x52xf32>
    %86 = tpu.matmul %85, %79, %cst_72 {dimension_numbers = #tpu.dot_dimension_numbers<[1], [0], [0], [1], [0, 0, 1, 1], [], []>} : vector<80x84xf32>, vector<84x52xf32>, vector<80x52xf32> -> vector<80x52xf32>
    %87 = arith.addf %78, %86 : vector<80x52xf32>
    %88 = vector.extract_strided_slice %58 {offsets = [0, 3], sizes = [84, 52], strides = [1, 1]} : vector<84x56xf32> to vector<84x52xf32>
    %c3_73 = arith.constant 3 : index
    %c0_74 = arith.constant 0 : index
    %c0_75 = arith.constant 0 : index
    %89 = vector.load %arg7[%c3_73, %c0_74, %c0_75] : memref<5x80x84xf32, #tpu.memory_space<vmem>>, vector<1x80x84xf32>
    %90 = vector.shape_cast %89 : vector<1x80x84xf32> to vector<80x84xf32>
    %cst_76 = arith.constant dense<0.000000e+00> : vector<80x52xf32>
    %91 = tpu.matmul %90, %88, %cst_76 {dimension_numbers = #tpu.dot_dimension_numbers<[1], [0], [0], [1], [0, 0, 1, 1], [], []>} : vector<80x84xf32>, vector<84x52xf32>, vector<80x52xf32> -> vector<80x52xf32>
    %92 = arith.addf %83, %91 : vector<80x52xf32>
    %c3_77 = arith.constant 3 : index
    %c0_78 = arith.constant 0 : index
    %c0_79 = arith.constant 0 : index
    %93 = vector.load %arg8[%c3_77, %c0_78, %c0_79] : memref<5x80x84xf32, #tpu.memory_space<vmem>>, vector<1x80x84xf32>
    %94 = vector.shape_cast %93 : vector<1x80x84xf32> to vector<80x84xf32>
    %cst_80 = arith.constant dense<0.000000e+00> : vector<80x52xf32>
    %95 = tpu.matmul %94, %88, %cst_80 {dimension_numbers = #tpu.dot_dimension_numbers<[1], [0], [0], [1], [0, 0, 1, 1], [], []>} : vector<80x84xf32>, vector<84x52xf32>, vector<80x52xf32> -> vector<80x52xf32>
    %96 = arith.addf %87, %95 : vector<80x52xf32>
    %97 = vector.extract_strided_slice %58 {offsets = [0, 4], sizes = [84, 52], strides = [1, 1]} : vector<84x56xf32> to vector<84x52xf32>
    %c4_81 = arith.constant 4 : index
    %c0_82 = arith.constant 0 : index
    %c0_83 = arith.constant 0 : index
    %98 = vector.load %arg7[%c4_81, %c0_82, %c0_83] : memref<5x80x84xf32, #tpu.memory_space<vmem>>, vector<1x80x84xf32>
    %99 = vector.shape_cast %98 : vector<1x80x84xf32> to vector<80x84xf32>
    %cst_84 = arith.constant dense<0.000000e+00> : vector<80x52xf32>
    %100 = tpu.matmul %99, %97, %cst_84 {dimension_numbers = #tpu.dot_dimension_numbers<[1], [0], [0], [1], [0, 0, 1, 1], [], []>} : vector<80x84xf32>, vector<84x52xf32>, vector<80x52xf32> -> vector<80x52xf32>
    %101 = arith.addf %92, %100 : vector<80x52xf32>
    %c4_85 = arith.constant 4 : index
    %c0_86 = arith.constant 0 : index
    %c0_87 = arith.constant 0 : index
    %102 = vector.load %arg8[%c4_85, %c0_86, %c0_87] : memref<5x80x84xf32, #tpu.memory_space<vmem>>, vector<1x80x84xf32>
    %103 = vector.shape_cast %102 : vector<1x80x84xf32> to vector<80x84xf32>
    %cst_88 = arith.constant dense<0.000000e+00> : vector<80x52xf32>
    %104 = tpu.matmul %103, %97, %cst_88 {dimension_numbers = #tpu.dot_dimension_numbers<[1], [0], [0], [1], [0, 0, 1, 1], [], []>} : vector<80x84xf32>, vector<84x52xf32>, vector<80x52xf32> -> vector<80x52xf32>
    %105 = arith.addf %96, %104 : vector<80x52xf32>
    %106 = arith.maximumf %101, %105 : vector<80x52xf32>
    %c0_89 = arith.constant 0 : index
    %c0_90 = arith.constant 0 : index
    %107 = vector.load %arg9[%c0_89, %c0_90] : memref<52x20xf32, #tpu.memory_space<vmem>>, vector<52x20xf32>
    %cst_91 = arith.constant dense<0.000000e+00> : vector<80x20xf32>
    %108 = tpu.matmul %106, %107, %cst_91 {dimension_numbers = #tpu.dot_dimension_numbers<[1], [0], [0], [1], [0, 0, 1, 1], [], []>} : vector<80x52xf32>, vector<52x20xf32>, vector<80x20xf32> -> vector<80x20xf32>
    %c0_92 = arith.constant 0 : index
    %c0_93 = arith.constant 0 : index
    %109 = vector.load %arg10[%c0_92, %c0_93] : memref<52x20xf32, #tpu.memory_space<vmem>>, vector<52x20xf32>
    %cst_94 = arith.constant dense<0.000000e+00> : vector<80x20xf32>
    %110 = tpu.matmul %106, %109, %cst_94 {dimension_numbers = #tpu.dot_dimension_numbers<[1], [0], [0], [1], [0, 0, 1, 1], [], []>} : vector<80x52xf32>, vector<52x20xf32>, vector<80x20xf32> -> vector<80x20xf32>
    %111 = arith.maximumf %108, %110 : vector<80x20xf32>
    %c0_95 = arith.constant 0 : index
    %c0_96 = arith.constant 0 : index
    %112 = vector.load %arg11[%c0_95, %c0_96] : memref<80x1xf32, #tpu.memory_space<vmem>>, vector<80x1xf32>
    %113 = vector.broadcast %112 : vector<80x1xf32> to vector<80x20xf32>
    %114 = arith.addf %111, %113 : vector<80x20xf32>
    %cst_97 = arith.constant 0.000000e+00 : f32
    %115 = vector.broadcast %cst_97 : f32 to vector<80x20xf32>
    %116 = arith.maximumf %114, %115 : vector<80x20xf32>
    %c0_98 = arith.constant 0 : index
    %c0_99 = arith.constant 0 : index
    %117 = vector.load %arg14[%c0_98, %c0_99] : memref<120x1xf32, #tpu.memory_space<vmem>>, vector<120x1xf32>
    %c0_100 = arith.constant 0 : index
    %c0_101 = arith.constant 0 : index
    %c0_102 = arith.constant 0 : index
    %118 = vector.load %arg13[%c0_100, %c0_101, %c0_102] : memref<5x20x4xf32, #tpu.memory_space<vmem>>, vector<1x20x4xf32>
    %119 = vector.shape_cast %118 : vector<1x20x4xf32> to vector<20x4xf32>
    %cst_103 = arith.constant dense<0.000000e+00> : vector<80x4xf32>
    %120 = tpu.matmul %116, %119, %cst_103 {dimension_numbers = #tpu.dot_dimension_numbers<[1], [0], [0], [1], [0, 0, 1, 1], [], []>} : vector<80x20xf32>, vector<20x4xf32>, vector<80x4xf32> -> vector<80x4xf32>
    %c0_104 = arith.constant 0 : index
    %c0_105 = arith.constant 0 : index
    %c0_106 = arith.constant 0 : index
    %121 = vector.load %arg12[%c0_104, %c0_105, %c0_106] : memref<5x120x80xf32, #tpu.memory_space<vmem>>, vector<1x120x80xf32>
    %122 = vector.shape_cast %121 : vector<1x120x80xf32> to vector<120x80xf32>
    %cst_107 = arith.constant dense<0.000000e+00> : vector<120x4xf32>
    %123 = tpu.matmul %122, %120, %cst_107 {dimension_numbers = #tpu.dot_dimension_numbers<[1], [0], [0], [1], [0, 0, 1, 1], [], []>} : vector<120x80xf32>, vector<80x4xf32>, vector<120x4xf32> -> vector<120x4xf32>
    %124 = vector.broadcast %117 : vector<120x1xf32> to vector<120x4xf32>
    %125 = arith.addf %124, %123 : vector<120x4xf32>
    %c1_108 = arith.constant 1 : index
    %c0_109 = arith.constant 0 : index
    %c0_110 = arith.constant 0 : index
    %126 = vector.load %arg13[%c1_108, %c0_109, %c0_110] : memref<5x20x4xf32, #tpu.memory_space<vmem>>, vector<1x20x4xf32>
    %127 = vector.shape_cast %126 : vector<1x20x4xf32> to vector<20x4xf32>
    %cst_111 = arith.constant dense<0.000000e+00> : vector<80x4xf32>
    %128 = tpu.matmul %116, %127, %cst_111 {dimension_numbers = #tpu.dot_dimension_numbers<[1], [0], [0], [1], [0, 0, 1, 1], [], []>} : vector<80x20xf32>, vector<20x4xf32>, vector<80x4xf32> -> vector<80x4xf32>
    %c1_112 = arith.constant 1 : index
    %c0_113 = arith.constant 0 : index
    %c0_114 = arith.constant 0 : index
    %129 = vector.load %arg12[%c1_112, %c0_113, %c0_114] : memref<5x120x80xf32, #tpu.memory_space<vmem>>, vector<1x120x80xf32>
    %130 = vector.shape_cast %129 : vector<1x120x80xf32> to vector<120x80xf32>
    %cst_115 = arith.constant dense<0.000000e+00> : vector<120x4xf32>
    %131 = tpu.matmul %130, %128, %cst_115 {dimension_numbers = #tpu.dot_dimension_numbers<[1], [0], [0], [1], [0, 0, 1, 1], [], []>} : vector<120x80xf32>, vector<80x4xf32>, vector<120x4xf32> -> vector<120x4xf32>
    %132 = arith.addf %125, %131 : vector<120x4xf32>
    %c2_116 = arith.constant 2 : index
    %c0_117 = arith.constant 0 : index
    %c0_118 = arith.constant 0 : index
    %133 = vector.load %arg13[%c2_116, %c0_117, %c0_118] : memref<5x20x4xf32, #tpu.memory_space<vmem>>, vector<1x20x4xf32>
    %134 = vector.shape_cast %133 : vector<1x20x4xf32> to vector<20x4xf32>
    %cst_119 = arith.constant dense<0.000000e+00> : vector<80x4xf32>
    %135 = tpu.matmul %116, %134, %cst_119 {dimension_numbers = #tpu.dot_dimension_numbers<[1], [0], [0], [1], [0, 0, 1, 1], [], []>} : vector<80x20xf32>, vector<20x4xf32>, vector<80x4xf32> -> vector<80x4xf32>
    %c2_120 = arith.constant 2 : index
    %c0_121 = arith.constant 0 : index
    %c0_122 = arith.constant 0 : index
    %136 = vector.load %arg12[%c2_120, %c0_121, %c0_122] : memref<5x120x80xf32, #tpu.memory_space<vmem>>, vector<1x120x80xf32>
    %137 = vector.shape_cast %136 : vector<1x120x80xf32> to vector<120x80xf32>
    %cst_123 = arith.constant dense<0.000000e+00> : vector<120x4xf32>
    %138 = tpu.matmul %137, %135, %cst_123 {dimension_numbers = #tpu.dot_dimension_numbers<[1], [0], [0], [1], [0, 0, 1, 1], [], []>} : vector<120x80xf32>, vector<80x4xf32>, vector<120x4xf32> -> vector<120x4xf32>
    %139 = arith.addf %132, %138 : vector<120x4xf32>
    %c3_124 = arith.constant 3 : index
    %c0_125 = arith.constant 0 : index
    %c0_126 = arith.constant 0 : index
    %140 = vector.load %arg13[%c3_124, %c0_125, %c0_126] : memref<5x20x4xf32, #tpu.memory_space<vmem>>, vector<1x20x4xf32>
    %141 = vector.shape_cast %140 : vector<1x20x4xf32> to vector<20x4xf32>
    %cst_127 = arith.constant dense<0.000000e+00> : vector<80x4xf32>
    %142 = tpu.matmul %116, %141, %cst_127 {dimension_numbers = #tpu.dot_dimension_numbers<[1], [0], [0], [1], [0, 0, 1, 1], [], []>} : vector<80x20xf32>, vector<20x4xf32>, vector<80x4xf32> -> vector<80x4xf32>
    %c3_128 = arith.constant 3 : index
    %c0_129 = arith.constant 0 : index
    %c0_130 = arith.constant 0 : index
    %143 = vector.load %arg12[%c3_128, %c0_129, %c0_130] : memref<5x120x80xf32, #tpu.memory_space<vmem>>, vector<1x120x80xf32>
    %144 = vector.shape_cast %143 : vector<1x120x80xf32> to vector<120x80xf32>
    %cst_131 = arith.constant dense<0.000000e+00> : vector<120x4xf32>
    %145 = tpu.matmul %144, %142, %cst_131 {dimension_numbers = #tpu.dot_dimension_numbers<[1], [0], [0], [1], [0, 0, 1, 1], [], []>} : vector<120x80xf32>, vector<80x4xf32>, vector<120x4xf32> -> vector<120x4xf32>
    %146 = arith.addf %139, %145 : vector<120x4xf32>
    %c4_132 = arith.constant 4 : index
    %c0_133 = arith.constant 0 : index
    %c0_134 = arith.constant 0 : index
    %147 = vector.load %arg13[%c4_132, %c0_133, %c0_134] : memref<5x20x4xf32, #tpu.memory_space<vmem>>, vector<1x20x4xf32>
    %148 = vector.shape_cast %147 : vector<1x20x4xf32> to vector<20x4xf32>
    %cst_135 = arith.constant dense<0.000000e+00> : vector<80x4xf32>
    %149 = tpu.matmul %116, %148, %cst_135 {dimension_numbers = #tpu.dot_dimension_numbers<[1], [0], [0], [1], [0, 0, 1, 1], [], []>} : vector<80x20xf32>, vector<20x4xf32>, vector<80x4xf32> -> vector<80x4xf32>
    %c4_136 = arith.constant 4 : index
    %c0_137 = arith.constant 0 : index
    %c0_138 = arith.constant 0 : index
    %150 = vector.load %arg12[%c4_136, %c0_137, %c0_138] : memref<5x120x80xf32, #tpu.memory_space<vmem>>, vector<1x120x80xf32>
    %151 = vector.shape_cast %150 : vector<1x120x80xf32> to vector<120x80xf32>
    %cst_139 = arith.constant dense<0.000000e+00> : vector<120x4xf32>
    %152 = tpu.matmul %151, %149, %cst_139 {dimension_numbers = #tpu.dot_dimension_numbers<[1], [0], [0], [1], [0, 0, 1, 1], [], []>} : vector<120x80xf32>, vector<80x4xf32>, vector<120x4xf32> -> vector<120x4xf32>
    %153 = arith.addf %146, %152 : vector<120x4xf32>
    %cst_140 = arith.constant 0.000000e+00 : f32
    %154 = vector.broadcast %cst_140 : f32 to vector<120x4xf32>
    %155 = arith.maximumf %153, %154 : vector<120x4xf32>
    %c0_141 = arith.constant 0 : index
    %c0_142 = arith.constant 0 : index
    %156 = vector.load %arg15[%c0_141, %c0_142] : memref<84x120xf32, #tpu.memory_space<vmem>>, vector<84x120xf32>
    %cst_143 = arith.constant dense<0.000000e+00> : vector<84x4xf32>
    %157 = tpu.matmul %156, %155, %cst_143 {dimension_numbers = #tpu.dot_dimension_numbers<[1], [0], [0], [1], [0, 0, 1, 1], [], []>} : vector<84x120xf32>, vector<120x4xf32>, vector<84x4xf32> -> vector<84x4xf32>
    %c0_144 = arith.constant 0 : index
    %c0_145 = arith.constant 0 : index
    %158 = vector.load %arg16[%c0_144, %c0_145] : memref<84x1xf32, #tpu.memory_space<vmem>>, vector<84x1xf32>
    %159 = vector.broadcast %158 : vector<84x1xf32> to vector<84x4xf32>
    %160 = arith.addf %157, %159 : vector<84x4xf32>
    %cst_146 = arith.constant 0.000000e+00 : f32
    %161 = vector.broadcast %cst_146 : f32 to vector<84x4xf32>
    %162 = arith.maximumf %160, %161 : vector<84x4xf32>
    %c0_147 = arith.constant 0 : index
    %c0_148 = arith.constant 0 : index
    %163 = vector.load %arg17[%c0_147, %c0_148] : memref<10x84xf32, #tpu.memory_space<vmem>>, vector<10x84xf32>
    %cst_149 = arith.constant dense<0.000000e+00> : vector<10x4xf32>
    %164 = tpu.matmul %163, %162, %cst_149 {dimension_numbers = #tpu.dot_dimension_numbers<[1], [0], [0], [1], [0, 0, 1, 1], [], []>} : vector<10x84xf32>, vector<84x4xf32>, vector<10x4xf32> -> vector<10x4xf32>
    %c0_150 = arith.constant 0 : index
    %c0_151 = arith.constant 0 : index
    %165 = vector.load %arg18[%c0_150, %c0_151] : memref<10x1xf32, #tpu.memory_space<vmem>>, vector<10x1xf32>
    %166 = vector.broadcast %165 : vector<10x1xf32> to vector<10x4xf32>
    %167 = arith.addf %164, %166 : vector<10x4xf32>
    %c0_152 = arith.constant 0 : index
    %c0_153 = arith.constant 0 : index
    %c0_154 = arith.constant 0 : index
    %168 = vector.load %arg19[%c0_152, %c0_153, %c0_154] : memref<1x10x4xf32, #tpu.memory_space<vmem>>, vector<1x10x4xf32>
    %169 = vector.shape_cast %168 : vector<1x10x4xf32> to vector<10x4xf32>
    %170 = vector.shape_cast %167 : vector<10x4xf32> to vector<1x10x4xf32>
    tpu.vector_store %arg19[%c0_152, %c0_153, %c0_154], %170 {strides = array<i32>} : memref<1x10x4xf32, #tpu.memory_space<vmem>>, vector<1x10x4xf32>,
    return
  }
  func.func @transform_0(%arg0: i32) -> (i32, i32) {
    %c0_i32 = arith.constant 0 : i32
    %c0_i32_0 = arith.constant 0 : i32
    return %c0_i32, %arg0 : i32, i32
  }
  func.func @transform_1(%arg0: i32) -> (i32, i32, i32) {
    %c0_i32 = arith.constant 0 : i32
    %c0_i32_0 = arith.constant 0 : i32
    %c0_i32_1 = arith.constant 0 : i32
    %c0_i32_2 = arith.constant 0 : i32
    return %c0_i32, %c0_i32_0, %c0_i32_1 : i32, i32, i32
  }
  func.func @transform_2(%arg0: i32) -> (i32, i32, i32) {
    %c0_i32 = arith.constant 0 : i32
    %c0_i32_0 = arith.constant 0 : i32
    %c0_i32_1 = arith.constant 0 : i32
    %c0_i32_2 = arith.constant 0 : i32
    return %c0_i32, %c0_i32_0, %c0_i32_1 : i32, i32, i32
  }
  func.func @transform_3(%arg0: i32) -> (i32, i32) {
    %c0_i32 = arith.constant 0 : i32
    %c0_i32_0 = arith.constant 0 : i32
    %c0_i32_1 = arith.constant 0 : i32
    return %c0_i32, %c0_i32_0 : i32, i32
  }
  func.func @transform_4(%arg0: i32) -> (i32, i32) {
    %c0_i32 = arith.constant 0 : i32
    %c0_i32_0 = arith.constant 0 : i32
    %c0_i32_1 = arith.constant 0 : i32
    return %c0_i32, %c0_i32_0 : i32, i32
  }
  func.func @transform_5(%arg0: i32) -> (i32, i32) {
    %c0_i32 = arith.constant 0 : i32
    %c0_i32_0 = arith.constant 0 : i32
    %c0_i32_1 = arith.constant 0 : i32
    return %c0_i32, %c0_i32_0 : i32, i32
  }
  func.func @transform_6(%arg0: i32) -> (i32, i32, i32) {
    %c0_i32 = arith.constant 0 : i32
    %c0_i32_0 = arith.constant 0 : i32
    %c0_i32_1 = arith.constant 0 : i32
    %c0_i32_2 = arith.constant 0 : i32
    return %c0_i32, %c0_i32_0, %c0_i32_1 : i32, i32, i32
  }
  func.func @transform_7(%arg0: i32) -> (i32, i32, i32) {
    %c0_i32 = arith.constant 0 : i32
    %c0_i32_0 = arith.constant 0 : i32
    %c0_i32_1 = arith.constant 0 : i32
    %c0_i32_2 = arith.constant 0 : i32
    return %c0_i32, %c0_i32_0, %c0_i32_1 : i32, i32, i32
  }
  func.func @transform_8(%arg0: i32) -> (i32, i32) {
    %c0_i32 = arith.constant 0 : i32
    %c0_i32_0 = arith.constant 0 : i32
    %c0_i32_1 = arith.constant 0 : i32
    return %c0_i32, %c0_i32_0 : i32, i32
  }
  func.func @transform_9(%arg0: i32) -> (i32, i32) {
    %c0_i32 = arith.constant 0 : i32
    %c0_i32_0 = arith.constant 0 : i32
    %c0_i32_1 = arith.constant 0 : i32
    return %c0_i32, %c0_i32_0 : i32, i32
  }
  func.func @transform_10(%arg0: i32) -> (i32, i32) {
    %c0_i32 = arith.constant 0 : i32
    %c0_i32_0 = arith.constant 0 : i32
    %c0_i32_1 = arith.constant 0 : i32
    return %c0_i32, %c0_i32_0 : i32, i32
  }
  func.func @transform_11(%arg0: i32) -> (i32, i32, i32) {
    %c0_i32 = arith.constant 0 : i32
    %c0_i32_0 = arith.constant 0 : i32
    %c0_i32_1 = arith.constant 0 : i32
    %c0_i32_2 = arith.constant 0 : i32
    return %c0_i32, %c0_i32_0, %c0_i32_1 : i32, i32, i32
  }
  func.func @transform_12(%arg0: i32) -> (i32, i32, i32) {
    %c0_i32 = arith.constant 0 : i32
    %c0_i32_0 = arith.constant 0 : i32
    %c0_i32_1 = arith.constant 0 : i32
    %c0_i32_2 = arith.constant 0 : i32
    return %c0_i32, %c0_i32_0, %c0_i32_1 : i32, i32, i32
  }
  func.func @transform_13(%arg0: i32) -> (i32, i32) {
    %c0_i32 = arith.constant 0 : i32
    %c0_i32_0 = arith.constant 0 : i32
    %c0_i32_1 = arith.constant 0 : i32
    return %c0_i32, %c0_i32_0 : i32, i32
  }
  func.func @transform_14(%arg0: i32) -> (i32, i32) {
    %c0_i32 = arith.constant 0 : i32
    %c0_i32_0 = arith.constant 0 : i32
    %c0_i32_1 = arith.constant 0 : i32
    return %c0_i32, %c0_i32_0 : i32, i32
  }
  func.func @transform_15(%arg0: i32) -> (i32, i32) {
    %c0_i32 = arith.constant 0 : i32
    %c0_i32_0 = arith.constant 0 : i32
    %c0_i32_1 = arith.constant 0 : i32
    return %c0_i32, %c0_i32_0 : i32, i32
  }
  func.func @transform_16(%arg0: i32) -> (i32, i32) {
    %c0_i32 = arith.constant 0 : i32
    %c0_i32_0 = arith.constant 0 : i32
    %c0_i32_1 = arith.constant 0 : i32
    return %c0_i32, %c0_i32_0 : i32, i32
  }
  func.func @transform_17(%arg0: i32) -> (i32, i32) {
    %c0_i32 = arith.constant 0 : i32
    %c0_i32_0 = arith.constant 0 : i32
    %c0_i32_1 = arith.constant 0 : i32
    return %c0_i32, %c0_i32_0 : i32, i32
  }
  func.func @transform_18(%arg0: i32) -> (i32, i32, i32) {
    %c0_i32 = arith.constant 0 : i32
    %c0_i32_0 = arith.constant 0 : i32
    %c0_i32_1 = arith.constant 0 : i32
    return %arg0, %c0_i32, %c0_i32_0 : i32, i32, i32
  }
}

</mosaic_0001>

<bundles_post_ra>
// kernel: cnn01_forward.1
= control target key start
LH: loop header
LB: loop body
LE: loop exit
PB: predicated region body
PF: predicated region fallthrough
CT: control target
= control target key end

     0   :  { %s5076_s23 = smov 127   ;;  %vm153_vm0 = vcmask 785408   ;;  %s5079_s20 = smov 124   ;;  %vm1303_vm1 = vcmask 1043456   ;;  %vm1269_vm2 = vcmask 1014784   ;;  %vm1599_vm3 = vcmask 687104   ;;  %s7599_s0 = inlined_call_operand.vmem [shape: f32[96,128], index: 0, kind: input, shape index: {}]   ;;  %s7600_s1 = inlined_call_operand.vmem [shape: f32[5,84,96], index: 1, kind: input, shape index: {}]   ;;  %s7601_s2 = inlined_call_operand.vmem [shape: f32[5,84,96], index: 2, kind: input, shape index: {}]   ;;  %s7602_s3 = inlined_call_operand.vmem [shape: f32[124,56], index: 3, kind: input, shape index: {}]   ;;  %s7603_s4 = inlined_call_operand.vmem [shape: f32[124,56], index: 4, kind: input, shape index: {}]   ;;  %s7604_s5 = inlined_call_operand.vmem [shape: f32[84,1], index: 5, kind: input, shape index: {}]   ;;  %s7605_s10 = inlined_call_operand.vmem [shape: f32[80,1], index: 10, kind: input, shape index: {}]   ;;  %s7606_s6 = inlined_call_operand.vmem [shape: f32[5,80,84], index: 6, kind: input, shape index: {}]   ;;  %s7607_s13 = inlined_call_operand.vmem [shape: f32[120,1], index: 13, kind: input, shape index: {}]   ;;  %s7608_s7 = inlined_call_operand.vmem [shape: f32[5,80,84], index: 7, kind: input, shape index: {}]   ;;  %s7609_s15 = inlined_call_operand.vmem [shape: f32[84,1], index: 15, kind: input, shape index: {}]   ;;  %s7610_s17 = inlined_call_operand.vmem [shape: f32[10,1], index: 17, kind: input, shape index: {}]   ;;  %s7611_s8 = inlined_call_operand.vmem [shape: f32[52,20], index: 8, kind: input, shape index: {}]   ;;  %s7612_s9 = inlined_call_operand.vmem [shape: f32[52,20], index: 9, kind: input, shape index: {}]   ;;  %s7613_s12 = inlined_call_operand.vmem [shape: f32[5,20,4], index: 12, kind: input, shape index: {}]   ;;  %s7614_s11 = inlined_call_operand.vmem [shape: f32[5,120,80], index: 11, kind: input, shape index: {}]   ;;  %s7615_s14 = inlined_call_operand.vmem [shape: f32[84,120], index: 14, kind: input, shape index: {}]   ;;  %s7616_s16 = inlined_call_operand.vmem [shape: f32[10,84], index: 16, kind: input, shape index: {}]   ;;  %s7617_s18 = inlined_call_operand.vmem [shape: f32[1,10,4], index: 18, kind: output, shape index: {}]  }
   0x1   :  { %7621 = sst [smem:[#allocation22_spill]] %s7599_s0  ;;  %vm2630_vm4 = vcmask 424960   ;;  %vm2876_vm5 = vcmask 162816   ;;  %vm2972_vm6 = vcmask 654336   ;;  %vm4030_vm7 = vcmask 982016  }
   0x2   :  { %7622 = sst [smem:[#allocation23_spill]] %s7600_s1  ;;  %s5078_s1 = smov 125   ;;  %vm4171_vm8 = vcmask 31744   ;;  %vm4173_vm9 = vcmask 25600  }
   0x3   :  { %7623 = sst [smem:[#allocation24_spill]] %s7601_s2 }
   0x4   :  { %s7624_s29 = sld [smem:[#allocation22_spill]] }
   0x5   :  { %s7625_s27 = sld [smem:[#allocation23_spill]] }
   0x6   :  { %s7626_s28 = sld [smem:[#allocation24_spill]] }
   0xa   :  { %v69_v0 = vld [vmem:[%s7624_s29 + $0x50] sm:$0xff]  ;;  %v70_v1 = vld [vmem:[%s7624_s29 + $0x58] sm:$0xff]  ;;  %v67_v8 = vld [vmem:[%s7624_s29 + $0x40] sm:$0xff] }
   0xb   :  { %v5185_v2 = vld [vmem:[%s7624_s29 + $0x30] sm:$0xff]  ;;  %v5187_v3 = vpack.i.bf16 %v69_v0, %v70_v1  ;;  %v5192_v4 = vld [vmem:[%s7624_s29 + $0x38] sm:$0xff]  ;;  %4829 = vmatpush.msra.mxu3 %v70_v1  ;;  %274 = vmatpush.msra.mxu1 %v70_v1  ;;  %v68_v9 = vld [vmem:[%s7624_s29 + $0x48] sm:$0xff] }
   0xc   :  { %v5196_v5 = vpack.i.bf16 %v5185_v2, %v5192_v4  ;;  %v5201_v6 = vld [vmem:[%s7624_s29 + $0x10] sm:$0xff]  ;;  %v5208_v7 = vld [vmem:[%s7624_s29 + $0x18] sm:$0xff]  ;;  %v63_v11 = vld [vmem:[%s7624_s29 + $0x20] sm:$0xff]  ;;  %v5230_v13 = vpack.i.bf16 %v67_v8, %v68_v9 }
   0xd   :  { %4854 = vrot.lane.b32.xlu0 %v5187_v3, %s5076_s23  ;;  %4830 = vmatpush.msra.mxu3 %v69_v0  ;;  %v5220_v10 = vpack.i.bf16 %v5201_v6, %v5208_v7  ;;  %v64_v12 = vld [vmem:[%s7624_s29 + $0x28] sm:$0xff]  ;;  %v59_v14 = vld [vmem:[%s7624_s29] sm:$0xff]  ;;  %v77_v18 = vld [vmem:[%s7625_s27 + $0x30] sm:$0xff] }
   0xe   :  { %4864 = vrot.lane.b32.xlu1 %v5196_v5, %s5076_s23  ;;  %275 = vmatpush.msra.mxu1 %v69_v0  ;;  %v60_v15 = vld [vmem:[%s7624_s29 + $0x8] sm:$0xff]  ;;  %v4868_v16 = vpack.i.bf16 %v63_v11, %v64_v12  ;;  %s5077_s29 = smov 126   ;;  %v71_v19 = vld [vmem:[%s7625_s27] sm:$0xff]  ;;  %v78_v20 = vld [vmem:[%s7625_s27 + $0x38] sm:$0xff] }
   0xf   :  { %4831 = vmatpush.msra.mxu3 %v68_v9  ;;  %4874 = vrot.lane.b32.xlu2 %v5220_v10, %s5076_s23  ;;  %v5239_v17 = vpack.i.bf16 %v59_v14, %v60_v15  ;;  %v72_v21 = vld [vmem:[%s7625_s27 + $0x8] sm:$0xff]  ;;  %v79_v22 = vld [vmem:[%s7625_s27 + $0x40] sm:$0xff]  ;;  %v73_v23 = vld [vmem:[%s7625_s27 + $0x10] sm:$0xff] }
  0x10   :  { %276 = vmatpush.msra.mxu1 %v68_v9  ;;  %v80_v24 = vld [vmem:[%s7625_s27 + $0x48] sm:$0xff]  ;;  %v74_v25 = vld [vmem:[%s7625_s27 + $0x18] sm:$0xff]  ;;  %v81_v26 = vld [vmem:[%s7625_s27 + $0x50] sm:$0xf] }
  0x11   :  { %4832 = vmatpush.msra.mxu3 %v67_v8  ;;  %v75_v27 = vld [vmem:[%s7625_s27 + $0x20] sm:$0xff]  ;;  %v76_v33 = vld [vmem:[%s7625_s27 + $0x28] sm:$0xff]  ;;  %v84_v41 = vld [vmem:[%s7626_s28 + $0x10] sm:$0xff] }
  0x12   :  { %277 = vmatpush.msra.mxu1 %v67_v8  ;;  %v82_v28 = vld [vmem:[%s7626_s28] sm:$0xff]  ;;  %v83_v35 = vld [vmem:[%s7626_s28 + $0x8] sm:$0xff]  ;;  %v85_v50 = vld [vmem:[%s7626_s28 + $0x18] sm:$0xff] }
  0x13   :  { %4833 = vmatpush.msra.mxu3 %v5192_v4  ;;  %v4179_v61 = vld [vmem:[%s7625_s27 + $0x58] sm:$0xff] }
  0x14   :  { %278 = vmatpush.msra.mxu1 %v5192_v4  ;;  %v4212_v62 = vld [vmem:[%s7626_s28 + $0x58] sm:$0xff] }
  0x15   :  { %4859 = vrot.lane.b32.xlu0 %v5230_v13, %s5076_s23  ;;  %4834 = vmatpush.msra.mxu3 %v5185_v2 }
  0x16   :  { %4869 = vrot.lane.b32.xlu1 %v4868_v16, %s5076_s23  ;;  %279 = vmatpush.msra.mxu1 %v5185_v2 }
  0x17   :  { %4835 = vmatpush.msra.mxu3 %v64_v12  ;;  %4879 = vrot.lane.b32.xlu2 %v5239_v17, %s5076_s23 }
  0x18   :  { %280 = vmatpush.msra.mxu1 %v64_v12 }
  0x19   :  { %4836 = vmatpush.msra.mxu3 %v63_v11 }
  0x1a   :  { %281 = vmatpush.msra.mxu1 %v63_v11 }
  0x1b   :  { %4837 = vmatpush.msra.mxu3 %v5208_v7 }
  0x1c   :  { %282 = vmatpush.msra.mxu1 %v5208_v7 }
  0x1d   :  { %4884 = vrot.lane.b32.xlu0 %v5187_v3, %s5077_s29  ;;  %4838 = vmatpush.msra.mxu3 %v5201_v6 }
  0x1e   :  { %4889 = vrot.lane.b32.xlu1 %v5230_v13, %s5077_s29  ;;  %283 = vmatpush.msra.mxu1 %v5201_v6 }
  0x1f   :  { %4839 = vmatpush.msra.mxu3 %v60_v15  ;;  %4894 = vrot.lane.b32.xlu2 %v5196_v5, %s5077_s29 }
  0x20   :  { %284 = vmatpush.msra.mxu1 %v60_v15 }
  0x21   :  { %4840 = vmatpush.msra.mxu3 %v59_v14 }
  0x22   :  { %4207 = vmatmul.msk.f32.vlgmr.msra.gmra.mxu3 %vm153_vm0, %v77_v18  ;;  %285 = vmatpush.msra.mxu1 %v59_v14  ;;  %v89_v18 = vld [vmem:[%s7626_s28 + $0x38] sm:$0xff] }
  0x23   :  { %452 = vmatpush.msrb.mxu3 %v70_v1  ;;  %4201 = vmatmul.msk.f32.vlgmr.msra.gmra.mxu1 %vm153_vm0, %v71_v19 }
  0x25   :  { %4899 = vrot.lane.b32.xlu0 %v4868_v16, %s5077_s29  ;;  %453 = vmatpush.msrb.mxu3 %v69_v0  ;;  %v86_v0 = vld [vmem:[%s7626_s28 + $0x20] sm:$0xff] }
  0x26   :  { %4904 = vrot.lane.b32.xlu1 %v5220_v10, %s5077_s29 }
  0x27   :  { %4909 = vrot.lane.b32.xlu2 %v5239_v17, %s5077_s29  ;;  %454 = vmatpush.msrb.mxu3 %v68_v9  ;;  %v87_v9 = vld [vmem:[%s7626_s28 + $0x28] sm:$0xff] }
  0x29   :  { %455 = vmatpush.msrb.mxu3 %v67_v8 }
  0x2a   :  { %4208 = vmatmul.msk.f32.gmra.mxu3 %vm153_vm0, %v78_v20  ;;  %v4269_v20 = vld [vmem:[%s7626_s28 + $0xc0] sm:$0xff] }
  0x2b   :  { %456 = vmatpush.msrb.mxu3 %v5192_v4  ;;  %4202 = vmatmul.msk.f32.gmra.mxu1 %vm153_vm0, %v72_v21 }
  0x2d   :  { %4914 = vrot.lane.b32.xlu0 %v5187_v3, %s5078_s1  ;;  %457 = vmatpush.msrb.mxu3 %v5185_v2 }
  0x2e   :  { %4919 = vrot.lane.b32.xlu1 %v5230_v13, %s5078_s1 }
  0x2f   :  { %458 = vmatpush.msrb.mxu3 %v64_v12  ;;  %4924 = vrot.lane.b32.xlu2 %v5196_v5, %s5078_s1  ;;  %v4181_v12 = vld [vmem:[%s7625_s27 + $0x68] sm:$0xff] }
  0x31   :  { %459 = vmatpush.msrb.mxu3 %v63_v11  ;;  %v4267_v11 = vld [vmem:[%s7626_s28 + $0xb0] sm:$0xff] }
  0x32   :  { %4209 = vmatmul.msk.f32.gmra.mxu3 %vm153_vm0, %v79_v22 }
  0x33   :  { %460 = vmatpush.msrb.mxu3 %v5208_v7  ;;  %4203 = vmatmul.msk.f32.gmra.mxu1 %vm153_vm0, %v73_v23  ;;  %v4213_v7 = vld [vmem:[%s7626_s28 + $0x60] sm:$0xff]  ;;  %v4183_v23 = vld [vmem:[%s7625_s27 + $0x78] sm:$0xff] }
  0x35   :  { %4929 = vrot.lane.b32.xlu0 %v5187_v3, %s5079_s20  ;;  %461 = vmatpush.msrb.mxu3 %v5201_v6  ;;  %v4180_v6 = vld [vmem:[%s7625_s27 + $0x60] sm:$0xff] }
  0x36   :  { %4934 = vrot.lane.b32.xlu1 %v4868_v16, %s5078_s1 }
  0x37   :  { %462 = vmatpush.msrb.mxu3 %v60_v15  ;;  %4939 = vrot.lane.b32.xlu2 %v5230_v13, %s5079_s20  ;;  %v4214_v13 = vld [vmem:[%s7626_s28 + $0x68] sm:$0xff]  ;;  %v4268_v15 = vld [vmem:[%s7626_s28 + $0xb8] sm:$0xff] }
  0x39   :  { %463 = vmatpush.msrb.mxu3 %v59_v14  ;;  %v88_v14 = vld [vmem:[%s7626_s28 + $0x30] sm:$0xff] }
  0x3a   :  { %4210 = vmatmul.msk.f32.gmra.mxu3 %vm153_vm0, %v80_v24 }
  0x3b   :  { %4204 = vmatmul.msk.f32.gmra.mxu1 %vm153_vm0, %v74_v25  ;;  %v4216_v25 = vld [vmem:[%s7626_s28 + $0x78] sm:$0xff] }
  0x3d   :  { %4944 = vrot.lane.b32.xlu0 %v5220_v10, %s5078_s1 }
  0x3e   :  { %4949 = vrot.lane.b32.xlu1 %v5196_v5, %s5079_s20 }
  0x3f   :  { %4954 = vrot.lane.b32.xlu2 %v5239_v17, %s5078_s1 }
  0x42   :  { %4211 = vmatmul.msk.f32.gmra.mxu3 %vm153_vm0, %v81_v26  ;;  %v90_v26 = vld [vmem:[%s7626_s28 + $0x40] sm:$0xff] }
  0x43   :  { %4205 = vmatmul.msk.f32.gmra.mxu1 %vm153_vm0, %v75_v27 }
  0x45   :  { %4959 = vrot.lane.b32.xlu0 %v4868_v16, %s5079_s20  ;;  %v4182_v16 = vld [vmem:[%s7625_s27 + $0x70] sm:$0xff] }
  0x46   :  { %4964 = vrot.lane.b32.xlu1 %v5220_v10, %s5079_s20 }
  0x47   :  { %4969 = vrot.lane.b32.xlu2 %v5239_v17, %s5079_s20  ;;  %v4215_v17 = vld [vmem:[%s7626_s28 + $0x70] sm:$0xff] }
  0x4a   :  { %4234 = vmatmul.msk.f32.vlgmr.msrb.gmra.mxu3 %vm153_vm0, %v82_v28 }
  0x4b   :  { %4206 = vmatmul.msk.f32.gmra.mxu1 %vm153_vm0, %v76_v33 }
  0x52   :  { %4235 = vmatmul.msk.f32.gmra.mxu3 %vm153_vm0, %v83_v35  ;;  %v4184_v35 = vld [vmem:[%s7625_s27 + $0x80] sm:$0xff] }
  0x5a   :  { %4236 = vmatmul.msk.f32.gmra.mxu3 %vm153_vm0, %v84_v41 }
  0x62   :  { %4237 = vmatmul.msk.f32.gmra.mxu3 %vm153_vm0, %v85_v50  ;;  %v4218_v50 = vld [vmem:[%s7626_s28 + $0x88] sm:$0xff] }
  0x69   :  { %v4875_v32 = vpop.permute.xlu2 %4874 }
  0x6a   :  { %v4876_v52 = vunpack.i.l.bf16 %v4875_v32  ;;  %v4877_v55 = vunpack.i.h.bf16 %v4875_v32  ;;  %4238 = vmatmul.msk.f32.gmra.mxu3 %vm153_vm0, %v86_v0  ;;  %v4270_v32 = vld [vmem:[%s7626_s28 + $0xc8] sm:$0xff] }
  0x71   :  { %v4880_v40 = vpop.permute.xlu2 %4879 }
  0x72   :  { %v4881_v56 = vunpack.i.l.bf16 %v4880_v40  ;;  %v4882_v60 = vunpack.i.h.bf16 %v4880_v40  ;;  %4239 = vmatmul.msk.f32.gmra.mxu3 %vm153_vm0, %v87_v9 }
  0x79   :  { %v4895_v53 = vpop.permute.xlu2 %4894 }
  0x7a   :  { %v4896_v57 = vunpack.i.l.bf16 %v4895_v53  ;;  %v4897_v59 = vunpack.i.h.bf16 %v4895_v53  ;;  %4240 = vmatmul.msk.f32.gmra.mxu3 %vm153_vm0, %v88_v14  ;;  %v4313_v14 = vld [vmem:[%s7626_s28 + $0x118] sm:$0xff] }
  0x7f   :  { %v4855_v29 = vpop.permute.xlu0 %4854 }
  0x80   :  { %v4856_v30 = vunpack.i.l.bf16 %v4855_v29  ;;  %v4865_v31 = vpop.permute.xlu1 %4864  ;;  %v4857_v34 = vunpack.i.h.bf16 %v4855_v29 }
  0x81   :  { %v4866_v42 = vunpack.i.l.bf16 %v4865_v31  ;;  %v4867_v43 = vunpack.i.h.bf16 %v4865_v31  ;;  %v4910_v4 = vpop.permute.xlu2 %4909 }
  0x82   :  { %191 = vmatpush.msra.mxu0 %v4856_v30  ;;  %369 = vmatpush.msra.mxu2 %v4856_v30  ;;  %v4911_v8 = vunpack.i.l.bf16 %v4910_v4  ;;  %v4912_v10 = vunpack.i.h.bf16 %v4910_v4 }
  0x83   :  { %4241 = vmatmul.msk.f32.gmra.mxu3 %vm153_vm0, %v89_v18  ;;  %v4314_v18 = vld [vmem:[%s7626_s28 + $0x120] sm:$0xff] }
  0x84   :  { %192 = vmatpush.msra.mxu0 %v4857_v34  ;;  %370 = vmatpush.msra.mxu2 %v4857_v34 }
  0x87   :  { %v4860_v36 = vpop.permute.xlu0 %4859 }
  0x88   :  { %v4861_v37 = vunpack.i.l.bf16 %v4860_v36  ;;  %v4870_v38 = vpop.permute.xlu1 %4869  ;;  %v4862_v39 = vunpack.i.h.bf16 %v4860_v36 }
  0x89   :  { %v4871_v44 = vunpack.i.l.bf16 %v4870_v38  ;;  %v4872_v49 = vunpack.i.h.bf16 %v4870_v38  ;;  %v4925_v29 = vpop.permute.xlu2 %4924  ;;  %v4217_v38 = vld [vmem:[%s7626_s28 + $0x80] sm:$0xff] }
  0x8a   :  { %193 = vmatpush.msra.mxu0 %v4861_v37  ;;  %371 = vmatpush.msra.mxu2 %v4861_v37  ;;  %v4926_v30 = vunpack.i.l.bf16 %v4925_v29  ;;  %v4927_v33 = vunpack.i.h.bf16 %v4925_v29  ;;  %v4291_v29 = vld [vmem:[%s7625_s27 + $0x118] sm:$0xff] }
  0x8b   :  { %4242 = vmatmul.msk.f32.gmra.mxu3 %vm153_vm0, %v90_v26  ;;  %v4316_v26 = vld [vmem:[%s7626_s28 + $0x130] sm:$0xff] }
  0x8c   :  { %194 = vmatpush.msra.mxu0 %v4862_v39  ;;  %372 = vmatpush.msra.mxu2 %v4862_v39  ;;  %v91_v39 = vld [vmem:[%s7626_s28 + $0x48] sm:$0xff] }
  0x8e   :  { %195 = vmatpush.msra.mxu0 %v4866_v42  ;;  %373 = vmatpush.msra.mxu2 %v4866_v42 }
  0x8f   :  { %v4885_v45 = vpop.permute.xlu0 %4884 }
  0x90   :  { %196 = vmatpush.msra.mxu0 %v4867_v43  ;;  %374 = vmatpush.msra.mxu2 %v4867_v43  ;;  %v4886_v46 = vunpack.i.l.bf16 %v4885_v45  ;;  %v4890_v47 = vpop.permute.xlu1 %4889  ;;  %v4887_v48 = vunpack.i.h.bf16 %v4885_v45  ;;  %v4271_v45 = vld [vmem:[%s7626_s28 + $0xd0] sm:$0xff] }
  0x91   :  { %v4891_v51 = vunpack.i.l.bf16 %v4890_v47  ;;  %v4892_v54 = vunpack.i.h.bf16 %v4890_v47  ;;  %v4940_v42 = vpop.permute.xlu2 %4939 }
  0x92   :  { %197 = vmatpush.msra.mxu0 %v4871_v44  ;;  %375 = vmatpush.msra.mxu2 %v4871_v44  ;;  %v4941_v43 = vunpack.i.l.bf16 %v4940_v42 }
  0x93   :  { %689 = vmatpush.msrb.mxu1 %v4886_v46  ;;  %4243 = vmatmul.msk.f32.gmra.mxu3 %vm153_vm0, %v91_v39  ;;  %v4293_v39 = vld [vmem:[%s7625_s27 + $0x128] sm:$0xff] }
  0x94   :  { %198 = vmatpush.msra.mxu0 %v4872_v49  ;;  %376 = vmatpush.msra.mxu2 %v4872_v49  ;;  %v4185_v49 = vld [vmem:[%s7625_s27 + $0x88] sm:$0xff] }
  0x95   :  { %690 = vmatpush.msrb.mxu1 %v4887_v48 }
  0x96   :  { %199 = vmatpush.msra.mxu0 %v4876_v52  ;;  %377 = vmatpush.msra.mxu2 %v4876_v52 }
  0x97   :  { %691 = vmatpush.msrb.mxu1 %v4891_v51  ;;  %v4900_v58 = vpop.permute.xlu0 %4899 }
  0x98   :  { %200 = vmatpush.msra.mxu0 %v4877_v55  ;;  %378 = vmatpush.msra.mxu2 %v4877_v55  ;;  %v4901_v63 = vunpack.i.l.bf16 %v4900_v58  ;;  %v4905_v1 = vpop.permute.xlu1 %4904  ;;  %v4902_v2 = vunpack.i.h.bf16 %v4900_v58 }
  0x99   :  { %692 = vmatpush.msrb.mxu1 %v4892_v54  ;;  %v4906_v3 = vunpack.i.l.bf16 %v4905_v1  ;;  %v4907_v5 = vunpack.i.h.bf16 %v4905_v1  ;;  %v4955_v52 = vpop.permute.xlu2 %4954  ;;  %v4273_v1 = vld [vmem:[%s7626_s28 + $0xe0] sm:$0xff] }
  0x9a   :  { %201 = vmatpush.msra.mxu0 %v4881_v56  ;;  %379 = vmatpush.msra.mxu2 %v4881_v56  ;;  %v4956_v53 = vunpack.i.l.bf16 %v4955_v52  ;;  %v4272_v56 = vld [vmem:[%s7626_s28 + $0xd8] sm:$0xff] }
  0x9b   :  { %693 = vmatpush.msrb.mxu1 %v4896_v57 }
  0x9c   :  { %202 = vmatpush.msra.mxu0 %v4882_v60  ;;  %380 = vmatpush.msra.mxu2 %v4882_v60  ;;  %v4219_v60 = vld [vmem:[%s7626_s28 + $0x90] sm:$0xff] }
  0x9d   :  { %694 = vmatpush.msrb.mxu1 %v4897_v59  ;;  %4190 = vmatmul.msk.f32.vlgmr.msra.gmra.mxu0 %vm153_vm0, %v4179_v61  ;;  %v4311_v61 = vld [vmem:[%s7626_s28 + $0x108] sm:$0xff] }
  0x9e   :  { %4223 = vmatmul.msk.f32.vlgmr.msra.gmra.mxu2 %vm153_vm0, %v4212_v62  ;;  %583 = vmatpush.msrb.mxu0 %v4886_v46 }
  0x9f   :  { %695 = vmatpush.msrb.mxu1 %v4901_v63  ;;  %v4915_v19 = vpop.permute.xlu0 %4914 }
  0xa0   :  { %584 = vmatpush.msrb.mxu0 %v4887_v48  ;;  %v4917_v21 = vunpack.i.h.bf16 %v4915_v19  ;;  %v4916_v22 = vunpack.i.l.bf16 %v4915_v19  ;;  %v4920_v24 = vpop.permute.xlu1 %4919  ;;  %v4942_v48 = vunpack.i.h.bf16 %v4940_v42  ;;  %v4276_v19 = vld [vmem:[%s7626_s28 + $0xf8] sm:$0xff] }
  0xa1   :  { %696 = vmatpush.msrb.mxu1 %v4902_v2  ;;  %v4922_v27 = vunpack.i.h.bf16 %v4920_v24  ;;  %v4921_v28 = vunpack.i.l.bf16 %v4920_v24  ;;  %v4246_v24 = vld [vmem:[%s7625_s27 + $0xb8] sm:$0xff] }
  0xa2   :  { %585 = vmatpush.msrb.mxu0 %v4891_v51  ;;  %937 = vmatpush.msra.mxu3 %v4916_v22  ;;  %v92_v51 = vld [vmem:[%s7626_s28 + $0x50] sm:$0xf]  ;;  %v4358_v42 = vld [vmem:[%s7626_s28 + $0x178] sm:$0xff] }
  0xa3   :  { %697 = vmatpush.msrb.mxu1 %v4906_v3  ;;  %831 = vmatpush.msrb.mxu2 %v4916_v22  ;;  %v4315_v22 = vld [vmem:[%s7626_s28 + $0x128] sm:$0xff] }
  0xa4   :  { %586 = vmatpush.msrb.mxu0 %v4892_v54  ;;  %938 = vmatpush.msra.mxu3 %v4917_v21  ;;  %v4957_v54 = vunpack.i.h.bf16 %v4955_v52  ;;  %v4295_v52 = vld [vmem:[%s7625_s27 + $0x138] sm:$0xff] }
  0xa5   :  { %698 = vmatpush.msrb.mxu1 %v4907_v5  ;;  %4191 = vmatmul.msk.f32.gmra.mxu0 %vm153_vm0, %v4180_v6  ;;  %v4220_v6 = vld [vmem:[%s7626_s28 + $0x98] sm:$0xff] }
  0xa6   :  { %4224 = vmatmul.msk.f32.gmra.mxu2 %vm153_vm0, %v4213_v7  ;;  %587 = vmatpush.msrb.mxu0 %v4896_v57  ;;  %v4312_v7 = vld [vmem:[%s7626_s28 + $0x110] sm:$0xff] }
  0xa7   :  { %699 = vmatpush.msrb.mxu1 %v4911_v8  ;;  %832 = vmatpush.msrb.mxu2 %v4917_v21  ;;  %v4930_v31 = vpop.permute.xlu0 %4929  ;;  %v4289_v21 = vld [vmem:[%s7625_s27 + $0x108] sm:$0xff] }
  0xa8   :  { %588 = vmatpush.msrb.mxu0 %v4897_v59  ;;  %939 = vmatpush.msra.mxu3 %v4921_v28  ;;  %v4931_v34 = vunpack.i.l.bf16 %v4930_v31  ;;  %v4932_v36 = vunpack.i.h.bf16 %v4930_v31  ;;  %v4935_v37 = vpop.permute.xlu1 %4934  ;;  %v4186_v59 = vld [vmem:[%s7625_s27 + $0x90] sm:$0xff]  ;;  %v4356_v31 = vld [vmem:[%s7626_s28 + $0x168] sm:$0xff] }
  0xa9   :  { %700 = vmatpush.msrb.mxu1 %v4912_v10  ;;  %833 = vmatpush.msrb.mxu2 %v4921_v28  ;;  %v4937_v40 = vunpack.i.h.bf16 %v4935_v37  ;;  %v4936_v41 = vunpack.i.l.bf16 %v4935_v37  ;;  %v4247_v28 = vld [vmem:[%s7625_s27 + $0xc0] sm:$0xff]  ;;  %v5587_v37 = vpop.f32.mrf.mxu3 }
  0xaa   :  { %4278 = vmatmul.msk.f32.vlgmr.msrb.gmra.mxu1 %vm153_vm0, %v4267_v11  ;;  %589 = vmatpush.msrb.mxu0 %v4901_v63 }
  0xab   :  { %940 = vmatpush.msra.mxu3 %v4922_v27  ;;  %834 = vmatpush.msrb.mxu2 %v4922_v27  ;;  %v4355_v27 = vld [vmem:[%s7626_s28 + $0x160] sm:$0xff] }
  0xac   :  { %590 = vmatpush.msrb.mxu0 %v4902_v2  ;;  %1185 = vmatpush.msra.mxu1 %v4931_v34 }
  0xad   :  { %4192 = vmatmul.msk.f32.gmra.mxu0 %vm153_vm0, %v4181_v12  ;;  %941 = vmatpush.msra.mxu3 %v4926_v30  ;;  %v4188_v12 = vld [vmem:[%s7625_s27 + $0xa0] sm:$0xff] }
  0xae   :  { %4225 = vmatmul.msk.f32.gmra.mxu2 %vm153_vm0, %v4214_v13  ;;  %591 = vmatpush.msrb.mxu0 %v4906_v3  ;;  %v4221_v13 = vld [vmem:[%s7626_s28 + $0xa0] sm:$0xff] }
  0xaf   :  { %942 = vmatpush.msra.mxu3 %v4927_v33  ;;  %835 = vmatpush.msrb.mxu2 %v4926_v30  ;;  %v4945_v44 = vpop.permute.xlu0 %4944  ;;  %v4317_v30 = vld [vmem:[%s7626_s28 + $0x138] sm:$0xff] }
  0xb0   :  { %592 = vmatpush.msrb.mxu0 %v4907_v5  ;;  %v4947_v46 = vunpack.i.h.bf16 %v4945_v44  ;;  %v4946_v47 = vunpack.i.l.bf16 %v4945_v44  ;;  %1186 = vmatpush.msra.mxu1 %v4932_v36  ;;  %v4950_v55 = vpop.permute.xlu1 %4949  ;;  %v4187_v5 = vld [vmem:[%s7625_s27 + $0x98] sm:$0xff] }
  0xb1   :  { %943 = vmatpush.msra.mxu3 %v4936_v41  ;;  %836 = vmatpush.msrb.mxu2 %v4927_v33  ;;  %v4951_v57 = vunpack.i.l.bf16 %v4950_v55  ;;  %v4952_v58 = vunpack.i.h.bf16 %v4950_v55  ;;  %v4248_v33 = vld [vmem:[%s7625_s27 + $0xc8] sm:$0xff]  ;;  %v4250_v44 = vld [vmem:[%s7625_s27 + $0xd8] sm:$0xff] }
  0xb2   :  { %4279 = vmatmul.msk.f32.gmra.mxu1 %vm153_vm0, %v4268_v15  ;;  %593 = vmatpush.msrb.mxu0 %v4911_v8  ;;  %v4970_v8 = vpop.permute.xlu2 %4969  ;;  %v4275_v15 = vld [vmem:[%s7626_s28 + $0xf0] sm:$0xff]  ;;  %v4360_v55 = vld [vmem:[%s7626_s28 + $0x188] sm:$0xff] }
  0xb3   :  { %944 = vmatpush.msra.mxu3 %v4937_v40  ;;  %837 = vmatpush.msrb.mxu2 %v4936_v41  ;;  %v4971_v9 = vunpack.i.l.bf16 %v4970_v8  ;;  %v4972_v11 = vunpack.i.h.bf16 %v4970_v8  ;;  %v4363_v8 = vld [vmem:[%s7626_s28 + $0x1a0] sm:$0xff] }
  0xb4   :  { %594 = vmatpush.msrb.mxu0 %v4912_v10  ;;  %1187 = vmatpush.msra.mxu1 %v4941_v43  ;;  %v4274_v10 = vld [vmem:[%s7626_s28 + $0xe8] sm:$0xff] }
  0xb5   :  { %4193 = vmatmul.msk.f32.gmra.mxu0 %vm153_vm0, %v4182_v16  ;;  %945 = vmatpush.msra.mxu3 %v4946_v47  ;;  %v4189_v16 = vld [vmem:[%s7625_s27 + $0xa8] sm:$0xf] }
  0xb6   :  { %4226 = vmatmul.msk.f32.gmra.mxu2 %vm153_vm0, %v4215_v17  ;;  %1079 = vmatpush.msra.mxu0 %v4931_v34  ;;  %v4222_v17 = vld [vmem:[%s7626_s28 + $0xa8] sm:$0xf]  ;;  %v4292_v34 = vld [vmem:[%s7625_s27 + $0x120] sm:$0xff] }
  0xb7   :  { %838 = vmatpush.msrb.mxu2 %v4937_v40  ;;  %946 = vmatpush.msra.mxu3 %v4947_v46  ;;  %v4960_v62 = vpop.permute.xlu0 %4959  ;;  %v4319_v40 = vld [vmem:[%s7626_s28 + $0x148] sm:$0xff] }
  0xb8   :  { %1080 = vmatpush.msra.mxu0 %v4932_v36  ;;  %4244 = vmatmul.msk.f32.gmra.mxu3 %vm153_vm0, %v92_v51  ;;  %v4961_v63 = vunpack.i.l.bf16 %v4960_v62  ;;  %v4962_v0 = vunpack.i.h.bf16 %v4960_v62  ;;  %v4965_v2 = vpop.permute.xlu1 %4964  ;;  %v4357_v36 = vld [vmem:[%s7626_s28 + $0x170] sm:$0xff]  ;;  %v4251_v51 = vld [vmem:[%s7625_s27 + $0xe0] sm:$0xff] }
  0xb9   :  { %839 = vmatpush.msrb.mxu2 %v4946_v47  ;;  %947 = vmatpush.msra.mxu3 %v4956_v53  ;;  %v4966_v3 = vunpack.i.l.bf16 %v4965_v2  ;;  %v4967_v4 = vunpack.i.h.bf16 %v4965_v2  ;;  %v4320_v47 = vld [vmem:[%s7626_s28 + $0x150] sm:$0xff]  ;;  %v4362_v2 = vld [vmem:[%s7626_s28 + $0x198] sm:$0xff] }
  0xba   :  { %4280 = vmatmul.msk.f32.gmra.mxu1 %vm153_vm0, %v4269_v20  ;;  %1081 = vmatpush.msra.mxu0 %v4941_v43  ;;  %v4245_v20 = vld [vmem:[%s7625_s27 + $0xb0] sm:$0xff] }
  0xbb   :  { %840 = vmatpush.msrb.mxu2 %v4947_v46  ;;  %1188 = vmatpush.msra.mxu1 %v4942_v48  ;;  %v4294_v46 = vld [vmem:[%s7625_s27 + $0x130] sm:$0xff] }
  0xbc   :  { %1082 = vmatpush.msra.mxu0 %v4942_v48  ;;  %948 = vmatpush.msra.mxu3 %v4957_v54 }
  0xbd   :  { %4194 = vmatmul.msk.f32.gmra.mxu0 %vm153_vm0, %v4183_v23  ;;  %841 = vmatpush.msrb.mxu2 %v4956_v53  ;;  %v4277_v23 = vld [vmem:[%s7626_s28 + $0x100] sm:$0xf]  ;;  %v4321_v53 = vld [vmem:[%s7626_s28 + $0x158] sm:$0xf] }
  0xbe   :  { %4227 = vmatmul.msk.f32.gmra.mxu2 %vm153_vm0, %v4216_v25  ;;  %1083 = vmatpush.msra.mxu0 %v4951_v57  ;;  %v4290_v25 = vld [vmem:[%s7625_s27 + $0x110] sm:$0xff] }
  0xbf   :  { %1189 = vmatpush.msra.mxu1 %v4951_v57  ;;  %842 = vmatpush.msrb.mxu2 %v4957_v54 }
  0xc0   :  { %1084 = vmatpush.msra.mxu0 %v4952_v58  ;;  %4322 = vmatmul.msk.f32.vlgmr.msra.gmra.mxu3 %vm153_vm0, %v4311_v61  ;;  %v4361_v61 = vld [vmem:[%s7626_s28 + $0x190] sm:$0xff] }
  0xc1   :  { %1190 = vmatpush.msra.mxu1 %v4952_v58  ;;  %v4252_v58 = vld [vmem:[%s7625_s27 + $0xe8] sm:$0xff] }
  0xc2   :  { %4281 = vmatmul.msk.f32.gmra.mxu1 %vm153_vm0, %v4270_v32  ;;  %1085 = vmatpush.msra.mxu0 %v4961_v63  ;;  %v5569_v32 = vpop.f32.mrf.mxu1 }
  0xc3   :  { %1191 = vmatpush.msra.mxu1 %v4961_v63 }
  0xc4   :  { %1086 = vmatpush.msra.mxu0 %v4962_v0 }
  0xc5   :  { %4195 = vmatmul.msk.f32.gmra.mxu0 %vm153_vm0, %v4184_v35  ;;  %1192 = vmatpush.msra.mxu1 %v4962_v0  ;;  %v4318_v35 = vld [vmem:[%s7626_s28 + $0x140] sm:$0xff]  ;;  %v4253_v0 = vld [vmem:[%s7625_s27 + $0xf0] sm:$0xff] }
  0xc6   :  { %4228 = vmatmul.msk.f32.gmra.mxu2 %vm153_vm0, %v4217_v38  ;;  %1087 = vmatpush.msra.mxu0 %v4966_v3  ;;  %v4249_v38 = vld [vmem:[%s7625_s27 + $0xd0] sm:$0xff] }
  0xc7   :  { %1193 = vmatpush.msra.mxu1 %v4966_v3 }
  0xc8   :  { %4323 = vmatmul.msk.f32.gmra.mxu3 %vm153_vm0, %v4312_v7  ;;  %1088 = vmatpush.msra.mxu0 %v4967_v4 }
  0xc9   :  { %1194 = vmatpush.msra.mxu1 %v4967_v4 }
  0xca   :  { %4282 = vmatmul.msk.f32.gmra.mxu1 %vm153_vm0, %v4271_v45  ;;  %1089 = vmatpush.msra.mxu0 %v4971_v9  ;;  %v5599_v41 = vpop.f32.mrf.mxu1  ;;  %v5613_v45 = vpop.f32.mrf.mxu3 }
  0xcb   :  { %1195 = vmatpush.msra.mxu1 %v4971_v9 }
  0xcc   :  { %1090 = vmatpush.msra.mxu0 %v4972_v11 }
  0xcd   :  { %4196 = vmatmul.msk.f32.gmra.mxu0 %vm153_vm0, %v4185_v49  ;;  %1196 = vmatpush.msra.mxu1 %v4972_v11  ;;  %v4359_v49 = vld [vmem:[%s7626_s28 + $0x180] sm:$0xff] }
  0xce   :  { %4229 = vmatmul.msk.f32.gmra.mxu2 %vm153_vm0, %v4218_v50 }
  0xd0   :  { %4324 = vmatmul.msk.f32.gmra.mxu3 %vm153_vm0, %v4313_v14 }
  0xd2   :  { %4283 = vmatmul.msk.f32.gmra.mxu1 %vm153_vm0, %v4272_v56  ;;  %v5622_v48 = vpop.f32.mrf.mxu1  ;;  %v5641_v54 = vpop.f32.mrf.mxu3 }
  0xd3   :  { %7627 = vst [vmem:[#allocation2_spill] sm:$0xff] %v5641_v54 }
  0xd5   :  { %4197 = vmatmul.msk.f32.gmra.mxu0 %vm153_vm0, %v4186_v59  ;;  %v4296_v59 = vld [vmem:[%s7625_s27 + $0x140] sm:$0xff] }
  0xd6   :  { %4230 = vmatmul.msk.f32.gmra.mxu2 %vm153_vm0, %v4219_v60 }
  0xd8   :  { %4325 = vmatmul.msk.f32.gmra.mxu3 %vm153_vm0, %v4314_v18 }
  0xda   :  { %4284 = vmatmul.msk.f32.gmra.mxu1 %vm153_vm0, %v4273_v1  ;;  %v5649_v56 = vpop.f32.mrf.mxu1  ;;  %v5662_v60 = vpop.f32.mrf.mxu3  ;;  %v4297_v1 = vld [vmem:[%s7625_s27 + $0x148] sm:$0xff] }
  0xdb   :  { %7628 = vst [vmem:[#allocation3_spill] sm:$0xff] %v5662_v60 }
  0xdd   :  { %4198 = vmatmul.msk.f32.gmra.mxu0 %vm153_vm0, %v4187_v5  ;;  %v4254_v5 = vld [vmem:[%s7625_s27 + $0xf8] sm:$0xff] }
  0xde   :  { %4231 = vmatmul.msk.f32.gmra.mxu2 %vm153_vm0, %v4220_v6  ;;  %v4298_v6 = vld [vmem:[%s7625_s27 + $0x150] sm:$0xff] }
  0xe0   :  { %4326 = vmatmul.msk.f32.gmra.mxu3 %vm153_vm0, %v4315_v22 }
  0xe2   :  { %4285 = vmatmul.msk.f32.gmra.mxu1 %vm153_vm0, %v4274_v10  ;;  %v5667_v62 = vpop.f32.mrf.mxu1  ;;  %v5683_v3 = vpop.f32.mrf.mxu3  ;;  %v4255_v10 = vld [vmem:[%s7625_s27 + $0x100] sm:$0xf] }
  0xe3   :  { %7629 = vst [vmem:[#allocation4_spill] sm:$0xff] %v5683_v3  ;;  %v1361_v3 = vld [vmem:[%s7603_s4 + $0x20] sm:$0xff] }
  0xe5   :  { %4199 = vmatmul.msk.f32.gmra.mxu0 %vm153_vm0, %v4188_v12  ;;  %v4299_v12 = vld [vmem:[%s7625_s27 + $0x158] sm:$0xf] }
  0xe6   :  { %4232 = vmatmul.msk.f32.gmra.mxu2 %vm153_vm0, %v4221_v13 }
  0xe8   :  { %4327 = vmatmul.msk.f32.gmra.mxu3 %vm153_vm0, %v4316_v26 }
  0xea   :  { %4286 = vmatmul.msk.f32.gmra.mxu1 %vm153_vm0, %v4275_v15  ;;  %v5694_v7 = vpop.f32.mrf.mxu1  ;;  %v5707_v11 = vpop.f32.mrf.mxu3  ;;  %v4364_v15 = vld [vmem:[%s7626_s28 + $0x1a8] sm:$0xff] }
  0xed   :  { %4200 = vmatmul.msk.f32.gmra.mxu0 %vm153_vm0, %v4189_v16 }
  0xee   :  { %4233 = vmatmul.msk.f32.gmra.mxu2 %vm153_vm0, %v4222_v17  ;;  %v4333_v17 = vld [vmem:[%s7625_s27 + $0x160] sm:$0xff] }
  0xf0   :  { %4328 = vmatmul.msk.f32.gmra.mxu3 %vm153_vm0, %v4317_v30 }
  0xf2   :  { %4287 = vmatmul.msk.f32.gmra.mxu1 %vm153_vm0, %v4276_v19  ;;  %v5727_v18 = vpop.f32.mrf.mxu3 }
  0xf5   :  { %4256 = vmatmul.msk.f32.vlgmr.msrb.gmra.mxu0 %vm153_vm0, %v4245_v20  ;;  %v4365_v20 = vld [vmem:[%s7626_s28 + $0x1b0] sm:$0xf] }
  0xf6   :  { %4300 = vmatmul.msk.f32.vlgmr.msrb.gmra.mxu2 %vm153_vm0, %v4289_v21 }
  0xf8   :  { %4329 = vmatmul.msk.f32.gmra.mxu3 %vm153_vm0, %v4318_v35 }
  0xfa   :  { %4288 = vmatmul.msk.f32.gmra.mxu1 %vm153_vm0, %v4277_v23  ;;  %v4334_v23 = vld [vmem:[%s7625_s27 + $0x168] sm:$0xff] }
  0xfd   :  { %4257 = vmatmul.msk.f32.gmra.mxu0 %vm153_vm0, %v4246_v24  ;;  %v5744_v24 = vpop.f32.mrf.mxu3 }
  0xfe   :  { %4301 = vmatmul.msk.f32.gmra.mxu2 %vm153_vm0, %v4290_v25 }
 0x100   :  { %4330 = vmatmul.msk.f32.gmra.mxu3 %vm153_vm0, %v4319_v40 }
 0x102   :  { %4366 = vmatmul.msk.f32.vlgmr.msra.gmra.mxu1 %vm153_vm0, %v4355_v27 }
 0x105   :  { %4258 = vmatmul.msk.f32.gmra.mxu0 %vm153_vm0, %v4247_v28  ;;  %v4335_v28 = vld [vmem:[%s7625_s27 + $0x170] sm:$0xff] }
 0x106   :  { %4302 = vmatmul.msk.f32.gmra.mxu2 %vm153_vm0, %v4291_v29  ;;  %v5756_v29 = vpop.f32.mrf.mxu3 }
 0x108   :  { %4331 = vmatmul.msk.f32.gmra.mxu3 %vm153_vm0, %v4320_v47 }
 0x10a   :  { %4367 = vmatmul.msk.f32.gmra.mxu1 %vm153_vm0, %v4356_v31 }
 0x10d   :  { %4259 = vmatmul.msk.f32.gmra.mxu0 %vm153_vm0, %v4248_v33  ;;  %v4336_v33 = vld [vmem:[%s7625_s27 + $0x178] sm:$0xff] }
 0x10e   :  { %4303 = vmatmul.msk.f32.gmra.mxu2 %vm153_vm0, %v4292_v34 }
 0x110   :  { %4332 = vmatmul.msk.f32.gmra.mxu3 %vm153_vm0, %v4321_v53 }
 0x112   :  { %4368 = vmatmul.msk.f32.gmra.mxu1 %vm153_vm0, %v4357_v36  ;;  %v4337_v36 = vld [vmem:[%s7625_s27 + $0x180] sm:$0xff] }
 0x115   :  { %4260 = vmatmul.msk.f32.gmra.mxu0 %vm153_vm0, %v4249_v38  ;;  %v5773_v38 = vpop.f32.mrf.mxu3 }
 0x116   :  { %4304 = vmatmul.msk.f32.gmra.mxu2 %vm153_vm0, %v4293_v39 }
 0x11a   :  { %4369 = vmatmul.msk.f32.gmra.mxu1 %vm153_vm0, %v4358_v42  ;;  %v5608_v43 = vpop.f32.mrf.mxu0 }
 0x11d   :  { %4261 = vmatmul.msk.f32.gmra.mxu0 %vm153_vm0, %v4250_v44  ;;  %v4338_v44 = vld [vmem:[%s7625_s27 + $0x188] sm:$0xff] }
 0x11e   :  { %4305 = vmatmul.msk.f32.gmra.mxu2 %vm153_vm0, %v4294_v46  ;;  %v5785_v46 = vpop.f32.mrf.mxu3 }
 0x121   :  { %v5712_v13 = vpop.f32.mrf.mxu2 }
 0x122   :  { %4370 = vmatmul.msk.f32.gmra.mxu1 %vm153_vm0, %v4359_v49  ;;  %v5630_v50 = vpop.f32.mrf.mxu0 }
 0x125   :  { %4262 = vmatmul.msk.f32.gmra.mxu0 %vm153_vm0, %v4251_v51 }
 0x126   :  { %4306 = vmatmul.msk.f32.gmra.mxu2 %vm153_vm0, %v4295_v52  ;;  %v4339_v52 = vld [vmem:[%s7625_s27 + $0x190] sm:$0xff]  ;;  %v5798_v53 = vpop.f32.mrf.mxu3 }
 0x127   :  { %v5715_v14 = vpop.f32.mrf.mxu1 }
 0x129   :  { %v5730_v19 = vpop.f32.mrf.mxu2 }
 0x12a   :  { %4371 = vmatmul.msk.f32.gmra.mxu1 %vm153_vm0, %v4360_v55  ;;  %v5652_v57 = vpop.f32.mrf.mxu0 }
 0x12d   :  { %4263 = vmatmul.msk.f32.gmra.mxu0 %vm153_vm0, %v4252_v58 }
 0x12e   :  { %4307 = vmatmul.msk.f32.gmra.mxu2 %vm153_vm0, %v4296_v59 }
 0x12f   :  { %v5735_v21 = vpop.f32.mrf.mxu1 }
 0x131   :  { %v5746_v25 = vpop.f32.mrf.mxu2 }
 0x132   :  { %4372 = vmatmul.msk.f32.gmra.mxu1 %vm153_vm0, %v4361_v61  ;;  %v5670_v63 = vpop.f32.mrf.mxu0  ;;  %v4340_v61 = vld [vmem:[%s7625_s27 + $0x198] sm:$0xff] }
 0x135   :  { %4264 = vmatmul.msk.f32.gmra.mxu0 %vm153_vm0, %v4253_v0  ;;  %v5810_v0 = vpop.f32.mrf.mxu3 }
 0x136   :  { %4308 = vmatmul.msk.f32.gmra.mxu2 %vm153_vm0, %v4297_v1 }
 0x137   :  { %v5748_v26 = vpop.f32.mrf.mxu1 }
 0x139   :  { %v5758_v30 = vpop.f32.mrf.mxu2 }
 0x13a   :  { %4373 = vmatmul.msk.f32.gmra.mxu1 %vm153_vm0, %v4362_v2  ;;  %v5686_v4 = vpop.f32.mrf.mxu0 }
 0x13d   :  { %4265 = vmatmul.msk.f32.gmra.mxu0 %vm153_vm0, %v4254_v5  ;;  %v4341_v5 = vld [vmem:[%s7625_s27 + $0x1a0] sm:$0xff] }
 0x13e   :  { %4309 = vmatmul.msk.f32.gmra.mxu2 %vm153_vm0, %v4298_v6 }
 0x13f   :  { %v5765_v34 = vpop.f32.mrf.mxu1 }
 0x141   :  { %v5775_v39 = vpop.f32.mrf.mxu2 }
 0x142   :  { %4374 = vmatmul.msk.f32.gmra.mxu1 %vm153_vm0, %v4363_v8  ;;  %v5702_v9 = vpop.f32.mrf.mxu0  ;;  %v1268_v8 = vld [vmem:[%s7602_s3 + $0x78] sm:$0xf] }
 0x143   :  { %4377 = vmatpush.msk.msra.mxu2 %vm1303_vm1, %v1268_v8  ;;  %v1368_v8 = vld [vmem:[%s7603_s4 + $0x58] sm:$0xff] }
 0x145   :  { %4266 = vmatmul.msk.f32.gmra.mxu0 %vm153_vm0, %v4255_v10  ;;  %v1372_v10 = vld [vmem:[%s7603_s4 + $0x78] sm:$0xf] }
 0x146   :  { %4310 = vmatmul.msk.f32.gmra.mxu2 %vm153_vm0, %v4299_v12  ;;  %4389 = vmatpush.msk.msrb.mxu3 %vm1303_vm1, %v1372_v10 }
 0x147   :  { %v5778_v40 = vpop.f32.mrf.mxu1 }
 0x149   :  { %v5788_v47 = vpop.f32.mrf.mxu2 }
 0x14a   :  { %4375 = vmatmul.msk.f32.gmra.mxu1 %vm153_vm0, %v4364_v15  ;;  %v5722_v16 = vpop.f32.mrf.mxu0  ;;  %v4342_v15 = vld [vmem:[%s7625_s27 + $0x1a8] sm:$0xff] }
 0x14d   :  { %4344 = vmatmul.msk.f32.vlgmr.msra.gmra.mxu0 %vm153_vm0, %v4333_v17  ;;  %v1267_v17 = vld [vmem:[%s7602_s3 + $0x70] sm:$0xff] }
 0x14e   :  { %1308 = vmatpush.msra.mxu2 %v1267_v17  ;;  %v1263_v17 = vld [vmem:[%s7602_s3 + $0x50] sm:$0xff] }
 0x14f   :  { %v5790_v49 = vpop.f32.mrf.mxu1 }
 0x151   :  { %v5800_v55 = vpop.f32.mrf.mxu2 }
 0x152   :  { %4376 = vmatmul.msk.f32.gmra.mxu1 %vm153_vm0, %v4365_v20  ;;  %v5738_v22 = vpop.f32.mrf.mxu0  ;;  %v1371_v20 = vld [vmem:[%s7603_s4 + $0x70] sm:$0xff] }
 0x153   :  { %1377 = vmatpush.msrb.mxu3 %v1371_v20  ;;  %v1367_v20 = vld [vmem:[%s7603_s4 + $0x50] sm:$0xff] }
 0x155   :  { %4345 = vmatmul.msk.f32.gmra.mxu0 %vm153_vm0, %v4334_v23  ;;  %v5841_v23 = vpop.f32.mrf.mxu3 }
 0x156   :  { %7634 = vst [vmem:[#allocation9_spill] sm:$0xff] %v5841_v23 }
 0x157   :  { %v5802_v58 = vpop.f32.mrf.mxu1 }
 0x159   :  { %v5812_v1 = vpop.f32.mrf.mxu2 }
 0x15a   :  { %v5750_v27 = vpop.f32.mrf.mxu0 }
 0x15b   :  { %7630 = vst [vmem:[#allocation5_spill] sm:$0xff] %v5750_v27 }
 0x15d   :  { %4346 = vmatmul.msk.f32.gmra.mxu0 %vm153_vm0, %v4335_v28  ;;  %v1266_v28 = vld [vmem:[%s7602_s3 + $0x68] sm:$0xff] }
 0x15e   :  { %1309 = vmatpush.msra.mxu2 %v1266_v28  ;;  %v1262_v28 = vld [vmem:[%s7602_s3 + $0x48] sm:$0xff] }
 0x15f   :  { %v5819_v6 = vpop.f32.mrf.mxu1 }
 0x160   :  { %7633 = vst [vmem:[#allocation8_spill] sm:$0xff] %v5819_v6 }
 0x162   :  { %v5760_v31 = vpop.f32.mrf.mxu0 }
 0x163   :  { %7631 = vst [vmem:[#allocation6_spill] sm:$0xff] %v5760_v31  ;;  %v1444_v31 = vld [vmem:[%s7604_s5 + $0x38] sm:$0xff] }
 0x165   :  { %4347 = vmatmul.msk.f32.gmra.mxu0 %vm153_vm0, %v4336_v33  ;;  %v1370_v33 = vld [vmem:[%s7603_s4 + $0x68] sm:$0xff] }
 0x166   :  { %1378 = vmatpush.msrb.mxu3 %v1370_v33  ;;  %v1366_v33 = vld [vmem:[%s7603_s4 + $0x48] sm:$0xff] }
 0x16a   :  { %v5768_v35 = vpop.f32.mrf.mxu0 }
 0x16b   :  { %7632 = vst [vmem:[#allocation7_spill] sm:$0xff] %v5768_v35 }
 0x16d   :  { %4348 = vmatmul.msk.f32.gmra.mxu0 %vm153_vm0, %v4337_v36  ;;  %v5849_v36 = vpop.f32.mrf.mxu2 }
 0x16e   :  { %7635 = vst [vmem:[#allocation10_spill] sm:$0xff] %v5849_v36 }
 0x172   :  { %v5780_v42 = vpop.f32.mrf.mxu0 }
 0x175   :  { %4349 = vmatmul.msk.f32.gmra.mxu0 %vm153_vm0, %v4338_v44  ;;  %v5852_v44 = vpop.f32.mrf.mxu1 }
 0x176   :  { %7636 = vst [vmem:[#allocation11_spill] sm:$0xff] %v5852_v44  ;;  %v1447_v44 = vld [vmem:[%s7604_s5 + $0x50] sm:$0xf] }
 0x17a   :  { %v5792_v51 = vpop.f32.mrf.mxu0 }
 0x17d   :  { %4350 = vmatmul.msk.f32.gmra.mxu0 %vm153_vm0, %v4339_v52  ;;  %v1265_v52 = vld [vmem:[%s7602_s3 + $0x60] sm:$0xff] }
 0x17e   :  { %1310 = vmatpush.msra.mxu2 %v1265_v52  ;;  %v5883_v52 = vpop.f32.mrf.mxu3 }
 0x17f   :  { %7637 = vst [vmem:[#allocation12_spill] sm:$0xff] %v5883_v52 }
 0x182   :  { %v5804_v59 = vpop.f32.mrf.mxu0 }
 0x185   :  { %4351 = vmatmul.msk.f32.gmra.mxu0 %vm153_vm0, %v4340_v61  ;;  %v1369_v61 = vld [vmem:[%s7603_s4 + $0x60] sm:$0xff] }
 0x186   :  { %1379 = vmatpush.msrb.mxu3 %v1369_v61  ;;  %v5886_v61 = vpop.f32.mrf.mxu2 }
 0x187   :  { %7638 = vst [vmem:[#allocation13_spill] sm:$0xff] %v5886_v61 }
 0x188   :  { %1380 = vmatpush.msrb.mxu3 %v1368_v8  ;;  %v1365_v8 = vld [vmem:[%s7603_s4 + $0x40] sm:$0xff] }
 0x18a   :  { %v5814_v2 = vpop.f32.mrf.mxu0  ;;  %1381 = vmatpush.msrb.mxu3 %v1367_v20  ;;  %v1364_v20 = vld [vmem:[%s7603_s4 + $0x38] sm:$0xff] }
 0x18c   :  { %1382 = vmatpush.msrb.mxu3 %v1366_v33  ;;  %v1259_v33 = vld [vmem:[%s7602_s3 + $0x30] sm:$0xff] }
 0x18d   :  { %4352 = vmatmul.msk.f32.gmra.mxu0 %vm153_vm0, %v4341_v5  ;;  %v1264_v5 = vld [vmem:[%s7602_s3 + $0x58] sm:$0xff] }
 0x18e   :  { %1311 = vmatpush.msra.mxu2 %v1264_v5  ;;  %v1261_v5 = vld [vmem:[%s7602_s3 + $0x40] sm:$0xff]  ;;  %1383 = vmatpush.msrb.mxu3 %v1365_v8  ;;  %v1258_v8 = vld [vmem:[%s7602_s3 + $0x28] sm:$0xff]  ;;  %v5924_v35 = vpop.f32.mrf.mxu2 }
 0x18f   :  { %7641 = vst [vmem:[#allocation16_spill] sm:$0xff] %v5924_v35  ;;  %v5080_v35 = vmov 0  }
 0x190   :  { %1312 = vmatpush.msra.mxu2 %v1263_v17  ;;  %v5894_v17 = vpop.f32.mrf.mxu1  ;;  %1384 = vmatpush.msrb.mxu3 %v1364_v20  ;;  %v1257_v20 = vld [vmem:[%s7602_s3 + $0x20] sm:$0xff] }
 0x191   :  { %7639 = vst [vmem:[#allocation14_spill] sm:$0xff] %v5894_v17  ;;  %4974 = vset.pattern.permute.xlu1 %v5080_v35  ;;  %4975 = vset.pattern.permute.xlu2 %v5080_v35 }
 0x192   :  { %v5830_v12 = vpop.f32.mrf.mxu0  ;;  %1313 = vmatpush.msra.mxu2 %v1262_v28  ;;  %4973 = vset.pattern.permute.xlu0 %v5080_v35  ;;  %v1445_v35 = vld [vmem:[%s7604_s5 + $0x40] sm:$0xff] }
 0x193   :  { %1500 = vperm.xlu0 %4973, %v1447_v44   ;;  %1490 = vperm.xlu2 %4975, %v1445_v35   ;;  %v1442_v44 = vld [vmem:[%s7604_s5 + $0x28] sm:$0xff] }
 0x194   :  { %1314 = vmatpush.msra.mxu2 %v1261_v5  ;;  %v1363_v5 = vld [vmem:[%s7603_s4 + $0x30] sm:$0xff] }
 0x195   :  { %4353 = vmatmul.msk.f32.gmra.mxu0 %vm153_vm0, %v4342_v15  ;;  %v4343_v15 = vld [vmem:[%s7625_s27 + $0x1b0] sm:$0xf]  ;;  %1385 = vmatpush.msrb.mxu3 %v1363_v5  ;;  %v1256_v5 = vld [vmem:[%s7602_s3 + $0x18] sm:$0xff] }
 0x19a   :  { %v5866_v10 = vpop.f32.mrf.mxu0 }
 0x19b   :  { %1475 = vperm.xlu0 %4973, %v1442_v44  }
 0x19d   :  { %4354 = vmatmul.msk.f32.gmra.mxu0 %vm153_vm0, %v4343_v15  ;;  %v1260_v15 = vld [vmem:[%s7602_s3 + $0x38] sm:$0xff] }
 0x19e   :  { %1315 = vmatpush.msra.mxu2 %v1260_v15  ;;  %v1362_v15 = vld [vmem:[%s7603_s4 + $0x28] sm:$0xff] }
 0x19f   :  { %1386 = vmatpush.msrb.mxu3 %v1362_v15  ;;  %v5932_v15 = vpop.f32.mrf.mxu1 }
 0x1a0   :  { %1316 = vmatpush.msra.mxu2 %v1259_v33  ;;  %v5922_v33 = vpop.f32.mrf.mxu3  ;;  %7642 = vst [vmem:[#allocation17_spill] sm:$0xff] %v5932_v15  ;;  %v1357_v15 = vld [vmem:[%s7603_s4] sm:$0xff] }
 0x1a1   :  { %7640 = vst [vmem:[#allocation15_spill] sm:$0xff] %v5922_v33  ;;  %1387 = vmatpush.msrb.mxu3 %v1361_v3  ;;  %v1359_v3 = vld [vmem:[%s7603_s4 + $0x10] sm:$0xff]  ;;  %v1254_v33 = vld [vmem:[%s7602_s3 + $0x8] sm:$0xff] }
 0x1a2   :  { %v5902_v28 = vpop.f32.mrf.mxu0  ;;  %1317 = vmatpush.msra.mxu2 %v1258_v8  ;;  %v1360_v8 = vld [vmem:[%s7603_s4 + $0x18] sm:$0xff] }
 0x1a3   :  { %1388 = vmatpush.msrb.mxu3 %v1360_v8  ;;  %v1253_v8 = vld [vmem:[%s7602_s3] sm:$0xff] }
 0x1a4   :  { %1318 = vmatpush.msra.mxu2 %v1257_v20  ;;  %v1255_v20 = vld [vmem:[%s7602_s3 + $0x10] sm:$0xff] }
 0x1a5   :  { %1389 = vmatpush.msrb.mxu3 %v1359_v3 }
 0x1a6   :  { %1319 = vmatpush.msra.mxu2 %v1256_v5  ;;  %v1358_v5 = vld [vmem:[%s7603_s4 + $0x8] sm:$0xff] }
 0x1a7   :  { %1390 = vmatpush.msrb.mxu3 %v1358_v5  ;;  %v1198_v60 = vpop.f32.mrf.mxu1 }
 0x1a8   :  { %1320 = vmatpush.msra.mxu2 %v1255_v20  ;;  %v1446_v20 = vld [vmem:[%s7604_s5 + $0x48] sm:$0xff]  ;;  %v950_v3 = vpop.f32.mrf.mxu3 }
 0x1a9   :  { %1391 = vmatpush.msrb.mxu3 %v1357_v15  ;;  %1495 = vperm.xlu1 %4974, %v1446_v20   ;;  %v1441_v20 = vld [vmem:[%s7604_s5 + $0x20] sm:$0xff] }
 0x1aa   :  { %v5934_v17 = vpop.f32.mrf.mxu0  ;;  %1321 = vmatpush.msra.mxu2 %v1254_v33  ;;  %v844_v33 = vpop.f32.mrf.mxu2 }
 0x1ab   :  { %7643 = vst [vmem:[#allocation18_spill] sm:$0xff] %v5934_v17 }
 0x1ac   :  { %1322 = vmatpush.msra.mxu2 %v1253_v8 }
 0x1af   :  { %v1201_v61 = vpop.f32.mrf.mxu1 }
 0x1b0   :  { %v953_v15 = vpop.f32.mrf.mxu3 }
 0x1b1   :  { %1485 = vperm.xlu1 %4974, %v1444_v31   ;;  %v466_v31 = vadd.f32 %v5707_v11, %v5712_v13  ;;  %v1438_v11 = vld [vmem:[%s7604_s5 + $0x8] sm:$0xff]  ;;  %v1443_v13 = vld [vmem:[%s7604_s5 + $0x30] sm:$0xff] }
 0x1b2   :  { %v5957_v5 = vpop.f32.mrf.mxu0  ;;  %v847_v52 = vpop.f32.mrf.mxu2  ;;  %1480 = vperm.xlu2 %4975, %v1443_v13  }
 0x1b3   :  { %7644 = vst [vmem:[#allocation19_spill] sm:$0xff] %v5957_v5  ;;  %v288_v5 = vadd.f32 %v5569_v32, %v5608_v43  ;;  %v735_v54 = vadd.f32 %v5715_v14, %v466_v31  ;;  %v469_v32 = vadd.f32 %v5727_v18, %v5730_v19  ;;  %v291_v31 = vadd.f32 %v5599_v41, %v5630_v50 }
 0x1b4   :  { %v472_v41 = vadd.f32 %v5744_v24, %v5746_v25  ;;  %v1437_v24 = vld [vmem:[%s7604_s5] sm:$0xff]  ;;  %v475_v25 = vadd.f32 %v5756_v29, %v5758_v30 }
 0x1b5   :  { %v629_v36 = vadd.f32 %v5780_v42, %v288_v5  ;;  %v983_v43 = vadd.f32 %v950_v3, %v735_v54  ;;  %v630_v6 = vadd.f32 %v5792_v51, %v291_v31  ;;  %v1439_v54 = vld [vmem:[%s7604_s5 + $0x10] sm:$0xff]  ;;  %v294_v3 = vadd.f32 %v5622_v48, %v5652_v57 }
 0x1b6   :  { %1460 = vperm.xlu0 %4973, %v1439_v54  }
 0x1b7   :  { %v877_v14 = vadd.f32 %v844_v33, %v629_v36  ;;  %v1231_v5 = vadd.f32 %v1198_v60, %v983_v43  ;;  %v1440_v60 = vld [vmem:[%s7604_s5 + $0x18] sm:$0xff]  ;;  %v878_v19 = vadd.f32 %v847_v52, %v630_v6  ;;  %v737_v33 = vadd.f32 %v5748_v26, %v472_v41 }
 0x1b8   :  { %v956_v27 = vpop.f32.mrf.mxu3  ;;  %v631_v13 = vadd.f32 %v5804_v59, %v294_v3 }
 0x1b9   :  { %1470 = vperm.xlu1 %4974, %v1441_v20   ;;  %v1204_v20 = vpop.f32.mrf.mxu1  ;;  %v985_v6 = vadd.f32 %v956_v27, %v737_v33  ;;  %v478_v27 = vadd.f32 %v5773_v38, %v5775_v39  ;;  %v481_v38 = vadd.f32 %v5785_v46, %v5788_v47  ;;  %v484_v47 = vadd.f32 %v5798_v53, %v5800_v55 }
 0x1ba   :  { %v5962_v8 = vpop.f32.mrf.mxu0  ;;  %v850_v23 = vpop.f32.mrf.mxu2  ;;  %1465 = vperm.xlu2 %4975, %v1440_v60   ;;  %v487_v53 = vadd.f32 %v5810_v0, %v5812_v1  ;;  %v7650_v0 = vld [vmem:[#allocation9_spill] sm:$0xff] }
 0x1bb   :  { %7645 = vst [vmem:[#allocation20_spill] sm:$0xff] %v5962_v8  ;;  %v879_v52 = vadd.f32 %v850_v23, %v631_v13 }
 0x1c0   :  { %v959_v44 = vpop.f32.mrf.mxu3 }
 0x1c1   :  { %1455 = vperm.xlu1 %4974, %v1438_v11  }
 0x1c2   :  { %v5975_v8 = vpop.f32.mrf.mxu0  ;;  %v853_v18 = vpop.f32.mrf.mxu2  ;;  %1450 = vperm.xlu2 %4975, %v1437_v24  }
 0x1c3   :  { %7646 = vst [vmem:[#allocation21_spill] sm:$0xff] %v5975_v8  ;;  %v736_v8 = vadd.f32 %v5735_v21, %v469_v32  ;;  %v1207_v21 = vpop.f32.mrf.mxu1  ;;  %v738_v32 = vadd.f32 %v5765_v34, %v475_v25 }
 0x1c5   :  { %v984_v50 = vadd.f32 %v953_v15, %v736_v8  ;;  %v297_v15 = vadd.f32 %v5649_v56, %v5670_v63  ;;  %v986_v29 = vadd.f32 %v959_v44, %v738_v32  ;;  %v300_v56 = vadd.f32 %v5667_v62, %v5686_v4 }
 0x1c6   :  { %v739_v63 = vadd.f32 %v5778_v40, %v478_v27  ;;  %v303_v62 = vadd.f32 %v5694_v7, %v5702_v9  ;;  %v740_v4 = vadd.f32 %v5790_v49, %v481_v38  ;;  %v306_v9 = vadd.f32 %v5587_v37, %v5722_v16 }
 0x1c7   :  { %v1232_v36 = vadd.f32 %v1201_v61, %v984_v50  ;;  %v1233_v61 = vadd.f32 %v1204_v20, %v985_v6  ;;  %v1234_v20 = vadd.f32 %v1207_v21, %v986_v29  ;;  %v633_v31 = vadd.f32 %v5830_v12, %v300_v56  ;;  %v7653_v29 = vld [vmem:[#allocation11_spill] sm:$0xff] }
 0x1c8   :  { %v962_v48 = vpop.f32.mrf.mxu3  ;;  %v634_v50 = vadd.f32 %v5866_v10, %v303_v62  ;;  %v741_v49 = vadd.f32 %v5802_v58, %v484_v47  ;;  %v635_v10 = vadd.f32 %v5902_v28, %v306_v9  ;;  %v309_v16 = vadd.f32 %v5613_v45, %v5738_v22  ;;  %v7647_v58 = vld [vmem:[#allocation8_spill] sm:$0xff]  ;;  %v7651_v22 = vld [vmem:[#allocation5_spill] sm:$0xff]  ;;  %v7659_v62 = vld [vmem:[#allocation14_spill] sm:$0xff] }
 0x1c9   :  { %v987_v39 = vadd.f32 %v962_v48, %v739_v63  ;;  %v742_v28 = vadd.f32 %v7647_v58, %v487_v53  ;;  %v7662_v47 = vld [vmem:[#allocation15_spill] sm:$0xff] }
 0x1ca   :  { %v1092_v42 = vpop.f32.mrf.mxu0  ;;  %v856_v57 = vpop.f32.mrf.mxu2 }
 0x1cb   :  { %v1125_v35 = vadd.f32 %v1092_v42, %v877_v14  ;;  %v1210_v59 = vpop.f32.mrf.mxu1  ;;  %v632_v14 = vadd.f32 %v5814_v2, %v297_v15  ;;  %v881_v44 = vadd.f32 %v856_v57, %v633_v31  ;;  %v7649_v57 = vld [vmem:[#allocation10_spill] sm:$0xff] }
 0x1cc   :  { %v1235_v60 = vadd.f32 %v1210_v59, %v987_v39  ;;  %v490_v1 = vadd.f32 %v7650_v0, %v7649_v57 }
 0x1cd   :  { %v1242_v17 = vmax.f32 %v1125_v35, %v1231_v5  ;;  %v880_v30 = vadd.f32 %v853_v18, %v632_v14  ;;  %v7652_v14 = vld [vmem:[#allocation2_spill] sm:$0xff] }
 0x1ce   :  { %v312_v27 = vadd.f32 %v7652_v14, %v7651_v22 }
 0x1cf   :  { %4378 = vmatmul.msk.f32.vlgmr.msra.gmra.mxu2 %vm1269_vm2, %v1242_v17  ;;  %4390 = vmatmul.msk.f32.vlgmr.msrb.gmra.mxu3 %vm1269_vm2, %v1242_v17 }
 0x1d0   :  { %v965_v42 = vpop.f32.mrf.mxu3 }
 0x1d2   :  { %v1095_v51 = vpop.f32.mrf.mxu0  ;;  %v859_v35 = vpop.f32.mrf.mxu2 }
 0x1d3   :  { %v1126_v17 = vadd.f32 %v1095_v51, %v878_v19  ;;  %v1213_v2 = vpop.f32.mrf.mxu1  ;;  %v988_v19 = vadd.f32 %v965_v42, %v740_v4  ;;  %v882_v21 = vadd.f32 %v859_v35, %v634_v50  ;;  %v7656_v35 = vld [vmem:[#allocation12_spill] sm:$0xff] }
 0x1d5   :  { %v1243_v11 = vmax.f32 %v1126_v17, %v1232_v36  ;;  %v1236_v36 = vadd.f32 %v1213_v2, %v988_v19 }
 0x1d7   :  { %4379 = vmatmul.msk.f32.gmra.mxu2 %vm1269_vm2, %v1243_v11  ;;  %4391 = vmatmul.msk.f32.gmra.mxu3 %vm1269_vm2, %v1243_v11 }
 0x1d8   :  { %v968_v40 = vpop.f32.mrf.mxu3 }
 0x1d9   :  { %v989_v55 = vadd.f32 %v968_v40, %v741_v49  ;;  %v7663_v49 = vld [vmem:[#allocation7_spill] sm:$0xff] }
 0x1da   :  { %v1098_v26 = vpop.f32.mrf.mxu0  ;;  %v862_v12 = vpop.f32.mrf.mxu2 }
 0x1db   :  { %v1127_v8 = vadd.f32 %v1098_v26, %v879_v52  ;;  %v1216_v46 = vpop.f32.mrf.mxu1  ;;  %v883_v11 = vadd.f32 %v862_v12, %v635_v10  ;;  %v7648_v52 = vld [vmem:[#allocation18_spill] sm:$0xff]  ;;  %v7660_v12 = vld [vmem:[#allocation20_spill] sm:$0xff] }
 0x1dc   :  { %v1237_v25 = vadd.f32 %v1216_v46, %v989_v55  ;;  %v636_v48 = vadd.f32 %v7648_v52, %v309_v16  ;;  %v7661_v46 = vld [vmem:[#allocation16_spill] sm:$0xff] }
 0x1dd   :  { %v1244_v43 = vmax.f32 %v1127_v8, %v1233_v61  ;;  %v496_v19 = vadd.f32 %v7662_v47, %v7661_v46 }
 0x1df   :  { %4380 = vmatmul.msk.f32.gmra.mxu2 %vm1269_vm2, %v1244_v43  ;;  %4392 = vmatmul.msk.f32.gmra.mxu3 %vm1269_vm2, %v1244_v43 }
 0x1e0   :  { %v971_v3 = vpop.f32.mrf.mxu3 }
 0x1e1   :  { %v990_v26 = vadd.f32 %v971_v3, %v742_v28  ;;  %v7665_v3 = vld [vmem:[#allocation17_spill] sm:$0xff] }
 0x1e2   :  { %v1101_v23 = vpop.f32.mrf.mxu0  ;;  %v865_v33 = vpop.f32.mrf.mxu2 }
 0x1e3   :  { %v1128_v5 = vadd.f32 %v1101_v23, %v880_v30  ;;  %v1219_v13 = vpop.f32.mrf.mxu1  ;;  %v884_v61 = vadd.f32 %v865_v33, %v636_v48  ;;  %v743_v30 = vadd.f32 %v7653_v29, %v490_v1  ;;  %v745_v33 = vadd.f32 %v7665_v3, %v496_v19 }
 0x1e4   :  { %v1238_v32 = vadd.f32 %v1219_v13, %v990_v26  ;;  %v7666_v13 = vld [vmem:[#allocation21_spill] sm:$0xff] }
 0x1e5   :  { %v1245_v34 = vmax.f32 %v1128_v5, %v1234_v20  ;;  %v7654_v20 = vld [vmem:[#allocation19_spill] sm:$0xff]  ;;  %v7655_v5 = vld [vmem:[#allocation13_spill] sm:$0xff] }
 0x1e6   :  { %v637_v42 = vadd.f32 %v7654_v20, %v312_v27  ;;  %v493_v56 = vadd.f32 %v7656_v35, %v7655_v5 }
 0x1e7   :  { %4381 = vmatmul.msk.f32.gmra.mxu2 %vm1269_vm2, %v1245_v34  ;;  %4393 = vmatmul.msk.f32.gmra.mxu3 %vm1269_vm2, %v1245_v34 }
 0x1e8   :  { %v974_v8 = vpop.f32.mrf.mxu3  ;;  %v744_v4 = vadd.f32 %v7659_v62, %v493_v56 }
 0x1e9   :  { %v991_v63 = vadd.f32 %v974_v8, %v743_v30 }
 0x1ea   :  { %v1104_v54 = vpop.f32.mrf.mxu0  ;;  %v868_v59 = vpop.f32.mrf.mxu2 }
 0x1eb   :  { %v1129_v18 = vadd.f32 %v1104_v54, %v881_v44  ;;  %v1222_v45 = vpop.f32.mrf.mxu1  ;;  %v885_v34 = vadd.f32 %v868_v59, %v637_v42  ;;  %v7657_v54 = vld [vmem:[#allocation6_spill] sm:$0xff] }
 0x1ec   :  { %v1239_v31 = vadd.f32 %v1222_v45, %v991_v63 }
 0x1ed   :  { %v1246_v41 = vmax.f32 %v1129_v18, %v1235_v60  ;;  %v7658_v60 = vld [vmem:[#allocation3_spill] sm:$0xff] }
 0x1ee   :  { %v315_v18 = vadd.f32 %v7658_v60, %v7657_v54 }
 0x1ef   :  { %4382 = vmatmul.msk.f32.gmra.mxu2 %vm1269_vm2, %v1246_v41  ;;  %4394 = vmatmul.msk.f32.gmra.mxu3 %vm1269_vm2, %v1246_v41 }
 0x1f0   :  { %v977_v39 = vpop.f32.mrf.mxu3  ;;  %v638_v50 = vadd.f32 %v7660_v12, %v315_v18 }
 0x1f2   :  { %v1107_v51 = vpop.f32.mrf.mxu0  ;;  %v871_v44 = vpop.f32.mrf.mxu2 }
 0x1f3   :  { %v1130_v7 = vadd.f32 %v1107_v51, %v882_v21  ;;  %v1225_v41 = vpop.f32.mrf.mxu1  ;;  %v992_v21 = vadd.f32 %v977_v39, %v744_v4  ;;  %v886_v51 = vadd.f32 %v871_v44, %v638_v50 }
 0x1f5   :  { %v1247_v17 = vmax.f32 %v1130_v7, %v1236_v36  ;;  %v1240_v7 = vadd.f32 %v1225_v41, %v992_v21 }
 0x1f7   :  { %4383 = vmatmul.msk.f32.gmra.mxu2 %vm1269_vm2, %v1247_v17  ;;  %4395 = vmatmul.msk.f32.gmra.mxu3 %vm1269_vm2, %v1247_v17  ;;  %v7664_v17 = vld [vmem:[#allocation4_spill] sm:$0xff] }
 0x1f8   :  { %v318_v10 = vadd.f32 %v7664_v17, %v7663_v49  ;;  %v980_v55 = vpop.f32.mrf.mxu3 }
 0x1fa   :  { %v1110_v24 = vpop.f32.mrf.mxu0 }
 0x1fb   :  { %v1131_v37 = vadd.f32 %v1110_v24, %v883_v11  ;;  %v874_v11 = vpop.f32.mrf.mxu2  ;;  %v639_v24 = vadd.f32 %v7666_v13, %v318_v10 }
 0x1fd   :  { %v1248_v6 = vmax.f32 %v1131_v37, %v1237_v25  ;;  %v1228_v25 = vpop.f32.mrf.mxu1  ;;  %v993_v37 = vadd.f32 %v980_v55, %v745_v33  ;;  %v887_v16 = vadd.f32 %v874_v11, %v639_v24 }
 0x1ff   :  { %4384 = vmatmul.msk.f32.gmra.mxu2 %vm1269_vm2, %v1248_v6  ;;  %4396 = vmatmul.msk.f32.gmra.mxu3 %vm1269_vm2, %v1248_v6  ;;  %v1241_v28 = vadd.f32 %v1228_v25, %v993_v37 }
 0x202   :  { %v1113_v15 = vpop.f32.mrf.mxu0 }
 0x203   :  { %v1132_v43 = vadd.f32 %v1113_v15, %v884_v61 }
 0x205   :  { %v1249_v23 = vmax.f32 %v1132_v43, %v1238_v32  ;;  %v1491_v32 = vpop.permute.xlu2 %1490 }
 0x207   :  { %4385 = vmatmul.msk.f32.gmra.mxu2 %vm1269_vm2, %v1249_v23  ;;  %4397 = vmatmul.msk.f32.gmra.mxu3 %vm1269_vm2, %v1249_v23 }
 0x20a   :  { %v1116_v2 = vpop.f32.mrf.mxu0 }
 0x20b   :  { %v1133_v38 = vadd.f32 %v1116_v2, %v885_v34  ;;  %v1501_v2 = vpop.permute.xlu0 %1500 }
 0x20d   :  { %v1250_v40 = vmax.f32 %v1133_v38, %v1239_v31  ;;  %v1481_v29 = vpop.permute.xlu2 %1480 }
 0x20f   :  { %4386 = vmatmul.msk.f32.gmra.mxu2 %vm1269_vm2, %v1250_v40  ;;  %4398 = vmatmul.msk.f32.gmra.mxu3 %vm1269_vm2, %v1250_v40 }
 0x212   :  { %v1119_v36 = vpop.f32.mrf.mxu0 }
 0x213   :  { %v1134_v9 = vadd.f32 %v1119_v36, %v886_v51  ;;  %v1476_v46 = vpop.permute.xlu0 %1475 }
 0x215   :  { %v1251_v53 = vmax.f32 %v1134_v9, %v1240_v7  ;;  %v1466_v42 = vpop.permute.xlu2 %1465 }
 0x217   :  { %4387 = vmatmul.msk.f32.gmra.mxu2 %vm1269_vm2, %v1251_v53  ;;  %4399 = vmatmul.msk.f32.gmra.mxu3 %vm1269_vm2, %v1251_v53 }
 0x21a   :  { %v1122_v58 = vpop.f32.mrf.mxu0 }
 0x21b   :  { %v1135_v6 = vadd.f32 %v1122_v58, %v887_v16  ;;  %v1496_v15 = vpop.permute.xlu1 %1495 }
 0x21d   :  { %v1252_v52 = vmax.f32 %v1135_v6, %v1241_v28  ;;  %v1451_v18 = vpop.permute.xlu2 %1450 }
 0x21f   :  { %4388 = vmatmul.msk.f32.gmra.mxu2 %vm1269_vm2, %v1252_v52  ;;  %4400 = vmatmul.msk.f32.gmra.mxu3 %vm1269_vm2, %v1252_v52 }
 0x223   :  { %v1486_v22 = vpop.permute.xlu1 %1485 }
 0x228   :  { %v1461_v53 = vpop.permute.xlu0 %1460 }
 0x22b   :  { %v1471_v20 = vpop.permute.xlu1 %1470 }
 0x233   :  { %v1456_v39 = vpop.permute.xlu1 %1455 }
 0x252   :  { %v1324_v48 = vpop.f32.mrf.mxu2  ;;  %v1393_v57 = vpop.f32.mrf.mxu3 }
 0x253   :  { %v1426_v44 = vmax.f32 %v1324_v48, %v1393_v57 }
 0x255   :  { %v1503_v12 = vadd.f32 %v1451_v18, %v1426_v44  ;;  %v1531_v44 = vld [vmem:[%s7606_s6 + $0x30] sm:$0xff]  ;;  %v2866_v18 = vld [vmem:[%s7607_s13 + $0x40] sm:$0xff] }
 0x257   :  { %v6087_v47 = vmax.f32 %v1503_v12, 0.0  ;;  %v2863_v12 = vld [vmem:[%s7607_s13 + $0x28] sm:$0xff] }
 0x25a   :  { %v1327_v0 = vpop.f32.mrf.mxu2  ;;  %v1396_v1 = vpop.f32.mrf.mxu3 }
 0x25b   :  { %v1427_v31 = vmax.f32 %v1327_v0, %v1396_v1 }
 0x25d   :  { %v1504_v62 = vadd.f32 %v1456_v39, %v1427_v31  ;;  %v2787_v31 = vld [vmem:[%s7605_s10 + $0x48] sm:$0xff]  ;;  %v2869_v39 = vld [vmem:[%s7607_s13 + $0x58] sm:$0xff] }
 0x25f   :  { %v6085_v50 = vmax.f32 %v1504_v62, 0.0  ;;  %v1532_v62 = vld [vmem:[%s7606_s6 + $0x38] sm:$0xff] }
 0x261   :  { %v6091_v21 = vpack.i.bf16 %v6087_v47, %v6085_v50 }
 0x262   :  { %v1330_v26 = vpop.f32.mrf.mxu2  ;;  %v1399_v61 = vpop.f32.mrf.mxu3 }
 0x263   :  { %v1428_v10 = vmax.f32 %v1330_v26, %v1399_v61 }
 0x265   :  { %v1505_v25 = vadd.f32 %v1461_v53, %v1428_v10  ;;  %v1537_v53 = vld [vmem:[%s7608_s7 + $0x10] sm:$0xff] }
 0x267   :  { %v1516_v52 = vmax.f32 %v1505_v25, 0.0 }
 0x26a   :  { %v1333_v8 = vpop.f32.mrf.mxu2  ;;  %v1402_v59 = vpop.f32.mrf.mxu3 }
 0x26b   :  { %v1429_v49 = vmax.f32 %v1333_v8, %v1402_v59  ;;  %v2780_v59 = vld [vmem:[%s7605_s10 + $0x10] sm:$0xff] }
 0x26d   :  { %v1506_v55 = vadd.f32 %v1466_v42, %v1429_v49  ;;  %v2868_v42 = vld [vmem:[%s7607_s13 + $0x50] sm:$0xff] }
 0x26f   :  { %v1517_v58 = vmax.f32 %v1506_v55, 0.0 }
 0x271   :  { %v4991_v1 = vpack.i.bf16 %v1516_v52, %v1517_v58 }
 0x272   :  { %v1336_v43 = vpop.f32.mrf.mxu2  ;;  %v1405_v45 = vpop.f32.mrf.mxu3 }
 0x273   :  { %v1430_v28 = vmax.f32 %v1336_v43, %v1405_v45  ;;  %v1526_v43 = vld [vmem:[%s7606_s6 + $0x8] sm:$0xff]  ;;  %v2786_v45 = vld [vmem:[%s7605_s10 + $0x40] sm:$0xff] }
 0x275   :  { %v1507_v0 = vadd.f32 %v1471_v20, %v1430_v28  ;;  %v2781_v20 = vld [vmem:[%s7605_s10 + $0x18] sm:$0xff]  ;;  %v2858_v28 = vld [vmem:[%s7607_s13] sm:$0xff] }
 0x277   :  { %v1518_v61 = vmax.f32 %v1507_v0, 0.0  ;;  %v1538_v0 = vld [vmem:[%s7608_s7 + $0x18] sm:$0xff] }
 0x27a   :  { %v1339_v14 = vpop.f32.mrf.mxu2  ;;  %v1408_v27 = vpop.f32.mrf.mxu3 }
 0x27b   :  { %v1431_v37 = vmax.f32 %v1339_v14, %v1408_v27  ;;  %v1527_v14 = vld [vmem:[%s7606_s6 + $0x10] sm:$0xff]  ;;  %v2778_v27 = vld [vmem:[%s7605_s10] sm:$0xff] }
 0x27d   :  { %v1508_v48 = vadd.f32 %v1476_v46, %v1431_v37 }
 0x27f   :  { %v1519_v26 = vmax.f32 %v1508_v48, 0.0  ;;  %v3964_v48 = vld [vmem:[%s7609_s15] sm:$0xff] }
 0x281   :  { %v4986_v8 = vpack.i.bf16 %v1518_v61, %v1519_v26 }
 0x282   :  { %v1342_v30 = vpop.f32.mrf.mxu2  ;;  %v1411_v23 = vpop.f32.mrf.mxu3 }
 0x283   :  { %v1432_v5 = vmax.f32 %v1342_v30, %v1411_v23  ;;  %v2782_v30 = vld [vmem:[%s7605_s10 + $0x20] sm:$0xff]  ;;  %v1528_v23 = vld [vmem:[%s7606_s6 + $0x18] sm:$0xff] }
 0x285   :  { %v1509_v63 = vadd.f32 %v1481_v29, %v1432_v5  ;;  %v2871_v29 = vld [vmem:[%s7607_s13 + $0x68] sm:$0xff]  ;;  %v2785_v5 = vld [vmem:[%s7605_s10 + $0x38] sm:$0xff] }
 0x287   :  { %v1520_v54 = vmax.f32 %v1509_v63, 0.0  ;;  %v2865_v63 = vld [vmem:[%s7607_s13 + $0x38] sm:$0xff] }
 0x28a   :  { %v1345_v35 = vpop.f32.mrf.mxu2  ;;  %v1414_v56 = vpop.f32.mrf.mxu3 }
 0x28b   :  { %v1433_v34 = vmax.f32 %v1345_v35, %v1414_v56  ;;  %v1529_v35 = vld [vmem:[%s7606_s6 + $0x20] sm:$0xff]  ;;  %v2784_v56 = vld [vmem:[%s7605_s10 + $0x30] sm:$0xff] }
 0x28d   :  { %v1510_v38 = vadd.f32 %v1486_v22, %v1433_v34  ;;  %v2779_v22 = vld [vmem:[%s7605_s10 + $0x8] sm:$0xff]  ;;  %v2872_v34 = vld [vmem:[%s7607_s13 + $0x70] sm:$0xff] }
 0x28f   :  { %v1521_v60 = vmax.f32 %v1510_v38, 0.0  ;;  %v2862_v38 = vld [vmem:[%s7607_s13 + $0x20] sm:$0xff] }
 0x291   :  { %v6081_v4 = vpack.i.bf16 %v1520_v54, %v1521_v60 }
 0x292   :  { %v1348_v40 = vpop.f32.mrf.mxu2  ;;  %v1417_v41 = vpop.f32.mrf.mxu3 }
 0x293   :  { %4982 = vrot.lane.b32.xlu2 %v6081_v4, %s5076_s23  ;;  %v1434_v19 = vmax.f32 %v1348_v40, %v1417_v41  ;;  %v2867_v40 = vld [vmem:[%s7607_s13 + $0x48] sm:$0xff] }
 0x294   :  { %v3973_v41 = vld [vmem:[%s7609_s15 + $0x48] sm:$0xff] }
 0x295   :  { %v1511_v7 = vadd.f32 %v1491_v32, %v1434_v19  ;;  %v2783_v32 = vld [vmem:[%s7605_s10 + $0x28] sm:$0xff]  ;;  %v2864_v19 = vld [vmem:[%s7607_s13 + $0x30] sm:$0xff] }
 0x297   :  { %v1522_v3 = vmax.f32 %v1511_v7, 0.0  ;;  %v1534_v7 = vld [vmem:[%s7606_s6 + $0x48] sm:$0xff] }
 0x29a   :  { %v1351_v51 = vpop.f32.mrf.mxu2  ;;  %v1420_v36 = vpop.f32.mrf.mxu3 }
 0x29b   :  { %v1435_v9 = vmax.f32 %v1351_v51, %v1420_v36  ;;  %4997 = vrot.lane.b32.xlu2 %v6091_v21, %s5076_s23  ;;  %v3970_v51 = vld [vmem:[%s7609_s15 + $0x30] sm:$0xff] }
 0x29c   :  { %v2860_v36 = vld [vmem:[%s7607_s13 + $0x10] sm:$0xff] }
 0x29d   :  { %v1512_v17 = vadd.f32 %v1496_v15, %v1435_v9  ;;  %v1525_v15 = vld [vmem:[%s7606_s6] sm:$0xff] }
 0x29f   :  { %v1523_v33 = vmax.f32 %v1512_v17, 0.0 }
 0x2a1   :  { %v4976_v11 = vpack.i.bf16 %v1522_v3, %v1523_v33 }
 0x2a2   :  { %v1354_v13 = vpop.f32.mrf.mxu2  ;;  %v1423_v24 = vpop.f32.mrf.mxu3 }
 0x2a3   :  { %v1436_v16 = vmax.f32 %v1354_v13, %v1423_v24  ;;  %5007 = vrot.lane.b32.xlu2 %v6081_v4, %s5077_s29  ;;  %4977 = vrot.lane.b32.xlu1 %v4976_v11, %s5076_s23  ;;  %v3974_v13 = vld [vmem:[%s7609_s15 + $0x50] sm:$0xf] }
 0x2a5   :  { %v1513_v6 = vadd.f32 %v1501_v2, %v1436_v16  ;;  %v1530_v2 = vld [vmem:[%s7606_s6 + $0x28] sm:$0xff] }
 0x2a7   :  { %v1524_v57 = vmax.f32 %v1513_v6, 0.0 }
 0x2a9   :  { %1587 = vrot.lane.b32.xlu0 %v1524_v57, %s5076_s23  ;;  %4422 = vmatpush.msk.msrb.mxu1 %vm1303_vm1, %v1524_v57 }
 0x2aa   :  { %4454 = vmatpush.msk.msra.mxu3 %vm1303_vm1, %v1524_v57 }
 0x2ab   :  { %5022 = vrot.lane.b32.xlu2 %v6091_v21, %s5077_s29  ;;  %4992 = vrot.lane.b32.xlu1 %v4991_v1, %s5076_s23 }
 0x2ac   :  { %1717 = vmatpush.msrb.mxu1 %v1523_v33  ;;  %1882 = vmatpush.msra.mxu3 %v1523_v33  ;;  %v2861_v33 = vld [vmem:[%s7607_s13 + $0x18] sm:$0xff] }
 0x2ae   :  { %1718 = vmatpush.msrb.mxu1 %v1522_v3  ;;  %1883 = vmatpush.msra.mxu3 %v1522_v3 }
 0x2b0   :  { %1719 = vmatpush.msrb.mxu1 %v1521_v60  ;;  %1884 = vmatpush.msra.mxu3 %v1521_v60  ;;  %v2859_v60 = vld [vmem:[%s7607_s13 + $0x8] sm:$0xff] }
 0x2b1   :  { %4987 = vrot.lane.b32.xlu0 %v4986_v8, %s5076_s23 }
 0x2b2   :  { %1720 = vmatpush.msrb.mxu1 %v1520_v54  ;;  %1885 = vmatpush.msra.mxu3 %v1520_v54  ;;  %v2870_v54 = vld [vmem:[%s7607_s13 + $0x60] sm:$0xff] }
 0x2b3   :  { %5032 = vrot.lane.b32.xlu2 %v6081_v4, %s5078_s1  ;;  %5002 = vrot.lane.b32.xlu1 %v4976_v11, %s5077_s29 }
 0x2b4   :  { %1721 = vmatpush.msrb.mxu1 %v1519_v26  ;;  %1886 = vmatpush.msra.mxu3 %v1519_v26 }
 0x2b6   :  { %1722 = vmatpush.msrb.mxu1 %v1518_v61  ;;  %1887 = vmatpush.msra.mxu3 %v1518_v61 }
 0x2b8   :  { %1723 = vmatpush.msrb.mxu1 %v1517_v58  ;;  %1888 = vmatpush.msra.mxu3 %v1517_v58 }
 0x2b9   :  { %1954 = vrot.lane.b32.xlu0 %v1524_v57, %s5077_s29 }
 0x2ba   :  { %1724 = vmatpush.msrb.mxu1 %v1516_v52  ;;  %1889 = vmatpush.msra.mxu3 %v1516_v52 }
 0x2bb   :  { %5042 = vrot.lane.b32.xlu2 %v4976_v11, %s5079_s20  ;;  %5017 = vrot.lane.b32.xlu1 %v4991_v1, %s5077_s29 }
 0x2bc   :  { %1725 = vmatpush.msrb.mxu1 %v6085_v50  ;;  %1890 = vmatpush.msra.mxu3 %v6085_v50  ;;  %v1533_v50 = vld [vmem:[%s7606_s6 + $0x40] sm:$0xff] }
 0x2be   :  { %1726 = vmatpush.msrb.mxu1 %v6087_v47  ;;  %1891 = vmatpush.msra.mxu3 %v6087_v47 }
 0x2bf   :  { %4423 = vmatmul.msk.f32.vlgmr.msrb.gmra.mxu1 %vm1599_vm3, %v1525_v15 }
 0x2c1   :  { %5012 = vrot.lane.b32.xlu0 %v4986_v8, %s5077_s29 }
 0x2c3   :  { %5057 = vrot.lane.b32.xlu2 %v6091_v21, %s5078_s1  ;;  %5027 = vrot.lane.b32.xlu1 %v4976_v11, %s5078_s1  ;;  %v3967_v11 = vld [vmem:[%s7609_s15 + $0x18] sm:$0xff] }
 0x2c7   :  { %4424 = vmatmul.msk.f32.gmra.mxu1 %vm1599_vm3, %v1526_v43 }
 0x2c9   :  { %2184 = vrot.lane.b32.xlu0 %v1524_v57, %s5078_s1 }
 0x2cb   :  { %5072 = vrot.lane.b32.xlu2 %v6091_v21, %s5079_s20  ;;  %5037 = vrot.lane.b32.xlu1 %v4986_v8, %s5078_s1  ;;  %v1536_v21 = vld [vmem:[%s7608_s7 + $0x8] sm:$0xff] }
 0x2cf   :  { %4425 = vmatmul.msk.f32.gmra.mxu1 %vm1599_vm3, %v1527_v14 }
 0x2d1   :  { %2414 = vrot.lane.b32.xlu0 %v1524_v57, %s5079_s20  ;;  %v3971_v57 = vld [vmem:[%s7609_s15 + $0x38] sm:$0xff] }
 0x2d3   :  { %2800 = vperm.xlu2 %4975, %v2780_v59   ;;  %5052 = vrot.lane.b32.xlu1 %v6081_v4, %s5079_s20  ;;  %v1535_v4 = vld [vmem:[%s7608_s7] sm:$0xff] }
 0x2d4   :  { %4455 = vmatmul.msk.f32.vlgmr.msra.gmra.mxu3 %vm1599_vm3, %v1535_v4  ;;  %v3966_v4 = vld [vmem:[%s7609_s15 + $0x10] sm:$0xff] }
 0x2d7   :  { %4426 = vmatmul.msk.f32.gmra.mxu1 %vm1599_vm3, %v1528_v23 }
 0x2d9   :  { %5047 = vrot.lane.b32.xlu0 %v4991_v1, %s5078_s1 }
 0x2db   :  { %2815 = vperm.xlu2 %4975, %v2783_v32   ;;  %5067 = vrot.lane.b32.xlu1 %v4991_v1, %s5079_s20  ;;  %v3972_v32 = vld [vmem:[%s7609_s15 + $0x40] sm:$0xff] }
 0x2dc   :  { %4456 = vmatmul.msk.f32.gmra.mxu3 %vm1599_vm3, %v1536_v21 }
 0x2df   :  { %4427 = vmatmul.msk.f32.gmra.mxu1 %vm1599_vm3, %v1529_v35 }
 0x2e1   :  { %5062 = vrot.lane.b32.xlu0 %v4986_v8, %s5079_s20 }
 0x2e3   :  { %2830 = vperm.xlu2 %4975, %v2786_v45   ;;  %2795 = vperm.xlu1 %4974, %v2779_v22   ;;  %v4401_v45 = vld [vmem:[%s7606_s6 + $0x50] sm:$0xff] }
 0x2e4   :  { %4457 = vmatmul.msk.f32.gmra.mxu3 %vm1599_vm3, %v1537_v53  ;;  %v4433_v22 = vld [vmem:[%s7608_s7 + $0x50] sm:$0xff] }
 0x2e7   :  { %4428 = vmatmul.msk.f32.gmra.mxu1 %vm1599_vm3, %v1530_v2  ;;  %v3965_v2 = vld [vmem:[%s7609_s15 + $0x8] sm:$0xff] }
 0x2e9   :  { %2790 = vperm.xlu0 %4973, %v2778_v27  }
 0x2eb   :  { %3147 = vperm.xlu2 %4975, %v2871_v29   ;;  %2810 = vperm.xlu1 %4974, %v2782_v30   ;;  %v3968_v29 = vld [vmem:[%s7609_s15 + $0x20] sm:$0xff] }
 0x2ec   :  { %4458 = vmatmul.msk.f32.gmra.mxu3 %vm1599_vm3, %v1538_v0  ;;  %v1539_v30 = vld [vmem:[%s7608_s7 + $0x20] sm:$0xff] }
 0x2ed   :  { %v4983_v46 = vpop.permute.xlu2 %4982 }
 0x2ee   :  { %v4984_v55 = vunpack.i.l.bf16 %v4983_v46  ;;  %v4985_v24 = vunpack.i.h.bf16 %v4983_v46 }
 0x2ef   :  { %4429 = vmatmul.msk.f32.gmra.mxu1 %vm1599_vm3, %v1531_v44 }
 0x2f1   :  { %2805 = vperm.xlu0 %4973, %v2781_v20  }
 0x2f3   :  { %3132 = vperm.xlu2 %4975, %v2868_v42   ;;  %2825 = vperm.xlu1 %4974, %v2785_v5  }
 0x2f4   :  { %4459 = vmatmul.msk.f32.gmra.mxu3 %vm1599_vm3, %v1539_v30  ;;  %v4439_v30 = vld [vmem:[%s7608_s7 + $0x80] sm:$0xff] }
 0x2f5   :  { %v4998_v17 = vpop.permute.xlu2 %4997 }
 0x2f6   :  { %v4999_v61 = vunpack.i.l.bf16 %v4998_v17  ;;  %v5000_v15 = vunpack.i.h.bf16 %v4998_v17 }
 0x2f7   :  { %4430 = vmatmul.msk.f32.gmra.mxu1 %vm1599_vm3, %v1532_v62 }
 0x2f9   :  { %2820 = vperm.xlu0 %4973, %v2784_v56   ;;  %v3969_v56 = vld [vmem:[%s7609_s15 + $0x28] sm:$0xff] }
 0x2fb   :  { %3117 = vperm.xlu2 %4975, %v2865_v63   ;;  %3152 = vperm.xlu1 %4974, %v2872_v34   ;;  %v4402_v63 = vld [vmem:[%s7606_s6 + $0x58] sm:$0xff] }
 0x2fc   :  { %v4434_v34 = vld [vmem:[%s7608_s7 + $0x58] sm:$0xff] }
 0x2fd   :  { %v6270_v6 = vpop.permute.xlu2 %5007 }
 0x2fe   :  { %v5009_v14 = vunpack.i.l.bf16 %v6270_v6  ;;  %v5010_v23 = vunpack.i.h.bf16 %v6270_v6  ;;  %v4437_v6 = vld [vmem:[%s7608_s7 + $0x70] sm:$0xff] }
 0x2ff   :  { %4431 = vmatmul.msk.f32.gmra.mxu1 %vm1599_vm3, %v1533_v50  ;;  %v4486_v50 = vld [vmem:[%s7608_s7 + $0xa0] sm:$0xff] }
 0x301   :  { %2835 = vperm.xlu0 %4973, %v2787_v31  }
 0x303   :  { %3102 = vperm.xlu2 %4975, %v2862_v38   ;;  %3137 = vperm.xlu1 %4974, %v2869_v39  }
 0x305   :  { %v6295_v27 = vpop.permute.xlu2 %5022 }
 0x306   :  { %v5025_v62 = vunpack.i.h.bf16 %v6295_v27 }
 0x307   :  { %4432 = vmatmul.msk.f32.gmra.mxu1 %vm1599_vm3, %v1534_v7 }
 0x309   :  { %3142 = vperm.xlu0 %4973, %v2870_v54  }
 0x30b   :  { %3087 = vperm.xlu2 %4975, %v2859_v60   ;;  %3122 = vperm.xlu1 %4974, %v2866_v18   ;;  %v5024_v60 = vunpack.i.l.bf16 %v6295_v27  ;;  %v1542_v27 = vld [vmem:[%s7608_s7 + $0x38] sm:$0xff] }
 0x30d   :  { %v5033_v38 = vpop.permute.xlu2 %5032 }
 0x30e   :  { %v5034_v46 = vunpack.i.l.bf16 %v5033_v38  ;;  %v5035_v21 = vunpack.i.h.bf16 %v5033_v38  ;;  %v4528_v38 = vld [vmem:[%s7608_s7 + $0xf0] sm:$0xff] }
 0x311   :  { %3127 = vperm.xlu0 %4973, %v2867_v40   ;;  %v4403_v40 = vld [vmem:[%s7606_s6 + $0x60] sm:$0xff] }
 0x313   :  { %4022 = vperm.xlu2 %4975, %v3973_v41   ;;  %3107 = vperm.xlu1 %4974, %v2863_v12   ;;  %v4435_v12 = vld [vmem:[%s7608_s7 + $0x60] sm:$0xff] }
 0x315   :  { %v4978_v47 = vpop.permute.xlu1 %4977 }
 0x316   :  { %v4979_v49 = vunpack.i.l.bf16 %v4978_v47  ;;  %v4980_v3 = vunpack.i.h.bf16 %v4978_v47  ;;  %v4128_v47 = vld [vmem:[%s7610_s17 + $0x8] sm:$0x3] }
 0x319   :  { %3112 = vperm.xlu0 %4973, %v2864_v19  }
 0x31b   :  { %4007 = vperm.xlu2 %4975, %v3970_v51   ;;  %3092 = vperm.xlu1 %4974, %v2860_v36   ;;  %v1588_v9 = vpop.permute.xlu0 %1587  ;;  %v5043_v51 = vpop.permute.xlu2 %5042 }
 0x31c   :  { %4411 = vmatpush.msk.msrb.mxu0 %vm1303_vm1, %v1588_v9  ;;  %4443 = vmatpush.msk.msrb.mxu2 %vm1303_vm1, %v1588_v9  ;;  %v5044_v7 = vunpack.i.l.bf16 %v5043_v51  ;;  %v5045_v17 = vunpack.i.h.bf16 %v5043_v51  ;;  %v4509_v51 = vld [vmem:[%s7606_s6 + $0x100] sm:$0xff] }
 0x31d   :  { %v4993_v10 = vpop.permute.xlu1 %4992 }
 0x31e   :  { %1638 = vmatpush.msrb.mxu0 %v4979_v49  ;;  %1805 = vmatpush.msrb.mxu2 %v4979_v49  ;;  %v4994_v52 = vunpack.i.l.bf16 %v4993_v10  ;;  %v4995_v1 = vunpack.i.h.bf16 %v4993_v10  ;;  %v4127_v49 = vld [vmem:[%s7610_s17] sm:$0xff] }
 0x320   :  { %1639 = vmatpush.msrb.mxu0 %v4980_v3  ;;  %1806 = vmatpush.msrb.mxu2 %v4980_v3  ;;  %v4404_v3 = vld [vmem:[%s7606_s6 + $0x68] sm:$0xff] }
 0x321   :  { %3097 = vperm.xlu0 %4973, %v2861_v33   ;;  %v4436_v33 = vld [vmem:[%s7608_s7 + $0x68] sm:$0xff] }
 0x322   :  { %1640 = vmatpush.msrb.mxu0 %v4984_v55  ;;  %1807 = vmatpush.msrb.mxu2 %v4984_v55  ;;  %v4487_v55 = vld [vmem:[%s7608_s7 + $0xa8] sm:$0xff] }
 0x323   :  { %3992 = vperm.xlu2 %4975, %v3967_v11   ;;  %4027 = vperm.xlu1 %4974, %v3974_v13   ;;  %v4988_v25 = vpop.permute.xlu0 %4987 }
 0x324   :  { %v4989_v37 = vunpack.i.l.bf16 %v4988_v25  ;;  %1641 = vmatpush.msrb.mxu0 %v4985_v24  ;;  %1808 = vmatpush.msrb.mxu2 %v4985_v24  ;;  %v4990_v58 = vunpack.i.h.bf16 %v4988_v25  ;;  %v5058_v24 = vpop.permute.xlu2 %5057 }
 0x325   :  { %v5003_v16 = vpop.permute.xlu1 %5002  ;;  %v5060_v0 = vunpack.i.h.bf16 %v5058_v24 }
 0x326   :  { %1642 = vmatpush.msrb.mxu0 %v4989_v37  ;;  %1809 = vmatpush.msrb.mxu2 %v4989_v37  ;;  %v5004_v8 = vunpack.i.l.bf16 %v5003_v16  ;;  %v5005_v43 = vunpack.i.h.bf16 %v5003_v16  ;;  %v1540_v16 = vld [vmem:[%s7608_s7 + $0x28] sm:$0xff] }
 0x327   :  { %4460 = vmatmul.msk.f32.gmra.mxu3 %vm1599_vm3, %v1540_v16  ;;  %v4573_v16 = vld [vmem:[%s7608_s7 + $0x158] sm:$0xff] }
 0x328   :  { %1643 = vmatpush.msrb.mxu0 %v4990_v58  ;;  %1810 = vmatpush.msrb.mxu2 %v4990_v58  ;;  %v5059_v58 = vunpack.i.l.bf16 %v5058_v24  ;;  %v4534_v24 = vld [vmem:[%s7608_s7 + $0x120] sm:$0xff] }
 0x329   :  { %3082 = vperm.xlu0 %4973, %v2858_v28   ;;  %v4405_v28 = vld [vmem:[%s7606_s6 + $0x70] sm:$0xff] }
 0x32a   :  { %1644 = vmatpush.msrb.mxu0 %v4994_v52  ;;  %1811 = vmatpush.msrb.mxu2 %v4994_v52 }
 0x32b   :  { %3977 = vperm.xlu2 %4975, %v3964_v48   ;;  %4012 = vperm.xlu1 %4974, %v3971_v57   ;;  %v1955_v26 = vpop.permute.xlu0 %1954  ;;  %v4488_v48 = vld [vmem:[%s7608_s7 + $0xb0] sm:$0xff] }
 0x32c   :  { %1645 = vmatpush.msrb.mxu0 %v4995_v1  ;;  %1812 = vmatpush.msrb.mxu2 %v4995_v1 }
 0x32d   :  { %4496 = vmatpush.msk.msra.mxu1 %vm1303_vm1, %v1955_v26  ;;  %v6283_v59 = vpop.permute.xlu1 %5017 }
 0x32e   :  { %1646 = vmatpush.msrb.mxu0 %v4999_v61  ;;  %1813 = vmatpush.msrb.mxu2 %v4999_v61  ;;  %v5019_v31 = vunpack.i.l.bf16 %v6283_v59  ;;  %v5020_v44 = vunpack.i.h.bf16 %v6283_v59  ;;  %v1541_v61 = vld [vmem:[%s7608_s7 + $0x30] sm:$0xff]  ;;  %v4406_v59 = vld [vmem:[%s7606_s6 + $0x78] sm:$0xff] }
 0x32f   :  { %2102 = vmatpush.msra.mxu1 %v5004_v8  ;;  %4461 = vmatmul.msk.f32.gmra.mxu3 %vm1599_vm3, %v1541_v61  ;;  %v4514_v61 = vld [vmem:[%s7606_s6 + $0x128] sm:$0xff] }
 0x330   :  { %1647 = vmatpush.msrb.mxu0 %v5000_v15  ;;  %1814 = vmatpush.msrb.mxu2 %v5000_v15  ;;  %v4438_v15 = vld [vmem:[%s7608_s7 + $0x78] sm:$0xff] }
 0x331   :  { %2103 = vmatpush.msra.mxu1 %v5005_v43  ;;  %4017 = vperm.xlu0 %4973, %v3972_v32   ;;  %v5073_v32 = vpop.permute.xlu2 %5072 }
 0x332   :  { %4412 = vmatmul.msk.f32.vlgmr.msrb.gmra.mxu0 %vm1599_vm3, %v4401_v45  ;;  %4444 = vmatmul.msk.f32.vlgmr.msrb.gmra.mxu2 %vm1599_vm3, %v4433_v22  ;;  %v5074_v22 = vunpack.i.l.bf16 %v5073_v32 }
 0x333   :  { %4475 = vmatpush.msk.msra.mxu0 %vm1303_vm1, %v1955_v26  ;;  %2104 = vmatpush.msra.mxu1 %v5009_v14  ;;  %v5013_v20 = vpop.permute.xlu0 %5012 }
 0x334   :  { %3997 = vperm.xlu1 %4974, %v3968_v29   ;;  %v5014_v42 = vunpack.i.l.bf16 %v5013_v20  ;;  %v5015_v5 = vunpack.i.h.bf16 %v5013_v20  ;;  %v4407_v29 = vld [vmem:[%s7606_s6 + $0x80] sm:$0xff] }
 0x335   :  { %2004 = vmatpush.msra.mxu0 %v5004_v8  ;;  %2105 = vmatpush.msra.mxu1 %v5010_v23  ;;  %v5028_v35 = vpop.permute.xlu1 %5027  ;;  %v1543_v20 = vld [vmem:[%s7608_s7 + $0x40] sm:$0xff] }
 0x336   :  { %v5029_v54 = vunpack.i.l.bf16 %v5028_v35  ;;  %v5030_v18 = vunpack.i.h.bf16 %v5028_v35  ;;  %v4491_v35 = vld [vmem:[%s7608_s7 + $0xc8] sm:$0xff] }
 0x337   :  { %2005 = vmatpush.msra.mxu0 %v5005_v43  ;;  %2106 = vmatpush.msra.mxu1 %v5014_v42  ;;  %v4489_v43 = vld [vmem:[%s7608_s7 + $0xb8] sm:$0xff] }
 0x338   :  { %4462 = vmatmul.msk.f32.gmra.mxu3 %vm1599_vm3, %v1542_v27 }
 0x339   :  { %2006 = vmatpush.msra.mxu0 %v5009_v14  ;;  %2107 = vmatpush.msra.mxu1 %v5015_v5  ;;  %v5075_v14 = vunpack.i.h.bf16 %v5073_v32  ;;  %v4537_v32 = vld [vmem:[%s7608_s7 + $0x138] sm:$0xff] }
 0x33a   :  { %4002 = vperm.xlu0 %4973, %v3969_v56   ;;  %4413 = vmatmul.msk.f32.gmra.mxu0 %vm1599_vm3, %v4402_v63  ;;  %v1544_v56 = vld [vmem:[%s7608_s7 + $0x48] sm:$0xff]  ;;  %v4409_v63 = vld [vmem:[%s7606_s6 + $0x90] sm:$0xff] }
 0x33b   :  { %4445 = vmatmul.msk.f32.gmra.mxu2 %vm1599_vm3, %v4434_v34  ;;  %2007 = vmatpush.msra.mxu0 %v5010_v23  ;;  %v2185_v39 = vpop.permute.xlu0 %2184  ;;  %v4490_v23 = vld [vmem:[%s7608_s7 + $0xc0] sm:$0xff]  ;;  %v4441_v34 = vld [vmem:[%s7608_s7 + $0x90] sm:$0xff] }
 0x33c   :  { %2108 = vmatpush.msra.mxu1 %v5019_v31  ;;  %3982 = vperm.xlu1 %4974, %v3965_v2   ;;  %v4492_v2 = vld [vmem:[%s7608_s7 + $0xd0] sm:$0xff] }
 0x33d   :  { %2008 = vmatpush.msra.mxu0 %v5014_v42  ;;  %4517 = vmatpush.msk.msra.mxu2 %vm1303_vm1, %v2185_v39  ;;  %v5038_v41 = vpop.permute.xlu1 %5037  ;;  %v4408_v42 = vld [vmem:[%s7606_s6 + $0x88] sm:$0xff] }
 0x33e   :  { %2109 = vmatpush.msra.mxu1 %v5020_v44  ;;  %4538 = vmatpush.msk.msrb.mxu3 %vm1303_vm1, %v2185_v39  ;;  %v5039_v36 = vunpack.i.l.bf16 %v5038_v41  ;;  %v5040_v9 = vunpack.i.h.bf16 %v5038_v41  ;;  %v4410_v39 = vld [vmem:[%s7606_s6 + $0x98] sm:$0xff]  ;;  %v4530_v41 = vld [vmem:[%s7608_s7 + $0x100] sm:$0xff] }
 0x33f   :  { %2009 = vmatpush.msra.mxu0 %v5015_v5  ;;  %2234 = vmatpush.msra.mxu2 %v5029_v54  ;;  %v4440_v5 = vld [vmem:[%s7608_s7 + $0x88] sm:$0xff] }
 0x340   :  { %2110 = vmatpush.msra.mxu1 %v5024_v60  ;;  %2332 = vmatpush.msrb.mxu3 %v5029_v54  ;;  %v4493_v54 = vld [vmem:[%s7608_s7 + $0xd8] sm:$0xff] }
 0x341   :  { %2010 = vmatpush.msra.mxu0 %v5019_v31  ;;  %2235 = vmatpush.msra.mxu2 %v5030_v18  ;;  %v6442_v31 = vpop.f32.mrf.mxu1 }
 0x342   :  { %2111 = vmatpush.msra.mxu1 %v5025_v62  ;;  %2333 = vmatpush.msrb.mxu3 %v5030_v18  ;;  %v4529_v18 = vld [vmem:[%s7608_s7 + $0xf8] sm:$0xff] }
 0x343   :  { %3987 = vperm.xlu0 %4973, %v3966_v4   ;;  %4414 = vmatmul.msk.f32.gmra.mxu0 %vm1599_vm3, %v4403_v40  ;;  %v2415_v19 = vpop.permute.xlu0 %2414  ;;  %v4507_v4 = vld [vmem:[%s7606_s6 + $0xf0] sm:$0xff]  ;;  %v4494_v40 = vld [vmem:[%s7608_s7 + $0xe0] sm:$0xff] }
 0x344   :  { %4446 = vmatmul.msk.f32.gmra.mxu2 %vm1599_vm3, %v4435_v12  ;;  %2011 = vmatpush.msra.mxu0 %v5020_v44  ;;  %v4442_v44 = vld [vmem:[%s7608_s7 + $0x98] sm:$0xff] }
 0x345   :  { %4497 = vmatmul.msk.f32.vlgmr.msra.gmra.mxu1 %vm1599_vm3, %v4486_v50  ;;  %2236 = vmatpush.msra.mxu2 %v5034_v46  ;;  %v5053_v10 = vpop.permute.xlu1 %5052  ;;  %v4466_v50 = vld [vmem:[%s7606_s6 + $0xa8] sm:$0xff] }
 0x346   :  { %2334 = vmatpush.msrb.mxu3 %v5034_v46  ;;  %4136 = vperm.xlu1 %4974, %v4128_v47   ;;  %v5054_v13 = vunpack.i.l.bf16 %v5053_v10  ;;  %v5055_v25 = vunpack.i.h.bf16 %v5053_v10  ;;  %v4508_v46 = vld [vmem:[%s7606_s6 + $0xf8] sm:$0xff]  ;;  %v4495_v47 = vld [vmem:[%s7608_s7 + $0xe8] sm:$0xff] }
 0x347   :  { %2012 = vmatpush.msra.mxu0 %v5024_v60  ;;  %2237 = vmatpush.msra.mxu2 %v5035_v21  ;;  %v4571_v10 = vld [vmem:[%s7608_s7 + $0x148] sm:$0xff] }
 0x348   :  { %2335 = vmatpush.msrb.mxu3 %v5035_v21  ;;  %4580 = vmatpush.msk.msrb.mxu1 %vm1303_vm1, %v2415_v19  ;;  %v4467_v21 = vld [vmem:[%s7606_s6 + $0xb0] sm:$0xff] }
 0x349   :  { %2013 = vmatpush.msra.mxu0 %v5025_v62  ;;  %2238 = vmatpush.msra.mxu2 %v5039_v36  ;;  %v6461_v60 = vpop.f32.mrf.mxu1  ;;  %v4465_v62 = vld [vmem:[%s7606_s6 + $0xa0] sm:$0xff] }
 0x34a   :  { %2336 = vmatpush.msrb.mxu3 %v5039_v36  ;;  %2562 = vmatpush.msrb.mxu1 %v5044_v7  ;;  %v4570_v36 = vld [vmem:[%s7608_s7 + $0x140] sm:$0xff] }
 0x34b   :  { %4559 = vmatpush.msk.msrb.mxu0 %vm1303_vm1, %v2415_v19  ;;  %2239 = vmatpush.msra.mxu2 %v5040_v9  ;;  %v5048_v53 = vpop.permute.xlu0 %5047  ;;  %v4531_v19 = vld [vmem:[%s7608_s7 + $0x108] sm:$0xff] }
 0x34c   :  { %2337 = vmatpush.msrb.mxu3 %v5040_v9  ;;  %v5049_v11 = vunpack.i.l.bf16 %v5048_v53  ;;  %2563 = vmatpush.msrb.mxu1 %v5045_v17  ;;  %v5050_v37 = vunpack.i.h.bf16 %v5048_v53  ;;  %v4532_v9 = vld [vmem:[%s7608_s7 + $0x110] sm:$0xff]  ;;  %v4469_v53 = vld [vmem:[%s7606_s6 + $0xc0] sm:$0xff] }
 0x34d   :  { %2464 = vmatpush.msrb.mxu0 %v5044_v7  ;;  %4131 = vperm.xlu0 %4973, %v4127_v49   ;;  %v5068_v1 = vpop.permute.xlu1 %5067  ;;  %v4468_v49 = vld [vmem:[%s7606_s6 + $0xb8] sm:$0xff] }
 0x34e   :  { %4415 = vmatmul.msk.f32.gmra.mxu0 %vm1599_vm3, %v4404_v3  ;;  %4447 = vmatmul.msk.f32.gmra.mxu2 %vm1599_vm3, %v4436_v33  ;;  %v5069_v8 = vunpack.i.l.bf16 %v5068_v1  ;;  %v5070_v45 = vunpack.i.h.bf16 %v5068_v1  ;;  %v4533_v33 = vld [vmem:[%s7608_s7 + $0x118] sm:$0xff]  ;;  %v4536_v1 = vld [vmem:[%s7608_s7 + $0x130] sm:$0xff] }
 0x34f   :  { %4498 = vmatmul.msk.f32.gmra.mxu1 %vm1599_vm3, %v4487_v55  ;;  %2465 = vmatpush.msrb.mxu0 %v5045_v17  ;;  %v4510_v17 = vld [vmem:[%s7606_s6 + $0x108] sm:$0xff]  ;;  %v4511_v55 = vld [vmem:[%s7606_s6 + $0x110] sm:$0xff] }
 0x350   :  { %2564 = vmatpush.msrb.mxu1 %v5054_v13  ;;  %2240 = vmatpush.msra.mxu2 %v5049_v11 }
 0x351   :  { %2466 = vmatpush.msrb.mxu0 %v5054_v13  ;;  %2338 = vmatpush.msrb.mxu3 %v5049_v11  ;;  %v6482_v12 = vpop.f32.mrf.mxu1  ;;  %v4572_v11 = vld [vmem:[%s7608_s7 + $0x150] sm:$0xff] }
 0x352   :  { %2565 = vmatpush.msrb.mxu1 %v5055_v25  ;;  %2241 = vmatpush.msra.mxu2 %v5050_v37 }
 0x353   :  { %2467 = vmatpush.msrb.mxu0 %v5055_v25  ;;  %2339 = vmatpush.msrb.mxu3 %v5050_v37  ;;  %v5063_v52 = vpop.permute.xlu0 %5062  ;;  %v4470_v25 = vld [vmem:[%s7606_s6 + $0xc8] sm:$0xff]  ;;  %v4512_v37 = vld [vmem:[%s7606_s6 + $0x118] sm:$0xff] }
 0x354   :  { %2242 = vmatpush.msra.mxu2 %v5059_v58  ;;  %v5064_v57 = vunpack.i.l.bf16 %v5063_v52  ;;  %v5065_v26 = vunpack.i.h.bf16 %v5063_v52  ;;  %4463 = vmatmul.msk.f32.gmra.mxu3 %vm1599_vm3, %v1543_v20  ;;  %v4471_v52 = vld [vmem:[%s7606_s6 + $0xd0] sm:$0xff] }
 0x355   :  { %2340 = vmatpush.msrb.mxu3 %v5059_v58 }
 0x356   :  { %4416 = vmatmul.msk.f32.gmra.mxu0 %vm1599_vm3, %v4405_v28  ;;  %4448 = vmatmul.msk.f32.gmra.mxu2 %vm1599_vm3, %v4437_v6  ;;  %v4535_v28 = vld [vmem:[%s7608_s7 + $0x128] sm:$0xff] }
 0x357   :  { %4499 = vmatmul.msk.f32.gmra.mxu1 %vm1599_vm3, %v4488_v48  ;;  %2243 = vmatpush.msra.mxu2 %v5060_v0  ;;  %v4513_v48 = vld [vmem:[%s7606_s6 + $0x120] sm:$0xff] }
 0x358   :  { %2341 = vmatpush.msrb.mxu3 %v5060_v0  ;;  %2468 = vmatpush.msrb.mxu0 %v5064_v57 }
 0x359   :  { %2566 = vmatpush.msrb.mxu1 %v5064_v57  ;;  %v6510_v7 = vpop.f32.mrf.mxu1  ;;  %v4574_v57 = vld [vmem:[%s7608_s7 + $0x160] sm:$0xff] }
 0x35a   :  { %2469 = vmatpush.msrb.mxu0 %v5065_v26 }
 0x35b   :  { %2567 = vmatpush.msrb.mxu1 %v5065_v26  ;;  %v4472_v26 = vld [vmem:[%s7606_s6 + $0xd8] sm:$0xff] }
 0x35c   :  { %2470 = vmatpush.msrb.mxu0 %v5069_v8  ;;  %4464 = vmatmul.msk.f32.gmra.mxu3 %vm1599_vm3, %v1544_v56  ;;  %v6653_v56 = vpop.f32.mrf.mxu3 }
 0x35d   :  { %2568 = vmatpush.msrb.mxu1 %v5069_v8  ;;  %v4575_v8 = vld [vmem:[%s7608_s7 + $0x168] sm:$0xff] }
 0x35e   :  { %4417 = vmatmul.msk.f32.gmra.mxu0 %vm1599_vm3, %v4406_v59  ;;  %4449 = vmatmul.msk.f32.gmra.mxu2 %vm1599_vm3, %v4438_v15 }
 0x35f   :  { %4500 = vmatmul.msk.f32.gmra.mxu1 %vm1599_vm3, %v4489_v43  ;;  %2471 = vmatpush.msrb.mxu0 %v5070_v45  ;;  %v4473_v43 = vld [vmem:[%s7606_s6 + $0xe0] sm:$0xff] }
 0x360   :  { %2569 = vmatpush.msrb.mxu1 %v5070_v45  ;;  %v4515_v45 = vld [vmem:[%s7606_s6 + $0x130] sm:$0xff] }
 0x361   :  { %2472 = vmatpush.msrb.mxu0 %v5074_v22  ;;  %v6530_v3 = vpop.f32.mrf.mxu1 }
 0x362   :  { %2570 = vmatpush.msrb.mxu1 %v5074_v22  ;;  %v4576_v22 = vld [vmem:[%s7608_s7 + $0x170] sm:$0xff] }
 0x363   :  { %2473 = vmatpush.msrb.mxu0 %v5075_v14 }
 0x364   :  { %2571 = vmatpush.msrb.mxu1 %v5075_v14  ;;  %4539 = vmatmul.msk.f32.vlgmr.msrb.gmra.mxu3 %vm1599_vm3, %v4528_v38  ;;  %v4550_v38 = vld [vmem:[%s7606_s6 + $0x148] sm:$0xff] }
 0x366   :  { %4418 = vmatmul.msk.f32.gmra.mxu0 %vm1599_vm3, %v4407_v29  ;;  %4450 = vmatmul.msk.f32.gmra.mxu2 %vm1599_vm3, %v4439_v30  ;;  %v4474_v29 = vld [vmem:[%s7606_s6 + $0xe8] sm:$0xff]  ;;  %v4516_v30 = vld [vmem:[%s7606_s6 + $0x138] sm:$0xff] }
 0x367   :  { %4501 = vmatmul.msk.f32.gmra.mxu1 %vm1599_vm3, %v4490_v23  ;;  %v4577_v23 = vld [vmem:[%s7608_s7 + $0x178] sm:$0xff] }
 0x369   :  { %v6549_v13 = vpop.f32.mrf.mxu1 }
 0x36c   :  { %4540 = vmatmul.msk.f32.gmra.mxu3 %vm1599_vm3, %v4529_v18 }
 0x36e   :  { %4419 = vmatmul.msk.f32.gmra.mxu0 %vm1599_vm3, %v4408_v42  ;;  %4451 = vmatmul.msk.f32.gmra.mxu2 %vm1599_vm3, %v4440_v5  ;;  %v4549_v5 = vld [vmem:[%s7606_s6 + $0x140] sm:$0xff] }
 0x36f   :  { %4502 = vmatmul.msk.f32.gmra.mxu1 %vm1599_vm3, %v4491_v35  ;;  %v4578_v35 = vld [vmem:[%s7608_s7 + $0x180] sm:$0xff] }
 0x371   :  { %v6572_v6 = vpop.f32.mrf.mxu1 }
 0x374   :  { %4541 = vmatmul.msk.f32.gmra.mxu3 %vm1599_vm3, %v4530_v41  ;;  %v4552_v41 = vld [vmem:[%s7606_s6 + $0x158] sm:$0xff] }
 0x376   :  { %4420 = vmatmul.msk.f32.gmra.mxu0 %vm1599_vm3, %v4409_v63  ;;  %4452 = vmatmul.msk.f32.gmra.mxu2 %vm1599_vm3, %v4441_v34 }
 0x377   :  { %4503 = vmatmul.msk.f32.gmra.mxu1 %vm1599_vm3, %v4492_v2 }
 0x379   :  { %v6602_v59 = vpop.f32.mrf.mxu1 }
 0x37a   :  { %7667 = vst [vmem:[#allocation8_spill] sm:$0xff] %v6602_v59 }
 0x37c   :  { %4542 = vmatmul.msk.f32.gmra.mxu3 %vm1599_vm3, %v4531_v19 }
 0x37e   :  { %4421 = vmatmul.msk.f32.gmra.mxu0 %vm1599_vm3, %v4410_v39  ;;  %4453 = vmatmul.msk.f32.gmra.mxu2 %vm1599_vm3, %v4442_v44  ;;  %v4579_v39 = vld [vmem:[%s7608_s7 + $0x188] sm:$0xff]  ;;  %v6669_v44 = vpop.f32.mrf.mxu3 }
 0x37f   :  { %4504 = vmatmul.msk.f32.gmra.mxu1 %vm1599_vm3, %v4493_v54 }
 0x381   :  { %v6624_v14 = vpop.f32.mrf.mxu1 }
 0x382   :  { %7668 = vst [vmem:[#allocation18_spill] sm:$0xff] %v6624_v14 }
 0x384   :  { %4543 = vmatmul.msk.f32.gmra.mxu3 %vm1599_vm3, %v4532_v9 }
 0x386   :  { %4476 = vmatmul.msk.f32.vlgmr.msra.gmra.mxu0 %vm1599_vm3, %v4465_v62  ;;  %4518 = vmatmul.msk.f32.vlgmr.msra.gmra.mxu2 %vm1599_vm3, %v4507_v4  ;;  %v4551_v62 = vld [vmem:[%s7606_s6 + $0x150] sm:$0xff] }
 0x387   :  { %4505 = vmatmul.msk.f32.gmra.mxu1 %vm1599_vm3, %v4494_v40 }
 0x389   :  { %v6641_v20 = vpop.f32.mrf.mxu1 }
 0x38a   :  { %7669 = vst [vmem:[#allocation10_spill] sm:$0xff] %v6641_v20 }
 0x38c   :  { %4544 = vmatmul.msk.f32.gmra.mxu3 %vm1599_vm3, %v4533_v33 }
 0x38e   :  { %4477 = vmatmul.msk.f32.gmra.mxu0 %vm1599_vm3, %v4466_v50  ;;  %4519 = vmatmul.msk.f32.gmra.mxu2 %vm1599_vm3, %v4508_v46  ;;  %v6686_v50 = vpop.f32.mrf.mxu3 }
 0x38f   :  { %4506 = vmatmul.msk.f32.gmra.mxu1 %vm1599_vm3, %v4495_v47 }
 0x394   :  { %4545 = vmatmul.msk.f32.gmra.mxu3 %vm1599_vm3, %v4534_v24 }
 0x396   :  { %4478 = vmatmul.msk.f32.gmra.mxu0 %vm1599_vm3, %v4467_v21  ;;  %4520 = vmatmul.msk.f32.gmra.mxu2 %vm1599_vm3, %v4509_v51  ;;  %v4553_v21 = vld [vmem:[%s7606_s6 + $0x160] sm:$0xff]  ;;  %v6698_v51 = vpop.f32.mrf.mxu3 }
 0x397   :  { %4581 = vmatmul.msk.f32.vlgmr.msrb.gmra.mxu1 %vm1599_vm3, %v4570_v36 }
 0x39c   :  { %4546 = vmatmul.msk.f32.gmra.mxu3 %vm1599_vm3, %v4535_v28 }
 0x39e   :  { %4479 = vmatmul.msk.f32.gmra.mxu0 %vm1599_vm3, %v4468_v49  ;;  %4521 = vmatmul.msk.f32.gmra.mxu2 %vm1599_vm3, %v4510_v17  ;;  %v4554_v17 = vld [vmem:[%s7606_s6 + $0x168] sm:$0xff] }
 0x39f   :  { %4582 = vmatmul.msk.f32.gmra.mxu1 %vm1599_vm3, %v4571_v10  ;;  %v6711_v10 = vpop.f32.mrf.mxu3 }
 0x3a4   :  { %4547 = vmatmul.msk.f32.gmra.mxu3 %vm1599_vm3, %v4536_v1 }
 0x3a6   :  { %4480 = vmatmul.msk.f32.gmra.mxu0 %vm1599_vm3, %v4469_v53  ;;  %4522 = vmatmul.msk.f32.gmra.mxu2 %vm1599_vm3, %v4511_v55 }
 0x3a7   :  { %4583 = vmatmul.msk.f32.gmra.mxu1 %vm1599_vm3, %v4572_v11  ;;  %v4555_v11 = vld [vmem:[%s7606_s6 + $0x170] sm:$0xff] }
 0x3aa   :  { %v6723_v24 = vpop.f32.mrf.mxu3 }
 0x3ac   :  { %4548 = vmatmul.msk.f32.gmra.mxu3 %vm1599_vm3, %v4537_v32 }
 0x3ae   :  { %4481 = vmatmul.msk.f32.gmra.mxu0 %vm1599_vm3, %v4470_v25  ;;  %4523 = vmatmul.msk.f32.gmra.mxu2 %vm1599_vm3, %v4512_v37 }
 0x3af   :  { %4584 = vmatmul.msk.f32.gmra.mxu1 %vm1599_vm3, %v4573_v16  ;;  %v6567_v58 = vpop.f32.mrf.mxu0  ;;  %v4556_v16 = vld [vmem:[%s7606_s6 + $0x178] sm:$0xff] }
 0x3b5   :  { %v6655_v63 = vpop.f32.mrf.mxu2 }
 0x3b6   :  { %4482 = vmatmul.msk.f32.gmra.mxu0 %vm1599_vm3, %v4471_v52  ;;  %4524 = vmatmul.msk.f32.gmra.mxu2 %vm1599_vm3, %v4513_v48  ;;  %v4557_v48 = vld [vmem:[%s7606_s6 + $0x180] sm:$0xff] }
 0x3b7   :  { %4585 = vmatmul.msk.f32.gmra.mxu1 %vm1599_vm3, %v4574_v57  ;;  %v6587_v0 = vpop.f32.mrf.mxu0  ;;  %v6740_v57 = vpop.f32.mrf.mxu3 }
 0x3be   :  { %4483 = vmatmul.msk.f32.gmra.mxu0 %vm1599_vm3, %v4472_v26  ;;  %4525 = vmatmul.msk.f32.gmra.mxu2 %vm1599_vm3, %v4514_v61  ;;  %v6671_v54 = vpop.f32.mrf.mxu2 }
 0x3bf   :  { %4586 = vmatmul.msk.f32.gmra.mxu1 %vm1599_vm3, %v4575_v8  ;;  %v4558_v8 = vld [vmem:[%s7606_s6 + $0x188] sm:$0xff]  ;;  %v6752_v32 = vpop.f32.mrf.mxu3 }
 0x3c0   :  { %v6607_v15 = vpop.f32.mrf.mxu0 }
 0x3c2   :  { %v6657_v34 = vpop.f32.mrf.mxu1 }
 0x3c6   :  { %4484 = vmatmul.msk.f32.gmra.mxu0 %vm1599_vm3, %v4473_v43  ;;  %4526 = vmatmul.msk.f32.gmra.mxu2 %vm1599_vm3, %v4515_v45 }
 0x3c7   :  { %4587 = vmatmul.msk.f32.gmra.mxu1 %vm1599_vm3, %v4576_v22  ;;  %v6688_v46 = vpop.f32.mrf.mxu2 }
 0x3cb   :  { %v6627_v27 = vpop.f32.mrf.mxu0 }
 0x3cc   :  { %v6678_v4 = vpop.f32.mrf.mxu1 }
 0x3ce   :  { %4485 = vmatmul.msk.f32.gmra.mxu0 %vm1599_vm3, %v4474_v29  ;;  %4527 = vmatmul.msk.f32.gmra.mxu2 %vm1599_vm3, %v4516_v30 }
 0x3cf   :  { %4588 = vmatmul.msk.f32.gmra.mxu1 %vm1599_vm3, %v4577_v23 }
 0x3d1   :  { %v6701_v36 = vpop.f32.mrf.mxu2 }
 0x3d3   :  { %v6643_v42 = vpop.f32.mrf.mxu0 }
 0x3d4   :  { %v6691_v47 = vpop.f32.mrf.mxu1 }
 0x3d6   :  { %4560 = vmatmul.msk.f32.vlgmr.msrb.gmra.mxu0 %vm1599_vm3, %v4549_v5 }
 0x3d7   :  { %4589 = vmatmul.msk.f32.gmra.mxu1 %vm1599_vm3, %v4578_v35  ;;  %v6761_v29 = vpop.f32.mrf.mxu3  ;;  %v2629_v35 = vld [vmem:[%s7611_s8 + $0x30] sm:$0xf] }
 0x3d8   :  { %7673 = vst [vmem:[#allocation11_spill] sm:$0xff] %v6761_v29  ;;  %4591 = vmatpush.msk.msra.mxu0 %vm1303_vm1, %v2629_v35  ;;  %4841 = vmatpush.msk.msrb.mxu2 %vm1303_vm1, %v2629_v35  ;;  %v2625_v35 = vld [vmem:[%s7611_s8 + $0x10] sm:$0xff] }
 0x3d9   :  { %v6713_v33 = vpop.f32.mrf.mxu2 }
 0x3db   :  { %v6659_v2 = vpop.f32.mrf.mxu0 }
 0x3dc   :  { %v6703_v9 = vpop.f32.mrf.mxu1 }
 0x3de   :  { %4561 = vmatmul.msk.f32.gmra.mxu0 %vm1599_vm3, %v4550_v38  ;;  %v2717_v38 = vld [vmem:[%s7612_s9 + $0x30] sm:$0xf] }
 0x3df   :  { %4590 = vmatmul.msk.f32.gmra.mxu1 %vm1599_vm3, %v4579_v39  ;;  %4602 = vmatpush.msk.msra.mxu3 %vm1303_vm1, %v2717_v38  ;;  %v2628_v39 = vld [vmem:[%s7611_s8 + $0x28] sm:$0xff]  ;;  %v2713_v38 = vld [vmem:[%s7612_s9 + $0x10] sm:$0xff] }
 0x3e0   :  { %2674 = vmatpush.msra.mxu0 %v2628_v39  ;;  %4842 = vmatpush.msrb.mxu2 %v2628_v39 }
 0x3e1   :  { %v6725_v25 = vpop.f32.mrf.mxu2 }
 0x3e3   :  { %v6673_v18 = vpop.f32.mrf.mxu0 }
 0x3e4   :  { %v6715_v53 = vpop.f32.mrf.mxu1 }
 0x3e6   :  { %4562 = vmatmul.msk.f32.gmra.mxu0 %vm1599_vm3, %v4551_v62  ;;  %v2716_v62 = vld [vmem:[%s7612_s9 + $0x28] sm:$0xff] }
 0x3e7   :  { %2731 = vmatpush.msra.mxu3 %v2716_v62  ;;  %v2624_v62 = vld [vmem:[%s7611_s8 + $0x8] sm:$0xff] }
 0x3e9   :  { %v6742_v1 = vpop.f32.mrf.mxu2 }
 0x3eb   :  { %v6681_v40 = vpop.f32.mrf.mxu0 }
 0x3ec   :  { %v6732_v28 = vpop.f32.mrf.mxu1 }
 0x3ee   :  { %4563 = vmatmul.msk.f32.gmra.mxu0 %vm1599_vm3, %v4552_v41  ;;  %v2627_v41 = vld [vmem:[%s7611_s8 + $0x20] sm:$0xff] }
 0x3ef   :  { %2675 = vmatpush.msra.mxu0 %v2627_v41  ;;  %4843 = vmatpush.msrb.mxu2 %v2627_v41  ;;  %v2712_v41 = vld [vmem:[%s7612_s9 + $0x8] sm:$0xff] }
 0x3f1   :  { %v6755_v43 = vpop.f32.mrf.mxu2 }
 0x3f3   :  { %v6693_v19 = vpop.f32.mrf.mxu0 }
 0x3f4   :  { %7670 = vst [vmem:[#allocation9_spill] sm:$0xff] %v6693_v19  ;;  %v6745_v26 = vpop.f32.mrf.mxu1 }
 0x3f6   :  { %4564 = vmatmul.msk.f32.gmra.mxu0 %vm1599_vm3, %v4553_v21  ;;  %v2715_v21 = vld [vmem:[%s7612_s9 + $0x20] sm:$0xff] }
 0x3f7   :  { %2732 = vmatpush.msra.mxu3 %v2715_v21  ;;  %v2623_v21 = vld [vmem:[%s7611_s8] sm:$0xff] }
 0x3f9   :  { %v6763_v30 = vpop.f32.mrf.mxu2 }
 0x3fa   :  { %7674 = vst [vmem:[#allocation19_spill] sm:$0xff] %v6763_v30 }
 0x3fb   :  { %v6705_v49 = vpop.f32.mrf.mxu0 }
 0x3fc   :  { %7671 = vst [vmem:[#allocation5_spill] sm:$0xff] %v6705_v49  ;;  %v6757_v45 = vpop.f32.mrf.mxu1 }
 0x3fd   :  { %7672 = vst [vmem:[#allocation2_spill] sm:$0xff] %v6757_v45 }
 0x3fe   :  { %4565 = vmatmul.msk.f32.gmra.mxu0 %vm1599_vm3, %v4554_v17  ;;  %v2626_v17 = vld [vmem:[%s7611_s8 + $0x18] sm:$0xff] }
 0x3ff   :  { %2676 = vmatpush.msra.mxu0 %v2626_v17  ;;  %4844 = vmatpush.msrb.mxu2 %v2626_v17  ;;  %v2711_v17 = vld [vmem:[%s7612_s9] sm:$0xff] }
 0x401   :  { %2677 = vmatpush.msra.mxu0 %v2625_v35  ;;  %4845 = vmatpush.msrb.mxu2 %v2625_v35 }
 0x403   :  { %v6717_v55 = vpop.f32.mrf.mxu0  ;;  %2678 = vmatpush.msra.mxu0 %v2624_v62  ;;  %4846 = vmatpush.msrb.mxu2 %v2624_v62  ;;  %v1729_v62 = vadd.f32 %v6442_v31, %v6567_v58 }
 0x404   :  { %v6765_v23 = vpop.f32.mrf.mxu1 }
 0x405   :  { %7675 = vst [vmem:[#allocation13_spill] sm:$0xff] %v6765_v23  ;;  %2679 = vmatpush.msra.mxu0 %v2623_v21  ;;  %4847 = vmatpush.msrb.mxu2 %v2623_v21 }
 0x406   :  { %4566 = vmatmul.msk.f32.gmra.mxu0 %vm1599_vm3, %v4555_v11  ;;  %v2714_v11 = vld [vmem:[%s7612_s9 + $0x18] sm:$0xff] }
 0x407   :  { %2733 = vmatpush.msra.mxu3 %v2714_v11 }
 0x409   :  { %2734 = vmatpush.msra.mxu3 %v2713_v38 }
 0x40b   :  { %v6727_v37 = vpop.f32.mrf.mxu0  ;;  %2735 = vmatpush.msra.mxu3 %v2712_v41 }
 0x40c   :  { %v6808_v39 = vpop.f32.mrf.mxu1 }
 0x40d   :  { %7678 = vst [vmem:[#allocation3_spill] sm:$0xff] %v6808_v39  ;;  %2736 = vmatpush.msra.mxu3 %v2711_v17  ;;  %v2045_v17 = vadd.f32 %v6717_v55, %v1729_v62 }
 0x40e   :  { %4567 = vmatmul.msk.f32.gmra.mxu0 %vm1599_vm3, %v4556_v16  ;;  %v6796_v16 = vpop.f32.mrf.mxu3 }
 0x40f   :  { %7676 = vst [vmem:[#allocation12_spill] sm:$0xff] %v6796_v16 }
 0x413   :  { %v6735_v52 = vpop.f32.mrf.mxu0 }
 0x414   :  { %v2573_v20 = vpop.f32.mrf.mxu1 }
 0x416   :  { %4568 = vmatmul.msk.f32.gmra.mxu0 %vm1599_vm3, %v4557_v48  ;;  %v6798_v48 = vpop.f32.mrf.mxu2  ;;  %v2343_v38 = vpop.f32.mrf.mxu3 }
 0x417   :  { %7677 = vst [vmem:[#allocation6_spill] sm:$0xff] %v6798_v48  ;;  %v1894_v48 = vadd.f32 %v6653_v56, %v6655_v63  ;;  %v1732_v63 = vadd.f32 %v6461_v60, %v6587_v0  ;;  %v1735_v0 = vadd.f32 %v6482_v12, %v6607_v15  ;;  %v1738_v12 = vadd.f32 %v6510_v7, %v6627_v27 }
 0x418   :  { %v1741_v7 = vadd.f32 %v6530_v3, %v6643_v42  ;;  %v1744_v42 = vadd.f32 %v6549_v13, %v6659_v2  ;;  %v1747_v2 = vadd.f32 %v6572_v6, %v6673_v18  ;;  %v7681_v18 = vld [vmem:[#allocation8_spill] sm:$0xff] }
 0x419   :  { %v2143_v21 = vadd.f32 %v6657_v34, %v1894_v48  ;;  %v2046_v34 = vadd.f32 %v6727_v37, %v1732_v63  ;;  %v2047_v37 = vadd.f32 %v6735_v52, %v1735_v0 }
 0x41b   :  { %v6747_v61 = vpop.f32.mrf.mxu0  ;;  %v2373_v29 = vadd.f32 %v2343_v38, %v2143_v21 }
 0x41c   :  { %v2576_v16 = vpop.f32.mrf.mxu1  ;;  %v2048_v62 = vadd.f32 %v6747_v61, %v1738_v12 }
 0x41d   :  { %v2603_v59 = vadd.f32 %v2573_v20, %v2373_v29 }
 0x41e   :  { %4569 = vmatmul.msk.f32.gmra.mxu0 %vm1599_vm3, %v4558_v8  ;;  %v2245_v39 = vpop.f32.mrf.mxu2  ;;  %v2346_v41 = vpop.f32.mrf.mxu3 }
 0x41f   :  { %v2275_v30 = vadd.f32 %v2245_v39, %v2045_v17 }
 0x423   :  { %v6759_v22 = vpop.f32.mrf.mxu0 }
 0x426   :  { %v2248_v49 = vpop.f32.mrf.mxu2  ;;  %v2349_v14 = vpop.f32.mrf.mxu3 }
 0x427   :  { %v2276_v55 = vadd.f32 %v2248_v49, %v2046_v34 }
 0x42b   :  { %v6767_v5 = vpop.f32.mrf.mxu0 }
 0x42e   :  { %v2251_v19 = vpop.f32.mrf.mxu2  ;;  %v2352_v20 = vpop.f32.mrf.mxu3 }
 0x42f   :  { %v2277_v49 = vadd.f32 %v2251_v19, %v2047_v37 }
 0x433   :  { %v6800_v8 = vpop.f32.mrf.mxu0 }
 0x436   :  { %v2355_v38 = vpop.f32.mrf.mxu3 }
 0x43b   :  { %v6822_v11 = vpop.f32.mrf.mxu0 }
 0x43c   :  { %7679 = vst [vmem:[#allocation14_spill] sm:$0xff] %v6822_v11  ;;  %v2579_v11 = vpop.f32.mrf.mxu1 }
 0x443   :  { %v6824_v35 = vpop.f32.mrf.mxu0 }
 0x444   :  { %7680 = vst [vmem:[#allocation20_spill] sm:$0xff] %v6824_v35  ;;  %v1897_v35 = vadd.f32 %v6669_v44, %v6671_v54  ;;  %v1900_v44 = vadd.f32 %v6686_v50, %v6688_v46  ;;  %v2582_v60 = vpop.f32.mrf.mxu1  ;;  %v1903_v50 = vadd.f32 %v6698_v51, %v6701_v36 }
 0x446   :  { %v2144_v31 = vadd.f32 %v6678_v4, %v1897_v35  ;;  %v2146_v15 = vadd.f32 %v6703_v9, %v1903_v50  ;;  %v2358_v9 = vpop.f32.mrf.mxu3 }
 0x448   :  { %v2374_v54 = vadd.f32 %v2346_v41, %v2144_v31  ;;  %v2376_v19 = vadd.f32 %v2352_v20, %v2146_v15 }
 0x44b   :  { %v6828_v23 = vpop.f32.mrf.mxu0 }
 0x44c   :  { %v2585_v52 = vpop.f32.mrf.mxu1 }
 0x453   :  { %v2475_v45 = vpop.f32.mrf.mxu0 }
 0x454   :  { %v2505_v56 = vadd.f32 %v2475_v45, %v2275_v30  ;;  %v2254_v45 = vpop.f32.mrf.mxu2  ;;  %v2604_v30 = vadd.f32 %v2576_v16, %v2374_v54  ;;  %v2361_v54 = vpop.f32.mrf.mxu3 }
 0x455   :  { %v2278_v51 = vadd.f32 %v2254_v45, %v2048_v62 }
 0x456   :  { %v2613_v58 = vmax.f32 %v2505_v56, %v2603_v59  ;;  %v2145_v59 = vadd.f32 %v6691_v47, %v1900_v44  ;;  %v2049_v56 = vadd.f32 %v6759_v22, %v1741_v7  ;;  %v2050_v22 = vadd.f32 %v6767_v5, %v1744_v42  ;;  %v7689_v7 = vld [vmem:[#allocation20_spill] sm:$0xff]  ;;  %v7694_v42 = vld [vmem:[#allocation3_spill] sm:$0xff] }
 0x458   :  { %4592 = vmatmul.msk.f32.vlgmr.msra.gmra.mxu0 %vm2630_vm4, %v2613_v58  ;;  %4603 = vmatmul.msk.f32.vlgmr.msra.gmra.mxu3 %vm2630_vm4, %v2613_v58  ;;  %v2375_v46 = vadd.f32 %v2349_v14, %v2145_v59  ;;  %v1906_v14 = vadd.f32 %v6711_v10, %v6713_v33  ;;  %v2588_v10 = vpop.f32.mrf.mxu1  ;;  %v1909_v33 = vadd.f32 %v6723_v24, %v6725_v25 }
 0x459   :  { %v1912_v24 = vadd.f32 %v6740_v57, %v6742_v1  ;;  %v1915_v57 = vadd.f32 %v6752_v32, %v6755_v43  ;;  %v7684_v32 = vld [vmem:[#allocation19_spill] sm:$0xff] }
 0x45a   :  { %v2605_v39 = vadd.f32 %v2579_v11, %v2375_v46  ;;  %v2606_v11 = vadd.f32 %v2582_v60, %v2376_v19  ;;  %v2147_v27 = vadd.f32 %v6715_v53, %v1906_v14  ;;  %v2148_v53 = vadd.f32 %v6732_v28, %v1909_v33  ;;  %v7682_v46 = vld [vmem:[#allocation2_spill] sm:$0xff]  ;;  %v7685_v43 = vld [vmem:[#allocation11_spill] sm:$0xff] }
 0x45b   :  { %v2478_v29 = vpop.f32.mrf.mxu0  ;;  %v2149_v28 = vadd.f32 %v6745_v26, %v1912_v24  ;;  %v1750_v26 = vadd.f32 %v7681_v18, %v6681_v40  ;;  %v7686_v40 = vld [vmem:[#allocation9_spill] sm:$0xff]  ;;  %v7687_v14 = vld [vmem:[#allocation18_spill] sm:$0xff] }
 0x45c   :  { %v2506_v48 = vadd.f32 %v2478_v29, %v2276_v55  ;;  %v2257_v41 = vpop.f32.mrf.mxu2  ;;  %v2377_v63 = vadd.f32 %v2355_v38, %v2147_v27  ;;  %v2378_v25 = vadd.f32 %v2358_v9, %v2148_v53  ;;  %v2364_v0 = vpop.f32.mrf.mxu3  ;;  %v1918_v38 = vadd.f32 %v7685_v43, %v7684_v32  ;;  %v7690_v9 = vld [vmem:[#allocation6_spill] sm:$0xff] }
 0x45d   :  { %v2279_v31 = vadd.f32 %v2257_v41, %v2049_v56  ;;  %v2379_v1 = vadd.f32 %v2361_v54, %v2149_v28  ;;  %v1753_v19 = vadd.f32 %v7687_v14, %v7686_v40  ;;  %v2874_v28 = vld [vmem:[%s7613_s12 + $0x8] sm:$0xff]  ;;  %v2801_v32 = vpop.permute.xlu2 %2800 }
 0x45e   :  { %v2614_v4 = vmax.f32 %v2506_v48, %v2604_v30  ;;  %v2607_v34 = vadd.f32 %v2585_v52, %v2377_v63  ;;  %v2608_v30 = vadd.f32 %v2588_v10, %v2378_v25  ;;  %v2051_v48 = vadd.f32 %v6800_v8, %v1747_v2  ;;  %v2875_v2 = vld [vmem:[%s7613_s12 + $0x10] sm:$0xf] }
 0x45f   :  { %v2150_v8 = vadd.f32 %v7682_v46, %v1915_v57  ;;  %v2053_v27 = vadd.f32 %v7689_v7, %v1753_v19  ;;  %4613 = vmatpush.msk.msrb.mxu0 %vm1303_vm1, %v2875_v2  ;;  %v4639_v57 = vld [vmem:[%s7613_s12 + $0x18] sm:$0xff] }
 0x460   :  { %4593 = vmatmul.msk.f32.vlgmr.msrb.gmra.mxu2 %vm2630_vm4, %v2614_v4  ;;  %4604 = vmatmul.msk.f32.gmra.mxu3 %vm2630_vm4, %v2614_v4  ;;  %v2591_v45 = vpop.f32.mrf.mxu1 }
 0x461   :  { %v2609_v37 = vadd.f32 %v2591_v45, %v2379_v1  ;;  %2924 = vmatpush.msrb.mxu0 %v2874_v28 }
 0x463   :  { %v2481_v16 = vpop.f32.mrf.mxu0 }
 0x464   :  { %v2507_v35 = vadd.f32 %v2481_v16, %v2277_v49  ;;  %v2260_v61 = vpop.f32.mrf.mxu2  ;;  %v7683_v16 = vld [vmem:[#allocation14_spill] sm:$0xff]  ;;  %v2367_v52 = vpop.f32.mrf.mxu3 }
 0x465   :  { %v2280_v20 = vadd.f32 %v2260_v61, %v2050_v22 }
 0x466   :  { %v2615_v47 = vmax.f32 %v2507_v35, %v2605_v39  ;;  %v2052_v39 = vadd.f32 %v7683_v16, %v1750_v26  ;;  %v2380_v35 = vadd.f32 %v2364_v0, %v2150_v8  ;;  %v2796_v26 = vpop.permute.xlu1 %2795 }
 0x468   :  { %4594 = vmatmul.msk.f32.gmra.mxu2 %vm2630_vm4, %v2615_v47  ;;  %4605 = vmatmul.msk.f32.gmra.mxu3 %vm2630_vm4, %v2615_v47  ;;  %v2594_v6 = vpop.f32.mrf.mxu1 }
 0x469   :  { %v2610_v15 = vadd.f32 %v2594_v6, %v2380_v35 }
 0x46b   :  { %v2484_v36 = vpop.f32.mrf.mxu0 }
 0x46c   :  { %v2508_v21 = vadd.f32 %v2484_v36, %v2278_v51  ;;  %v2263_v55 = vpop.f32.mrf.mxu2  ;;  %v7688_v51 = vld [vmem:[#allocation13_spill] sm:$0xff]  ;;  %v2370_v22 = vpop.f32.mrf.mxu3 }
 0x46d   :  { %v2281_v60 = vadd.f32 %v2263_v55, %v2051_v48  ;;  %v2151_v36 = vadd.f32 %v7688_v51, %v1918_v38  ;;  %v2873_v48 = vld [vmem:[%s7613_s12] sm:$0xff] }
 0x46e   :  { %v2616_v17 = vmax.f32 %v2508_v21, %v2606_v11  ;;  %2925 = vmatpush.msrb.mxu0 %v2873_v48  ;;  %v2811_v19 = vpop.permute.xlu1 %2810 }
 0x46f   :  { %v2381_v56 = vadd.f32 %v2367_v52, %v2151_v36 }
 0x470   :  { %4595 = vmatmul.msk.f32.gmra.mxu2 %vm2630_vm4, %v2616_v17  ;;  %4606 = vmatmul.msk.f32.gmra.mxu3 %vm2630_vm4, %v2616_v17  ;;  %v2597_v21 = vpop.f32.mrf.mxu1  ;;  %v7691_v17 = vld [vmem:[#allocation12_spill] sm:$0xff] }
 0x471   :  { %v1921_v61 = vadd.f32 %v7691_v17, %v7690_v9  ;;  %v2611_v63 = vadd.f32 %v2597_v21, %v2381_v56  ;;  %v4684_v56 = vld [vmem:[%s7613_s12 + $0x38] sm:$0xff] }
 0x473   :  { %v2487_v58 = vpop.f32.mrf.mxu0  ;;  %v2152_v53 = vadd.f32 %v7694_v42, %v1921_v61  ;;  %v4685_v61 = vld [vmem:[%s7613_s12 + $0x40] sm:$0xf] }
 0x474   :  { %v2509_v3 = vadd.f32 %v2487_v58, %v2279_v31  ;;  %v2266_v59 = vpop.f32.mrf.mxu2  ;;  %v7692_v58 = vld [vmem:[#allocation5_spill] sm:$0xff]  ;;  %4686 = vmatpush.msk.msra.mxu0 %vm1303_vm1, %v4685_v61  ;;  %v2959_v61 = vld [vmem:[%s7614_s11 + $0x10] sm:$0xff] }
 0x475   :  { %v2282_v41 = vadd.f32 %v2266_v59, %v2052_v39  ;;  %v2382_v25 = vadd.f32 %v2370_v22, %v2152_v53  ;;  %v2791_v59 = vpop.permute.xlu0 %2790 }
 0x476   :  { %v2617_v44 = vmax.f32 %v2509_v3, %v2607_v34  ;;  %v7693_v34 = vld [vmem:[#allocation10_spill] sm:$0xff]  ;;  %3383 = vmatpush.msra.mxu0 %v4684_v56  ;;  %v2826_v22 = vpop.permute.xlu1 %2825  ;;  %v4655_v56 = vld [vmem:[%s7614_s11 + $0x88] sm:$0xff] }
 0x477   :  { %v1756_v3 = vadd.f32 %v7693_v34, %v7692_v58 }
 0x478   :  { %4596 = vmatmul.msk.f32.gmra.mxu2 %vm2630_vm4, %v2617_v44  ;;  %4607 = vmatmul.msk.f32.gmra.mxu3 %vm2630_vm4, %v2617_v44  ;;  %v2600_v24 = vpop.f32.mrf.mxu1 }
 0x479   :  { %v2054_v55 = vadd.f32 %v6828_v23, %v1756_v3  ;;  %v4641_v23 = vld [vmem:[%s7613_s12 + $0x28] sm:$0xf] }
 0x47a   :  { %4642 = vmatpush.msk.msra.mxu2 %vm1303_vm1, %v4641_v23 }
 0x47b   :  { %v2490_v29 = vpop.f32.mrf.mxu0 }
 0x47c   :  { %v2510_v13 = vadd.f32 %v2490_v29, %v2280_v20  ;;  %v2269_v62 = vpop.f32.mrf.mxu2  ;;  %v2612_v29 = vadd.f32 %v2600_v24, %v2382_v25 }
 0x47d   :  { %v2283_v10 = vadd.f32 %v2269_v62, %v2053_v27  ;;  %v2816_v27 = vpop.permute.xlu2 %2815 }
 0x47e   :  { %v2618_v5 = vmax.f32 %v2510_v13, %v2608_v30 }
 0x480   :  { %4597 = vmatmul.msk.f32.gmra.mxu2 %vm2630_vm4, %v2618_v5  ;;  %4608 = vmatmul.msk.f32.gmra.mxu3 %vm2630_vm4, %v2618_v5  ;;  %v4640_v5 = vld [vmem:[%s7613_s12 + $0x20] sm:$0xff] }
 0x481   :  { %3191 = vmatpush.msra.mxu2 %v4640_v5 }
 0x483   :  { %v2493_v4 = vpop.f32.mrf.mxu0  ;;  %3192 = vmatpush.msra.mxu2 %v4639_v57  ;;  %v4773_v57 = vld [vmem:[%s7613_s12 + $0x70] sm:$0xf] }
 0x484   :  { %v2511_v50 = vadd.f32 %v2493_v4, %v2281_v60  ;;  %v2272_v54 = vpop.f32.mrf.mxu2 }
 0x485   :  { %v2284_v20 = vadd.f32 %v2272_v54, %v2054_v55 }
 0x486   :  { %v2619_v49 = vmax.f32 %v2511_v50, %v2609_v37 }
 0x488   :  { %4598 = vmatmul.msk.f32.gmra.mxu2 %vm2630_vm4, %v2619_v49  ;;  %4609 = vmatmul.msk.f32.gmra.mxu3 %vm2630_vm4, %v2619_v49 }
 0x48b   :  { %v2496_v12 = vpop.f32.mrf.mxu0 }
 0x48c   :  { %v2512_v47 = vadd.f32 %v2496_v12, %v2282_v41 }
 0x48e   :  { %v2620_v11 = vmax.f32 %v2512_v47, %v2610_v15  ;;  %v2806_v15 = vpop.permute.xlu0 %2805 }
 0x490   :  { %4599 = vmatmul.msk.f32.gmra.mxu2 %vm2630_vm4, %v2620_v11  ;;  %4610 = vmatmul.msk.f32.gmra.mxu3 %vm2630_vm4, %v2620_v11 }
 0x493   :  { %v2499_v33 = vpop.f32.mrf.mxu0 }
 0x494   :  { %v2513_v31 = vadd.f32 %v2499_v33, %v2283_v10 }
 0x496   :  { %v2621_v44 = vmax.f32 %v2513_v31, %v2611_v63  ;;  %v4683_v31 = vld [vmem:[%s7613_s12 + $0x30] sm:$0xff]  ;;  %v2821_v58 = vpop.permute.xlu0 %2820 }
 0x497   :  { %3384 = vmatpush.msra.mxu0 %v4683_v31 }
 0x498   :  { %4600 = vmatmul.msk.f32.gmra.mxu2 %vm2630_vm4, %v2621_v44  ;;  %4611 = vmatmul.msk.f32.gmra.mxu3 %vm2630_vm4, %v2621_v44 }
 0x49b   :  { %v2502_v45 = vpop.f32.mrf.mxu0 }
 0x49c   :  { %v2514_v30 = vadd.f32 %v2502_v45, %v2284_v20  ;;  %v2831_v45 = vpop.permute.xlu2 %2830 }
 0x49e   :  { %v2622_v13 = vmax.f32 %v2514_v30, %v2612_v29  ;;  %v2836_v28 = vpop.permute.xlu0 %2835 }
 0x4a0   :  { %4601 = vmatmul.msk.f32.gmra.mxu2 %vm2630_vm4, %v2622_v13  ;;  %4612 = vmatmul.msk.f32.gmra.mxu3 %vm2630_vm4, %v2622_v13 }
 0x4d5   :  { %v2681_v1 = vpop.f32.mrf.mxu0 }
 0x4db   :  { %v2738_v60 = vpop.f32.mrf.mxu3 }
 0x4dc   :  { %v2768_v0 = vmax.f32 %v2681_v1, %v2738_v60  ;;  %v4772_v60 = vld [vmem:[%s7613_s12 + $0x68] sm:$0xff] }
 0x4de   :  { %v2838_v4 = vadd.f32 %v2791_v59, %v2768_v0  ;;  %v4771_v0 = vld [vmem:[%s7613_s12 + $0x60] sm:$0xff] }
 0x4e0   :  { %v6928_v37 = vmax.f32 %v2838_v4, 0.0 }
 0x4e2   :  { %4614 = vmatmul.msk.f32.vlgmr.msrb.gmra.mxu0 %vm2876_vm5, %v6928_v37  ;;  %4643 = vmatmul.msk.f32.vlgmr.msra.gmra.mxu2 %vm2876_vm5, %v6928_v37 }
 0x4e3   :  { %v2684_v50 = vpop.f32.mrf.mxu2  ;;  %v2741_v6 = vpop.f32.mrf.mxu3  ;;  %4774 = vmatpush.msk.msrb.mxu0 %vm1303_vm1, %v4773_v57  ;;  %v4662_v57 = vld [vmem:[%s7614_s11 + $0xc0] sm:$0xff] }
 0x4e4   :  { %v2769_v18 = vmax.f32 %v2684_v50, %v2741_v6 }
 0x4e5   :  { %3767 = vmatpush.msrb.mxu0 %v4772_v60  ;;  %v2967_v60 = vld [vmem:[%s7614_s11 + $0x50] sm:$0xff] }
 0x4e6   :  { %v2839_v46 = vadd.f32 %v2796_v26, %v2769_v18 }
 0x4e7   :  { %3768 = vmatpush.msrb.mxu0 %v4771_v0  ;;  %v4697_v0 = vld [vmem:[%s7614_s11 + $0xf0] sm:$0xff] }
 0x4e8   :  { %v6934_v8 = vmax.f32 %v2839_v46, 0.0 }
 0x4ea   :  { %4615 = vmatmul.msk.f32.gmra.mxu0 %vm2876_vm5, %v6934_v8  ;;  %4644 = vmatmul.msk.f32.gmra.mxu2 %vm2876_vm5, %v6934_v8 }
 0x4eb   :  { %v2687_v49 = vpop.f32.mrf.mxu2  ;;  %v2744_v16 = vpop.f32.mrf.mxu3 }
 0x4ec   :  { %v2770_v39 = vmax.f32 %v2687_v49, %v2744_v16 }
 0x4ee   :  { %v2840_v43 = vadd.f32 %v2801_v32, %v2770_v39 }
 0x4f0   :  { %v6940_v38 = vmax.f32 %v2840_v43, 0.0 }
 0x4f2   :  { %4616 = vmatmul.msk.f32.gmra.mxu0 %vm2876_vm5, %v6940_v38  ;;  %4645 = vmatmul.msk.f32.gmra.mxu2 %vm2876_vm5, %v6940_v38 }
 0x4f3   :  { %v2690_v35 = vpop.f32.mrf.mxu2  ;;  %v2747_v41 = vpop.f32.mrf.mxu3 }
 0x4f4   :  { %v2771_v12 = vmax.f32 %v2690_v35, %v2747_v41 }
 0x4f6   :  { %v2841_v47 = vadd.f32 %v2806_v15, %v2771_v12 }
 0x4f8   :  { %v6946_v52 = vmax.f32 %v2841_v47, 0.0 }
 0x4fa   :  { %4617 = vmatmul.msk.f32.gmra.mxu0 %vm2876_vm5, %v6946_v52  ;;  %4646 = vmatmul.msk.f32.gmra.mxu2 %vm2876_vm5, %v6946_v52 }
 0x4fb   :  { %v2693_v62 = vpop.f32.mrf.mxu2  ;;  %v2750_v40 = vpop.f32.mrf.mxu3 }
 0x4fc   :  { %v2772_v14 = vmax.f32 %v2693_v62, %v2750_v40 }
 0x4fe   :  { %v2842_v51 = vadd.f32 %v2811_v19, %v2772_v14 }
 0x500   :  { %v6952_v36 = vmax.f32 %v2842_v51, 0.0  ;;  %v2957_v51 = vld [vmem:[%s7614_s11] sm:$0xff] }
 0x502   :  { %4618 = vmatmul.msk.f32.gmra.mxu0 %vm2876_vm5, %v6952_v36  ;;  %4647 = vmatmul.msk.f32.gmra.mxu2 %vm2876_vm5, %v6952_v36 }
 0x503   :  { %v2696_v11 = vpop.f32.mrf.mxu2  ;;  %v2753_v21 = vpop.f32.mrf.mxu3 }
 0x504   :  { %v2773_v7 = vmax.f32 %v2696_v11, %v2753_v21  ;;  %v4653_v11 = vld [vmem:[%s7614_s11 + $0x78] sm:$0xff] }
 0x506   :  { %v2843_v9 = vadd.f32 %v2816_v27, %v2773_v7  ;;  %v2958_v7 = vld [vmem:[%s7614_s11 + $0x8] sm:$0xff]  ;;  %v4654_v27 = vld [vmem:[%s7614_s11 + $0x80] sm:$0xff] }
 0x508   :  { %v6958_v17 = vmax.f32 %v2843_v9, 0.0 }
 0x50a   :  { %4619 = vmatmul.msk.f32.gmra.mxu0 %vm2876_vm5, %v6958_v17  ;;  %4648 = vmatmul.msk.f32.gmra.mxu2 %vm2876_vm5, %v6958_v17 }
 0x50b   :  { %v2699_v10 = vpop.f32.mrf.mxu2  ;;  %v2756_v33 = vpop.f32.mrf.mxu3 }
 0x50c   :  { %v2774_v63 = vmax.f32 %v2699_v10, %v2756_v33  ;;  %v2960_v33 = vld [vmem:[%s7614_s11 + $0x18] sm:$0xff] }
 0x50e   :  { %v2844_v34 = vadd.f32 %v2821_v58, %v2774_v63  ;;  %v4656_v63 = vld [vmem:[%s7614_s11 + $0x90] sm:$0xff]  ;;  %v2961_v58 = vld [vmem:[%s7614_s11 + $0x20] sm:$0xff] }
 0x510   :  { %v6974_v3 = vmax.f32 %v2844_v34, 0.0  ;;  %v4657_v34 = vld [vmem:[%s7614_s11 + $0x98] sm:$0xff] }
 0x512   :  { %4620 = vmatmul.msk.f32.gmra.mxu0 %vm2876_vm5, %v6974_v3  ;;  %4649 = vmatmul.msk.f32.gmra.mxu2 %vm2876_vm5, %v6974_v3 }
 0x513   :  { %v2702_v42 = vpop.f32.mrf.mxu2  ;;  %v2759_v53 = vpop.f32.mrf.mxu3 }
 0x514   :  { %v2775_v44 = vmax.f32 %v2702_v42, %v2759_v53  ;;  %v2962_v53 = vld [vmem:[%s7614_s11 + $0x28] sm:$0xff] }
 0x516   :  { %v2845_v54 = vadd.f32 %v2826_v22, %v2775_v44  ;;  %v4658_v44 = vld [vmem:[%s7614_s11 + $0xa0] sm:$0xff] }
 0x518   :  { %v6980_v55 = vmax.f32 %v2845_v54, 0.0  ;;  %v2963_v54 = vld [vmem:[%s7614_s11 + $0x30] sm:$0xff] }
 0x51a   :  { %4621 = vmatmul.msk.f32.gmra.mxu0 %vm2876_vm5, %v6980_v55  ;;  %4650 = vmatmul.msk.f32.gmra.mxu2 %vm2876_vm5, %v6980_v55 }
 0x51b   :  { %v2705_v24 = vpop.f32.mrf.mxu2  ;;  %v2762_v25 = vpop.f32.mrf.mxu3 }
 0x51c   :  { %v2776_v20 = vmax.f32 %v2705_v24, %v2762_v25  ;;  %v4659_v24 = vld [vmem:[%s7614_s11 + $0xa8] sm:$0xff] }
 0x51e   :  { %v2846_v29 = vadd.f32 %v2831_v45, %v2776_v20  ;;  %v2964_v20 = vld [vmem:[%s7614_s11 + $0x38] sm:$0xff]  ;;  %v4660_v45 = vld [vmem:[%s7614_s11 + $0xb0] sm:$0xff] }
 0x520   :  { %v6986_v30 = vmax.f32 %v2846_v29, 0.0 }
 0x522   :  { %4622 = vmatmul.msk.f32.gmra.mxu0 %vm2876_vm5, %v6986_v30  ;;  %4651 = vmatmul.msk.f32.gmra.mxu2 %vm2876_vm5, %v6986_v30 }
 0x523   :  { %v2708_v13 = vpop.f32.mrf.mxu2  ;;  %v2765_v2 = vpop.f32.mrf.mxu3 }
 0x524   :  { %v2777_v23 = vmax.f32 %v2708_v13, %v2765_v2  ;;  %v2965_v13 = vld [vmem:[%s7614_s11 + $0x40] sm:$0xff]  ;;  %v4661_v2 = vld [vmem:[%s7614_s11 + $0xb8] sm:$0xff] }
 0x526   :  { %v2847_v5 = vadd.f32 %v2836_v28, %v2777_v23  ;;  %v4729_v28 = vld [vmem:[%s7613_s12 + $0x58] sm:$0xf] }
 0x528   :  { %v6992_v48 = vmax.f32 %v2847_v5, 0.0  ;;  %v2966_v5 = vld [vmem:[%s7614_s11 + $0x48] sm:$0xff] }
 0x52a   :  { %4623 = vmatmul.msk.f32.gmra.mxu0 %vm2876_vm5, %v6992_v48  ;;  %4652 = vmatmul.msk.f32.gmra.mxu2 %vm2876_vm5, %v6992_v48 }
 0x532   :  { %4687 = vmatmul.msk.f32.vlgmr.msra.gmra.mxu0 %vm2876_vm5, %v6928_v37 }
 0x53a   :  { %4688 = vmatmul.msk.f32.gmra.mxu0 %vm2876_vm5, %v6934_v8 }
 0x542   :  { %4689 = vmatmul.msk.f32.gmra.mxu0 %vm2876_vm5, %v6940_v38 }
 0x54a   :  { %4690 = vmatmul.msk.f32.gmra.mxu0 %vm2876_vm5, %v6946_v52 }
 0x552   :  { %4691 = vmatmul.msk.f32.gmra.mxu0 %vm2876_vm5, %v6952_v36 }
 0x55a   :  { %4692 = vmatmul.msk.f32.gmra.mxu0 %vm2876_vm5, %v6958_v17 }
 0x55f   :  { %v2927_v1 = vpop.f32.mrf.mxu0 }
 0x562   :  { %4693 = vmatmul.msk.f32.gmra.mxu0 %vm2876_vm5, %v6974_v3 }
 0x565   :  { %v3194_v59 = vpop.f32.mrf.mxu2 }
 0x567   :  { %v2930_v4 = vpop.f32.mrf.mxu0 }
 0x56a   :  { %4694 = vmatmul.msk.f32.gmra.mxu0 %vm2876_vm5, %v6980_v55 }
 0x56d   :  { %v3197_v50 = vpop.f32.mrf.mxu2 }
 0x56f   :  { %v2933_v6 = vpop.f32.mrf.mxu0 }
 0x572   :  { %4695 = vmatmul.msk.f32.gmra.mxu0 %vm2876_vm5, %v6986_v30 }
 0x575   :  { %v3200_v18 = vpop.f32.mrf.mxu2 }
 0x577   :  { %v2936_v26 = vpop.f32.mrf.mxu0 }
 0x57a   :  { %4696 = vmatmul.msk.f32.gmra.mxu0 %vm2876_vm5, %v6992_v48 }
 0x57d   :  { %v3203_v46 = vpop.f32.mrf.mxu2 }
 0x57f   :  { %v2939_v49 = vpop.f32.mrf.mxu0 }
 0x582   :  { %4775 = vmatmul.msk.f32.vlgmr.msrb.gmra.mxu0 %vm2876_vm5, %v6928_v37 }
 0x585   :  { %v3206_v16 = vpop.f32.mrf.mxu2 }
 0x587   :  { %v2942_v39 = vpop.f32.mrf.mxu0 }
 0x58a   :  { %4776 = vmatmul.msk.f32.gmra.mxu0 %vm2876_vm5, %v6934_v8 }
 0x58d   :  { %v3209_v32 = vpop.f32.mrf.mxu2 }
 0x58f   :  { %v2945_v43 = vpop.f32.mrf.mxu0 }
 0x592   :  { %4777 = vmatmul.msk.f32.gmra.mxu0 %vm2876_vm5, %v6940_v38 }
 0x595   :  { %v3212_v35 = vpop.f32.mrf.mxu2 }
 0x597   :  { %v2948_v41 = vpop.f32.mrf.mxu0 }
 0x59a   :  { %4778 = vmatmul.msk.f32.gmra.mxu0 %vm2876_vm5, %v6946_v52 }
 0x59d   :  { %v3215_v12 = vpop.f32.mrf.mxu2 }
 0x59f   :  { %v2951_v15 = vpop.f32.mrf.mxu0 }
 0x5a2   :  { %4779 = vmatmul.msk.f32.gmra.mxu0 %vm2876_vm5, %v6952_v36 }
 0x5a5   :  { %v3218_v47 = vpop.f32.mrf.mxu2 }
 0x5a7   :  { %v2954_v62 = vpop.f32.mrf.mxu0 }
 0x5a8   :  { %3024 = vmatpush.msra.mxu1 %v2954_v62  ;;  %v4701_v62 = vld [vmem:[%s7614_s11 + $0x110] sm:$0xff] }
 0x5aa   :  { %3025 = vmatpush.msra.mxu1 %v2951_v15  ;;  %4780 = vmatmul.msk.f32.gmra.mxu0 %vm2876_vm5, %v6958_v17 }
 0x5ac   :  { %3026 = vmatpush.msra.mxu1 %v2948_v41  ;;  %v4700_v41 = vld [vmem:[%s7614_s11 + $0x108] sm:$0xff] }
 0x5ad   :  { %v3221_v40 = vpop.f32.mrf.mxu2 }
 0x5ae   :  { %3027 = vmatpush.msra.mxu1 %v2945_v43  ;;  %3291 = vmatpush.msrb.mxu3 %v3221_v40  ;;  %v4667_v40 = vld [vmem:[%s7614_s11 + $0xe8] sm:$0xff] }
 0x5af   :  { %v7040_v14 = vpop.f32.mrf.mxu0 }
 0x5b0   :  { %3028 = vmatpush.msra.mxu1 %v2942_v39  ;;  %3292 = vmatpush.msrb.mxu3 %v3218_v47  ;;  %v4699_v39 = vld [vmem:[%s7614_s11 + $0x100] sm:$0xff]  ;;  %v2971_v47 = vld [vmem:[%s7614_s11 + $0x70] sm:$0xff] }
 0x5b2   :  { %3029 = vmatpush.msra.mxu1 %v2939_v49  ;;  %3293 = vmatpush.msrb.mxu3 %v3215_v12  ;;  %v4666_v12 = vld [vmem:[%s7614_s11 + $0xe0] sm:$0xff] }
 0x5b3   :  { %4781 = vmatmul.msk.f32.gmra.mxu0 %vm2876_vm5, %v6974_v3 }
 0x5b4   :  { %3030 = vmatpush.msra.mxu1 %v2936_v26  ;;  %3294 = vmatpush.msrb.mxu3 %v3212_v35  ;;  %v4727_v26 = vld [vmem:[%s7613_s12 + $0x48] sm:$0xff] }
 0x5b5   :  { %v2970_v35 = vld [vmem:[%s7614_s11 + $0x68] sm:$0xff] }
 0x5b6   :  { %3031 = vmatpush.msra.mxu1 %v2933_v6  ;;  %3295 = vmatpush.msrb.mxu3 %v3209_v32  ;;  %v4698_v6 = vld [vmem:[%s7614_s11 + $0xf8] sm:$0xff] }
 0x5b7   :  { %v7044_v19 = vpop.f32.mrf.mxu0  ;;  %v4665_v32 = vld [vmem:[%s7614_s11 + $0xd8] sm:$0xff] }
 0x5b8   :  { %3032 = vmatpush.msra.mxu1 %v2930_v4  ;;  %3296 = vmatpush.msrb.mxu3 %v3206_v16  ;;  %v2969_v16 = vld [vmem:[%s7614_s11 + $0x60] sm:$0xff] }
 0x5ba   :  { %3033 = vmatpush.msra.mxu1 %v2927_v1  ;;  %3297 = vmatpush.msrb.mxu3 %v3203_v46  ;;  %v4664_v46 = vld [vmem:[%s7614_s11 + $0xd0] sm:$0xff] }
 0x5bb   :  { %4782 = vmatmul.msk.f32.gmra.mxu0 %vm2876_vm5, %v6980_v55  ;;  %4624 = vmatmul.msk.f32.vlgmr.msra.gmra.mxu1 %vm2972_vm6, %v2957_v51 }
 0x5bc   :  { %3298 = vmatpush.msrb.mxu3 %v3200_v18  ;;  %4730 = vmatpush.msk.msrb.mxu1 %vm1303_vm1, %v4729_v28  ;;  %v4728_v18 = vld [vmem:[%s7613_s12 + $0x50] sm:$0xff]  ;;  %v7316_v28 = vpop.permute.xlu2 %3147 }
 0x5be   :  { %3299 = vmatpush.msrb.mxu3 %v3197_v50  ;;  %v2968_v50 = vld [vmem:[%s7614_s11 + $0x58] sm:$0xff]  ;;  %3575 = vmatpush.msrb.mxu1 %v4728_v18 }
 0x5bf   :  { %v3392_v21 = vpop.f32.mrf.mxu0 }
 0x5c0   :  { %3300 = vmatpush.msrb.mxu3 %v3194_v59  ;;  %v4663_v59 = vld [vmem:[%s7614_s11 + $0xc8] sm:$0xff]  ;;  %3576 = vmatpush.msrb.mxu1 %v4727_v26 }
 0x5c1   :  { %4668 = vmatmul.msk.f32.vlgmr.msrb.gmra.mxu3 %vm2972_vm6, %v4653_v11 }
 0x5c3   :  { %4783 = vmatmul.msk.f32.gmra.mxu0 %vm2876_vm5, %v6986_v30  ;;  %4625 = vmatmul.msk.f32.gmra.mxu1 %vm2972_vm6, %v2958_v7 }
 0x5c7   :  { %v3395_v9 = vpop.f32.mrf.mxu0 }
 0x5c9   :  { %4669 = vmatmul.msk.f32.gmra.mxu3 %vm2972_vm6, %v4654_v27 }
 0x5cb   :  { %4784 = vmatmul.msk.f32.gmra.mxu0 %vm2876_vm5, %v6992_v48  ;;  %4626 = vmatmul.msk.f32.gmra.mxu1 %vm2972_vm6, %v2959_v61 }
 0x5cf   :  { %v3398_v10 = vpop.f32.mrf.mxu0 }
 0x5d1   :  { %4670 = vmatmul.msk.f32.gmra.mxu3 %vm2972_vm6, %v4655_v56  ;;  %v4705_v56 = vld [vmem:[%s7614_s11 + $0x130] sm:$0xff] }
 0x5d3   :  { %4627 = vmatmul.msk.f32.gmra.mxu1 %vm2972_vm6, %v2960_v33 }
 0x5d7   :  { %v3401_v31 = vpop.f32.mrf.mxu0 }
 0x5d9   :  { %4671 = vmatmul.msk.f32.gmra.mxu3 %vm2972_vm6, %v4656_v63 }
 0x5db   :  { %4628 = vmatmul.msk.f32.gmra.mxu1 %vm2972_vm6, %v2961_v58  ;;  %v4710_v58 = vld [vmem:[%s7614_s11 + $0x158] sm:$0xff] }
 0x5df   :  { %v3404_v42 = vpop.f32.mrf.mxu0 }
 0x5e1   :  { %4672 = vmatmul.msk.f32.gmra.mxu3 %vm2972_vm6, %v4657_v34  ;;  %v4711_v34 = vld [vmem:[%s7614_s11 + $0x160] sm:$0xff] }
 0x5e3   :  { %4629 = vmatmul.msk.f32.gmra.mxu1 %vm2972_vm6, %v2962_v53 }
 0x5e7   :  { %v3407_v22 = vpop.f32.mrf.mxu0 }
 0x5e9   :  { %4673 = vmatmul.msk.f32.gmra.mxu3 %vm2972_vm6, %v4658_v44 }
 0x5eb   :  { %4630 = vmatmul.msk.f32.gmra.mxu1 %vm2972_vm6, %v2963_v54 }
 0x5ef   :  { %v3410_v25 = vpop.f32.mrf.mxu0 }
 0x5f1   :  { %4674 = vmatmul.msk.f32.gmra.mxu3 %vm2972_vm6, %v4659_v24 }
 0x5f3   :  { %4631 = vmatmul.msk.f32.gmra.mxu1 %vm2972_vm6, %v2964_v20 }
 0x5f7   :  { %v3413_v29 = vpop.f32.mrf.mxu0 }
 0x5f8   :  { %3483 = vmatpush.msrb.mxu2 %v3413_v29 }
 0x5f9   :  { %4675 = vmatmul.msk.f32.gmra.mxu3 %vm2972_vm6, %v4660_v45 }
 0x5fa   :  { %3484 = vmatpush.msrb.mxu2 %v3410_v25 }
 0x5fb   :  { %4632 = vmatmul.msk.f32.gmra.mxu1 %vm2972_vm6, %v2965_v13  ;;  %v7310_v13 = vpop.permute.xlu0 %3142 }
 0x5fc   :  { %3485 = vmatpush.msrb.mxu2 %v3407_v22 }
 0x5fe   :  { %3486 = vmatpush.msrb.mxu2 %v3404_v42 }
 0x5ff   :  { %v7123_v23 = vpop.f32.mrf.mxu0 }
 0x600   :  { %3487 = vmatpush.msrb.mxu2 %v3401_v31  ;;  %v4709_v31 = vld [vmem:[%s7614_s11 + $0x150] sm:$0xff] }
 0x601   :  { %4676 = vmatmul.msk.f32.gmra.mxu3 %vm2972_vm6, %v4661_v2 }
 0x602   :  { %3488 = vmatpush.msrb.mxu2 %v3398_v10 }
 0x603   :  { %4633 = vmatmul.msk.f32.gmra.mxu1 %vm2972_vm6, %v2966_v5 }
 0x604   :  { %3489 = vmatpush.msrb.mxu2 %v3395_v9  ;;  %v4704_v9 = vld [vmem:[%s7614_s11 + $0x128] sm:$0xff] }
 0x606   :  { %3490 = vmatpush.msrb.mxu2 %v3392_v21  ;;  %v4703_v21 = vld [vmem:[%s7614_s11 + $0x120] sm:$0xff] }
 0x607   :  { %v7137_v1 = vpop.f32.mrf.mxu0 }
 0x608   :  { %3491 = vmatpush.msrb.mxu2 %v7044_v19  ;;  %v4702_v19 = vld [vmem:[%s7614_s11 + $0x118] sm:$0xff] }
 0x609   :  { %4677 = vmatmul.msk.f32.gmra.mxu3 %vm2972_vm6, %v4662_v57 }
 0x60a   :  { %3492 = vmatpush.msrb.mxu2 %v7040_v14 }
 0x60b   :  { %4634 = vmatmul.msk.f32.gmra.mxu1 %vm2972_vm6, %v2967_v60  ;;  %4712 = vmatmul.msk.f32.vlgmr.msrb.gmra.mxu2 %vm2972_vm6, %v4697_v0 }
 0x60f   :  { %v3776_v4 = vpop.f32.mrf.mxu0 }
 0x611   :  { %4678 = vmatmul.msk.f32.gmra.mxu3 %vm2972_vm6, %v4663_v59  ;;  %v7326_v59 = vpop.permute.xlu2 %3132 }
 0x613   :  { %4635 = vmatmul.msk.f32.gmra.mxu1 %vm2972_vm6, %v2968_v50  ;;  %4713 = vmatmul.msk.f32.gmra.mxu2 %vm2972_vm6, %v4698_v6 }
 0x617   :  { %v3779_v49 = vpop.f32.mrf.mxu0 }
 0x619   :  { %4679 = vmatmul.msk.f32.gmra.mxu3 %vm2972_vm6, %v4664_v46 }
 0x61b   :  { %4636 = vmatmul.msk.f32.gmra.mxu1 %vm2972_vm6, %v2969_v16  ;;  %4714 = vmatmul.msk.f32.gmra.mxu2 %vm2972_vm6, %v4699_v39  ;;  %v3118_v39 = vpop.permute.xlu2 %3117 }
 0x61f   :  { %v3782_v43 = vpop.f32.mrf.mxu0 }
 0x621   :  { %4680 = vmatmul.msk.f32.gmra.mxu3 %vm2972_vm6, %v4665_v32 }
 0x623   :  { %4637 = vmatmul.msk.f32.gmra.mxu1 %vm2972_vm6, %v2970_v35  ;;  %4715 = vmatmul.msk.f32.gmra.mxu2 %vm2972_vm6, %v4700_v41 }
 0x627   :  { %v3785_v15 = vpop.f32.mrf.mxu0 }
 0x629   :  { %4681 = vmatmul.msk.f32.gmra.mxu3 %vm2972_vm6, %v4666_v12 }
 0x62b   :  { %4638 = vmatmul.msk.f32.gmra.mxu1 %vm2972_vm6, %v2971_v47  ;;  %4716 = vmatmul.msk.f32.gmra.mxu2 %vm2972_vm6, %v4701_v62 }
 0x630   :  { %v3788_v14 = vpop.f32.mrf.mxu0 }
 0x631   :  { %4682 = vmatmul.msk.f32.gmra.mxu3 %vm2972_vm6, %v4667_v40 }
 0x633   :  { %4717 = vmatmul.msk.f32.gmra.mxu2 %vm2972_vm6, %v4702_v19  ;;  %4731 = vmatmul.msk.f32.vlgmr.msrb.gmra.mxu1 %vm2876_vm5, %v6928_v37 }
 0x638   :  { %v3791_v51 = vpop.f32.mrf.mxu0  ;;  %v7214_v11 = vpop.f32.mrf.mxu1 }
 0x63b   :  { %4718 = vmatmul.msk.f32.gmra.mxu2 %vm2972_vm6, %v4703_v21  ;;  %4732 = vmatmul.msk.f32.gmra.mxu1 %vm2876_vm5, %v6934_v8 }
 0x640   :  { %v3794_v7 = vpop.f32.mrf.mxu0  ;;  %v7222_v27 = vpop.f32.mrf.mxu1 }
 0x643   :  { %4719 = vmatmul.msk.f32.gmra.mxu2 %vm2972_vm6, %v4704_v9  ;;  %4733 = vmatmul.msk.f32.gmra.mxu1 %vm2876_vm5, %v6940_v38  ;;  %v4706_v38 = vld [vmem:[%s7614_s11 + $0x138] sm:$0xff]  ;;  %v4787_v9 = vld [vmem:[%s7614_s11 + $0x1f0] sm:$0xff] }
 0x644   :  { %v7282_v42 = vpop.f32.mrf.mxu3 }
 0x648   :  { %v3797_v37 = vpop.f32.mrf.mxu0  ;;  %v7230_v61 = vpop.f32.mrf.mxu1 }
 0x649   :  { %3867 = vmatpush.msra.mxu1 %v3797_v37  ;;  %v4741_v37 = vld [vmem:[%s7614_s11 + $0x168] sm:$0xff] }
 0x64b   :  { %3868 = vmatpush.msra.mxu1 %v3794_v7  ;;  %4720 = vmatmul.msk.f32.gmra.mxu2 %vm2972_vm6, %v4705_v56  ;;  %v4786_v7 = vld [vmem:[%s7614_s11 + $0x1e8] sm:$0xff]  ;;  %v4788_v56 = vld [vmem:[%s7614_s11 + $0x1f8] sm:$0xff] }
 0x64c   :  { %4734 = vmatmul.msk.f32.gmra.mxu1 %vm2876_vm5, %v6946_v52  ;;  %v4707_v52 = vld [vmem:[%s7614_s11 + $0x140] sm:$0xff]  ;;  %v7288_v53 = vpop.f32.mrf.mxu3 }
 0x64d   :  { %3869 = vmatpush.msra.mxu1 %v3791_v51  ;;  %v4785_v51 = vld [vmem:[%s7614_s11 + $0x1e0] sm:$0xff] }
 0x64f   :  { %3870 = vmatpush.msra.mxu1 %v3788_v14 }
 0x650   :  { %v7238_v8 = vpop.f32.mrf.mxu1 }
 0x651   :  { %3871 = vmatpush.msra.mxu1 %v3785_v15 }
 0x653   :  { %3872 = vmatpush.msra.mxu1 %v3782_v43  ;;  %4721 = vmatmul.msk.f32.gmra.mxu2 %vm2972_vm6, %v4706_v38  ;;  %v4742_v38 = vld [vmem:[%s7614_s11 + $0x170] sm:$0xff] }
 0x654   :  { %4735 = vmatmul.msk.f32.gmra.mxu1 %vm2876_vm5, %v6952_v36  ;;  %v4708_v36 = vld [vmem:[%s7614_s11 + $0x148] sm:$0xff]  ;;  %v7294_v22 = vpop.f32.mrf.mxu3 }
 0x655   :  { %3873 = vmatpush.msra.mxu1 %v3779_v49 }
 0x657   :  { %3874 = vmatpush.msra.mxu1 %v3776_v4 }
 0x658   :  { %v7246_v10 = vpop.f32.mrf.mxu1 }
 0x659   :  { %3875 = vmatpush.msra.mxu1 %v7137_v1  ;;  %v7322_v1 = vpop.permute.xlu0 %3127 }
 0x65b   :  { %3876 = vmatpush.msra.mxu1 %v7123_v23  ;;  %4722 = vmatmul.msk.f32.gmra.mxu2 %vm2972_vm6, %v4707_v52  ;;  %v4789_v52 = vld [vmem:[%s7614_s11 + $0x200] sm:$0xff] }
 0x65c   :  { %4736 = vmatmul.msk.f32.gmra.mxu1 %vm2876_vm5, %v6958_v17  ;;  %v7302_v20 = vpop.f32.mrf.mxu3 }
 0x660   :  { %v7256_v33 = vpop.f32.mrf.mxu1 }
 0x661   :  { %v3113_v6 = vpop.permute.xlu0 %3112 }
 0x663   :  { %4723 = vmatmul.msk.f32.gmra.mxu2 %vm2972_vm6, %v4708_v36  ;;  %v4743_v36 = vld [vmem:[%s7614_s11 + $0x178] sm:$0xff] }
 0x664   :  { %4737 = vmatmul.msk.f32.gmra.mxu1 %vm2876_vm5, %v6974_v3  ;;  %v7308_v29 = vpop.f32.mrf.mxu3 }
 0x668   :  { %v3053_v63 = vpop.f32.mrf.mxu1 }
 0x669   :  { %v3161_v18 = vadd.f32 %v3113_v6, %v3053_v63  ;;  %v4790_v63 = vld [vmem:[%s7614_s11 + $0x208] sm:$0xff] }
 0x66a   :  { %v4794_v6 = vld [vmem:[%s7614_s11 + $0x228] sm:$0xff] }
 0x66b   :  { %4724 = vmatmul.msk.f32.gmra.mxu2 %vm2972_vm6, %v4709_v31  ;;  %v4744_v31 = vld [vmem:[%s7614_s11 + $0x180] sm:$0xff] }
 0x66c   :  { %4738 = vmatmul.msk.f32.gmra.mxu1 %vm2876_vm5, %v6980_v55  ;;  %v7318_v5 = vpop.f32.mrf.mxu3 }
 0x670   :  { %v3056_v17 = vpop.f32.mrf.mxu1 }
 0x671   :  { %v3162_v43 = vadd.f32 %v3118_v39, %v3056_v17  ;;  %v4791_v17 = vld [vmem:[%s7614_s11 + $0x210] sm:$0xff]  ;;  %v4796_v39 = vld [vmem:[%s7614_s11 + $0x238] sm:$0xff] }
 0x673   :  { %4725 = vmatmul.msk.f32.gmra.mxu2 %vm2972_vm6, %v4710_v58  ;;  %v4745_v58 = vld [vmem:[%s7614_s11 + $0x188] sm:$0xff] }
 0x674   :  { %4739 = vmatmul.msk.f32.gmra.mxu1 %vm2876_vm5, %v6986_v30  ;;  %v3320_v4 = vpop.f32.mrf.mxu3 }
 0x675   :  { %v3353_v26 = vadd.f32 %v3320_v4, %v3161_v18  ;;  %v4793_v4 = vld [vmem:[%s7614_s11 + $0x220] sm:$0xff] }
 0x676   :  { %v4748_v18 = vld [vmem:[%s7614_s11 + $0x1a0] sm:$0xff] }
 0x678   :  { %v7276_v3 = vpop.f32.mrf.mxu1 }
 0x67b   :  { %4726 = vmatmul.msk.f32.gmra.mxu2 %vm2972_vm6, %v4711_v34  ;;  %v4792_v34 = vld [vmem:[%s7614_s11 + $0x218] sm:$0xff] }
 0x67c   :  { %4740 = vmatmul.msk.f32.gmra.mxu1 %vm2876_vm5, %v6992_v48  ;;  %v3323_v32 = vpop.f32.mrf.mxu3 }
 0x67d   :  { %v3354_v35 = vadd.f32 %v3323_v32, %v3162_v43  ;;  %v4750_v32 = vld [vmem:[%s7614_s11 + $0x1b0] sm:$0xff]  ;;  %v4797_v43 = vld [vmem:[%s7614_s11 + $0x240] sm:$0xff] }
 0x680   :  { %v7286_v55 = vpop.f32.mrf.mxu1 }
 0x684   :  { %4800 = vmatmul.msk.f32.vlgmr.msra.gmra.mxu1 %vm2972_vm6, %v4785_v51  ;;  %v7452_v51 = vpop.permute.xlu1 %3152 }
 0x688   :  { %v7290_v44 = vpop.f32.mrf.mxu1 }
 0x68c   :  { %4801 = vmatmul.msk.f32.gmra.mxu1 %vm2972_vm6, %v4786_v7 }
 0x68e   :  { %v7292_v30 = vpop.f32.mrf.mxu2 }
 0x690   :  { %v7296_v54 = vpop.f32.mrf.mxu1 }
 0x694   :  { %4802 = vmatmul.msk.f32.gmra.mxu1 %vm2972_vm6, %v4787_v9 }
 0x696   :  { %v7298_v24 = vpop.f32.mrf.mxu2 }
 0x698   :  { %v7300_v25 = vpop.f32.mrf.mxu1 }
 0x69c   :  { %4803 = vmatmul.msk.f32.gmra.mxu1 %vm2972_vm6, %v4788_v56  ;;  %v7463_v56 = vpop.permute.xlu1 %3137 }
 0x69e   :  { %v7304_v45 = vpop.f32.mrf.mxu2 }
 0x6a0   :  { %v7306_v48 = vpop.f32.mrf.mxu1 }
 0x6a4   :  { %4804 = vmatmul.msk.f32.gmra.mxu1 %vm2972_vm6, %v4789_v52 }
 0x6a6   :  { %v7312_v2 = vpop.f32.mrf.mxu2 }
 0x6a8   :  { %v7314_v23 = vpop.f32.mrf.mxu1 }
 0x6ac   :  { %4805 = vmatmul.msk.f32.gmra.mxu1 %vm2972_vm6, %v4790_v63  ;;  %v7468_v63 = vpop.permute.xlu1 %3122 }
 0x6ae   :  { %v7320_v57 = vpop.f32.mrf.mxu2 }
 0x6b0   :  { %v3578_v60 = vpop.f32.mrf.mxu1 }
 0x6b4   :  { %4806 = vmatmul.msk.f32.gmra.mxu1 %vm2972_vm6, %v4791_v17 }
 0x6b6   :  { %v7324_v0 = vpop.f32.mrf.mxu2 }
 0x6b8   :  { %v3581_v50 = vpop.f32.mrf.mxu1 }
 0x6bc   :  { %4807 = vmatmul.msk.f32.gmra.mxu1 %vm2972_vm6, %v4792_v34 }
 0x6be   :  { %v3512_v46 = vpop.f32.mrf.mxu2 }
 0x6bf   :  { %v7328_v49 = vadd.f32 %v3512_v46, %v3353_v26  ;;  %v4795_v26 = vld [vmem:[%s7614_s11 + $0x230] sm:$0xff]  ;;  %v4749_v46 = vld [vmem:[%s7614_s11 + $0x1a8] sm:$0xff] }
 0x6c0   :  { %v3584_v16 = vpop.f32.mrf.mxu1 }
 0x6c4   :  { %4808 = vmatmul.msk.f32.gmra.mxu1 %vm2972_vm6, %v4793_v4 }
 0x6c6   :  { %v3515_v41 = vpop.f32.mrf.mxu2 }
 0x6c7   :  { %v7330_v12 = vadd.f32 %v3515_v41, %v3354_v35  ;;  %v4751_v41 = vld [vmem:[%s7614_s11 + $0x1b8] sm:$0xff] }
 0x6c9   :  { %v3587_v15 = vpop.f32.mrf.mxu1 }
 0x6cc   :  { %4809 = vmatmul.msk.f32.gmra.mxu1 %vm2972_vm6, %v4794_v6  ;;  %v3108_v6 = vpop.permute.xlu1 %3107 }
 0x6d1   :  { %v3590_v47 = vpop.f32.mrf.mxu1 }
 0x6d4   :  { %4810 = vmatmul.msk.f32.gmra.mxu1 %vm2972_vm6, %v4795_v26 }
 0x6d9   :  { %v3593_v62 = vpop.f32.mrf.mxu1 }
 0x6dc   :  { %4811 = vmatmul.msk.f32.gmra.mxu1 %vm2972_vm6, %v4796_v39 }
 0x6e1   :  { %v3596_v40 = vpop.f32.mrf.mxu1 }
 0x6e4   :  { %4812 = vmatmul.msk.f32.gmra.mxu1 %vm2972_vm6, %v4797_v43 }
 0x6e9   :  { %v3599_v14 = vpop.f32.mrf.mxu1 }
 0x6f1   :  { %v3602_v19 = vpop.f32.mrf.mxu1 }
 0x6f9   :  { %v3605_v21 = vpop.f32.mrf.mxu1 }
 0x6fa   :  { %3675 = vmatpush.msra.mxu3 %v3605_v21  ;;  %v4754_v21 = vld [vmem:[%s7614_s11 + $0x1d0] sm:$0xff] }
 0x6fc   :  { %3676 = vmatpush.msra.mxu3 %v3602_v19  ;;  %v4753_v19 = vld [vmem:[%s7614_s11 + $0x1c8] sm:$0xff] }
 0x6fe   :  { %3677 = vmatpush.msra.mxu3 %v3599_v14 }
 0x700   :  { %3678 = vmatpush.msra.mxu3 %v3596_v40  ;;  %v4799_v40 = vld [vmem:[%s7614_s11 + $0x250] sm:$0xff] }
 0x701   :  { %v3878_v9 = vpop.f32.mrf.mxu1 }
 0x702   :  { %3679 = vmatpush.msra.mxu3 %v3593_v62  ;;  %v4752_v62 = vld [vmem:[%s7614_s11 + $0x1c0] sm:$0xff] }
 0x704   :  { %3680 = vmatpush.msra.mxu3 %v3590_v47 }
 0x706   :  { %3681 = vmatpush.msra.mxu3 %v3587_v15  ;;  %v4798_v15 = vld [vmem:[%s7614_s11 + $0x248] sm:$0xff] }
 0x707   :  { %4813 = vmatmul.msk.f32.gmra.mxu1 %vm2972_vm6, %v4798_v15 }
 0x708   :  { %3682 = vmatpush.msra.mxu3 %v3584_v16  ;;  %v7411_v16 = vpop.f32.mrf.mxu3 }
 0x709   :  { %v3881_v52 = vpop.f32.mrf.mxu1 }
 0x70a   :  { %3683 = vmatpush.msra.mxu3 %v3581_v50  ;;  %v4747_v50 = vld [vmem:[%s7614_s11 + $0x198] sm:$0xff] }
 0x70c   :  { %3684 = vmatpush.msra.mxu3 %v3578_v60  ;;  %v4746_v60 = vld [vmem:[%s7614_s11 + $0x190] sm:$0xff] }
 0x70d   :  { %4756 = vmatmul.msk.f32.vlgmr.msra.gmra.mxu3 %vm2972_vm6, %v4741_v37  ;;  %v4755_v37 = vld [vmem:[%s7614_s11 + $0x1d8] sm:$0xff] }
 0x70f   :  { %4814 = vmatmul.msk.f32.gmra.mxu1 %vm2972_vm6, %v4799_v40 }
 0x710   :  { %v7426_v35 = vpop.f32.mrf.mxu3 }
 0x715   :  { %4757 = vmatmul.msk.f32.gmra.mxu3 %vm2972_vm6, %v4742_v38 }
 0x718   :  { %v7436_v47 = vpop.f32.mrf.mxu3 }
 0x71d   :  { %4758 = vmatmul.msk.f32.gmra.mxu3 %vm2972_vm6, %v4743_v36  ;;  %v3098_v36 = vpop.permute.xlu0 %3097 }
 0x720   :  { %v7446_v14 = vpop.f32.mrf.mxu3 }
 0x725   :  { %4759 = vmatmul.msk.f32.gmra.mxu3 %vm2972_vm6, %v4744_v31  ;;  %v3103_v31 = vpop.permute.xlu2 %3102  ;;  %v3083_v34 = vpop.permute.xlu0 %3082 }
 0x728   :  { %v7457_v7 = vpop.f32.mrf.mxu3 }
 0x72d   :  { %4760 = vmatmul.msk.f32.gmra.mxu3 %vm2972_vm6, %v4745_v58  ;;  %v3884_v58 = vpop.f32.mrf.mxu1 }
 0x730   :  { %v7466_v38 = vpop.f32.mrf.mxu3 }
 0x735   :  { %4761 = vmatmul.msk.f32.gmra.mxu3 %vm2972_vm6, %v4746_v60  ;;  %v3155_v60 = vadd.f32 %v3083_v34, %v7214_v11  ;;  %v3887_v39 = vpop.f32.mrf.mxu1  ;;  %v3093_v11 = vpop.permute.xlu1 %3092 }
 0x737   :  { %v3347_v4 = vadd.f32 %v7282_v42, %v3155_v60  ;;  %v3157_v42 = vadd.f32 %v3093_v11, %v7230_v61 }
 0x738   :  { %v7470_v17 = vpop.f32.mrf.mxu3 }
 0x73d   :  { %4762 = vmatmul.msk.f32.gmra.mxu3 %vm2972_vm6, %v4747_v50  ;;  %v3539_v50 = vadd.f32 %v7292_v30, %v3347_v4  ;;  %v3890_v30 = vpop.f32.mrf.mxu1 }
 0x745   :  { %4763 = vmatmul.msk.f32.gmra.mxu3 %vm2972_vm6, %v4748_v18 }
 0x74d   :  { %4764 = vmatmul.msk.f32.gmra.mxu3 %vm2972_vm6, %v4749_v46  ;;  %v3088_v46 = vpop.permute.xlu2 %3087 }
 0x755   :  { %4765 = vmatmul.msk.f32.gmra.mxu3 %vm2972_vm6, %v4750_v32  ;;  %v3156_v32 = vadd.f32 %v3088_v46, %v7222_v27 }
 0x75d   :  { %4766 = vmatmul.msk.f32.gmra.mxu3 %vm2972_vm6, %v4751_v41  ;;  %v3348_v41 = vadd.f32 %v7288_v53, %v3156_v32 }
 0x75f   :  { %v3540_v15 = vadd.f32 %v7298_v24, %v3348_v41  ;;  %v3893_v24 = vpop.f32.mrf.mxu1 }
 0x765   :  { %4767 = vmatmul.msk.f32.gmra.mxu3 %vm2972_vm6, %v4752_v62 }
 0x767   :  { %v3896_v46 = vpop.f32.mrf.mxu1 }
 0x76d   :  { %4768 = vmatmul.msk.f32.gmra.mxu3 %vm2972_vm6, %v4753_v19 }
 0x775   :  { %4769 = vmatmul.msk.f32.gmra.mxu3 %vm2972_vm6, %v4754_v21  ;;  %v3349_v21 = vadd.f32 %v7294_v22, %v3157_v42 }
 0x77d   :  { %4770 = vmatmul.msk.f32.gmra.mxu3 %vm2972_vm6, %v4755_v37  ;;  %v3541_v37 = vadd.f32 %v7304_v45, %v3349_v21 }
 0x790   :  { %v3686_v18 = vpop.f32.mrf.mxu3 }
 0x791   :  { %v3731_v26 = vadd.f32 %v3686_v18, %v3539_v50 }
 0x793   :  { %v7476_v43 = vadd.f32 %v3878_v9, %v3731_v26  ;;  %v3158_v9 = vadd.f32 %v3098_v36, %v7238_v8  ;;  %v3160_v36 = vadd.f32 %v3108_v6, %v7256_v33 }
 0x795   :  { %v3350_v53 = vadd.f32 %v7302_v20, %v3158_v9  ;;  %v3352_v20 = vadd.f32 %v7318_v5, %v3160_v36 }
 0x797   :  { %v3542_v4 = vadd.f32 %v7312_v2, %v3350_v53  ;;  %v3544_v2 = vadd.f32 %v7324_v0, %v3352_v20 }
 0x798   :  { %v3689_v62 = vpop.f32.mrf.mxu3 }
 0x799   :  { %v3732_v40 = vadd.f32 %v3689_v62, %v3540_v15 }
 0x79b   :  { %v7481_v19 = vadd.f32 %v3881_v52, %v3732_v40  ;;  %v3159_v52 = vadd.f32 %v3103_v31, %v7246_v10  ;;  %v3899_v10 = vpop.f32.mrf.mxu1 }
 0x79d   :  { %v3351_v22 = vadd.f32 %v7308_v29, %v3159_v52  ;;  %v3167_v52 = vadd.f32 %v7310_v13, %v7300_v25 }
 0x79f   :  { %v3543_v45 = vadd.f32 %v7320_v57, %v3351_v22  ;;  %v3169_v22 = vadd.f32 %v7452_v51, %v7314_v23  ;;  %v3164_v23 = vadd.f32 %v7322_v1, %v7286_v55 }
 0x7a0   :  { %v3692_v34 = vpop.f32.mrf.mxu3 }
 0x7a1   :  { %v3733_v27 = vadd.f32 %v3692_v34, %v3541_v37  ;;  %v3361_v36 = vadd.f32 %v7470_v17, %v3169_v22  ;;  %v3163_v17 = vadd.f32 %v7468_v63, %v7276_v3 }
 0x7a3   :  { %v7486_v60 = vadd.f32 %v3884_v58, %v3733_v27  ;;  %v7505_v62 = vpop.f32.mrf.mxu1 }
 0x7a8   :  { %v3695_v50 = vpop.f32.mrf.mxu3 }
 0x7a9   :  { %v3734_v61 = vadd.f32 %v3695_v50, %v3542_v4 }
 0x7ab   :  { %v7491_v18 = vadd.f32 %v3887_v39, %v3734_v61  ;;  %v3518_v39 = vpop.f32.mrf.mxu2  ;;  %v3905_v0 = vpop.f32.mrf.mxu1 }
 0x7b0   :  { %v3698_v26 = vpop.f32.mrf.mxu3 }
 0x7b1   :  { %v3735_v8 = vadd.f32 %v3698_v26, %v3543_v45 }
 0x7b3   :  { %v7496_v58 = vadd.f32 %v3890_v30, %v3735_v8  ;;  %v3521_v40 = vpop.f32.mrf.mxu2  ;;  %v3908_v21 = vpop.f32.mrf.mxu1  ;;  %v3359_v8 = vadd.f32 %v7457_v7, %v3167_v52 }
 0x7b8   :  { %v3701_v32 = vpop.f32.mrf.mxu3 }
 0x7b9   :  { %v3736_v41 = vadd.f32 %v3701_v32, %v3544_v2 }
 0x7bb   :  { %v7500_v31 = vadd.f32 %v3893_v24, %v3736_v41  ;;  %v3524_v42 = vpop.f32.mrf.mxu2  ;;  %v3911_v27 = vpop.f32.mrf.mxu1 }
 0x7c0   :  { %v3704_v29 = vpop.f32.mrf.mxu3 }
 0x7c1   :  { %v3737_v57 = vadd.f32 %v3704_v29, %v7328_v49  ;;  %v3355_v29 = vadd.f32 %v7411_v16, %v3163_v17 }
 0x7c3   :  { %v7503_v15 = vadd.f32 %v3896_v46, %v3737_v57  ;;  %v3527_v37 = vpop.f32.mrf.mxu2  ;;  %v3914_v53 = vpop.f32.mrf.mxu1  ;;  %v3166_v46 = vadd.f32 %v7463_v56, %v7296_v54 }
 0x7c8   :  { %v3707_v33 = vpop.f32.mrf.mxu3 }
 0x7c9   :  { %v3738_v6 = vadd.f32 %v3707_v33, %v7330_v12  ;;  %v3168_v12 = vadd.f32 %v7316_v28, %v7306_v48  ;;  %v3165_v48 = vadd.f32 %v7326_v59, %v7290_v44  ;;  %v3358_v28 = vadd.f32 %v7446_v14, %v3166_v46 }
 0x7ca   :  { %v3356_v44 = vadd.f32 %v7426_v35, %v3164_v23 }
 0x7cb   :  { %v7508_v5 = vadd.f32 %v3899_v10, %v3738_v6  ;;  %v3530_v9 = vpop.f32.mrf.mxu2  ;;  %v3917_v50 = vpop.f32.mrf.mxu1  ;;  %v3360_v45 = vadd.f32 %v7466_v38, %v3168_v12  ;;  %v3357_v54 = vadd.f32 %v7436_v47, %v3165_v48  ;;  %v3550_v56 = vadd.f32 %v3527_v37, %v3358_v28 }
 0x7cc   :  { %v3551_v25 = vadd.f32 %v3530_v9, %v3359_v8  ;;  %v3548_v57 = vadd.f32 %v3521_v40, %v3356_v44  ;;  %v3547_v6 = vadd.f32 %v3518_v39, %v3355_v29  ;;  %v4028_v48 = vpop.permute.xlu1 %4027  ;;  %v4023_v28 = vpop.permute.xlu2 %4022 }
 0x7cd   :  { %v3549_v59 = vadd.f32 %v3524_v42, %v3357_v54  ;;  %v3945_v39 = vmax.f32 %v7508_v5, 0.0  ;;  %v3938_v5 = vmax.f32 %v7476_v43, 0.0  ;;  %v3956_v43 = vld [vmem:[%s7615_s14 + $0x18] sm:$0xff] }
 0x7d0   :  { %v3710_v11 = vpop.f32.mrf.mxu3 }
 0x7d3   :  { %v3533_v4 = vpop.f32.mrf.mxu2  ;;  %v3920_v38 = vpop.f32.mrf.mxu1 }
 0x7d4   :  { %v3552_v20 = vadd.f32 %v3533_v4, %v3360_v45  ;;  %v4008_v23 = vpop.permute.xlu2 %4007 }
 0x7d8   :  { %v3713_v30 = vpop.f32.mrf.mxu3 }
 0x7d9   :  { %v3740_v47 = vadd.f32 %v3713_v30, %v3548_v57  ;;  %v3944_v30 = vmax.f32 %v7503_v15, 0.0  ;;  %v3959_v15 = vld [vmem:[%s7615_s14 + $0x30] sm:$0xff] }
 0x7db   :  { %v3536_v26 = vpop.f32.mrf.mxu2  ;;  %v3932_v35 = vadd.f32 %v3905_v0, %v3740_v47  ;;  %v3942_v0 = vmax.f32 %v7496_v58, 0.0  ;;  %v3958_v58 = vld [vmem:[%s7615_s14 + $0x28] sm:$0xff] }
 0x7dc   :  { %v3553_v13 = vadd.f32 %v3536_v26, %v3361_v36 }
 0x7dd   :  { %v3947_v16 = vmax.f32 %v3932_v35, 0.0 }
 0x7e0   :  { %v3716_v34 = vpop.f32.mrf.mxu3 }
 0x7e1   :  { %v3741_v55 = vadd.f32 %v3716_v34, %v3549_v59  ;;  %v3939_v34 = vmax.f32 %v7481_v19, 0.0  ;;  %v3955_v19 = vld [vmem:[%s7615_s14 + $0x10] sm:$0xff] }
 0x7e3   :  { %v3933_v4 = vadd.f32 %v3908_v21, %v3741_v55  ;;  %v3940_v21 = vmax.f32 %v7486_v60, 0.0  ;;  %v3957_v60 = vld [vmem:[%s7615_s14 + $0x20] sm:$0xff] }
 0x7e8   :  { %v3719_v49 = vpop.f32.mrf.mxu3 }
 0x7e9   :  { %v3742_v14 = vadd.f32 %v3719_v49, %v3550_v56  ;;  %v3948_v49 = vmax.f32 %v3933_v4, 0.0 }
 0x7eb   :  { %v3934_v37 = vadd.f32 %v3911_v27, %v3742_v14  ;;  %v3960_v27 = vld [vmem:[%s7615_s14 + $0x38] sm:$0xff] }
 0x7ed   :  { %v3949_v63 = vmax.f32 %v3934_v37, 0.0 }
 0x7f0   :  { %v3722_v24 = vpop.f32.mrf.mxu3 }
 0x7f1   :  { %v3743_v7 = vadd.f32 %v3722_v24, %v3551_v25  ;;  %v3739_v24 = vadd.f32 %v3710_v11, %v3547_v6  ;;  %v3943_v11 = vmax.f32 %v7500_v31, 0.0  ;;  %v3953_v31 = vld [vmem:[%s7615_s14] sm:$0xff] }
 0x7f3   :  { %v3935_v1 = vadd.f32 %v3914_v53, %v3743_v7  ;;  %v3931_v42 = vadd.f32 %v7505_v62, %v3739_v24  ;;  %v3941_v62 = vmax.f32 %v7491_v18, 0.0  ;;  %v3954_v18 = vld [vmem:[%s7615_s14 + $0x8] sm:$0xff]  ;;  %v3961_v53 = vld [vmem:[%s7615_s14 + $0x40] sm:$0xff] }
 0x7f5   :  { %v3950_v3 = vmax.f32 %v3935_v1, 0.0  ;;  %v3946_v40 = vmax.f32 %v3931_v42, 0.0 }
 0x7f8   :  { %v3725_v61 = vpop.f32.mrf.mxu3 }
 0x7f9   :  { %v3744_v2 = vadd.f32 %v3725_v61, %v3552_v20  ;;  %v3963_v61 = vld [vmem:[%s7615_s14 + $0x50] sm:$0xf] }
 0x7fb   :  { %v3936_v41 = vadd.f32 %v3917_v50, %v3744_v2  ;;  %v3962_v50 = vld [vmem:[%s7615_s14 + $0x48] sm:$0xff]  ;;  %v4013_v2 = vpop.permute.xlu1 %4012 }
 0x7fd   :  { %v3951_v9 = vmax.f32 %v3936_v41, 0.0 }
 0x800   :  { %v3728_v51 = vpop.f32.mrf.mxu3 }
 0x801   :  { %v3745_v32 = vadd.f32 %v3728_v51, %v3553_v13  ;;  %v4018_v13 = vpop.permute.xlu0 %4017 }
 0x803   :  { %v3937_v10 = vadd.f32 %v3920_v38, %v3745_v32  ;;  %v3998_v59 = vpop.permute.xlu1 %3997 }
 0x805   :  { %v3952_v33 = vmax.f32 %v3937_v10, 0.0  ;;  %v3993_v10 = vpop.permute.xlu2 %3992 }
 0x807   :  { %4065 = vmatpush.msra.mxu2 %v3952_v33 }
 0x809   :  { %4066 = vmatpush.msra.mxu2 %v3951_v9  ;;  %v4003_v32 = vpop.permute.xlu0 %4002 }
 0x80b   :  { %4067 = vmatpush.msra.mxu2 %v3950_v3  ;;  %v3983_v24 = vpop.permute.xlu1 %3982 }
 0x80d   :  { %4068 = vmatpush.msra.mxu2 %v3949_v63  ;;  %v3978_v35 = vpop.permute.xlu2 %3977 }
 0x80f   :  { %4069 = vmatpush.msra.mxu2 %v3948_v49 }
 0x811   :  { %4070 = vmatpush.msra.mxu2 %v3947_v16  ;;  %v3988_v47 = vpop.permute.xlu0 %3987 }
 0x813   :  { %4071 = vmatpush.msra.mxu2 %v3946_v40  ;;  %v4125_v40 = vld [vmem:[%s7616_s16] sm:$0xff] }
 0x815   :  { %4072 = vmatpush.msra.mxu2 %v3945_v39  ;;  %v4126_v39 = vld [vmem:[%s7616_s16 + $0x8] sm:$0x3] }
 0x817   :  { %4073 = vmatpush.msra.mxu2 %v3944_v30 }
 0x819   :  { %4074 = vmatpush.msra.mxu2 %v3943_v11  ;;  %v4132_v30 = vpop.permute.xlu0 %4131 }
 0x81b   :  { %4075 = vmatpush.msra.mxu2 %v3942_v0 }
 0x81d   :  { %4076 = vmatpush.msra.mxu2 %v3941_v62  ;;  %v4137_v62 = vpop.permute.xlu1 %4136 }
 0x81f   :  { %4077 = vmatpush.msra.mxu2 %v3940_v21 }
 0x821   :  { %4078 = vmatpush.msra.mxu2 %v3939_v34 }
 0x823   :  { %4079 = vmatpush.msra.mxu2 %v3938_v5 }
 0x824   :  { %4815 = vmatmul.msk.f32.vlgmr.msra.gmra.mxu2 %vm4030_vm7, %v3953_v31 }
 0x82c   :  { %4816 = vmatmul.msk.f32.gmra.mxu2 %vm4030_vm7, %v3954_v18 }
 0x834   :  { %4817 = vmatmul.msk.f32.gmra.mxu2 %vm4030_vm7, %v3955_v19 }
 0x83c   :  { %4818 = vmatmul.msk.f32.gmra.mxu2 %vm4030_vm7, %v3956_v43 }
 0x844   :  { %4819 = vmatmul.msk.f32.gmra.mxu2 %vm4030_vm7, %v3957_v60 }
 0x84c   :  { %4820 = vmatmul.msk.f32.gmra.mxu2 %vm4030_vm7, %v3958_v58 }
 0x854   :  { %4821 = vmatmul.msk.f32.gmra.mxu2 %vm4030_vm7, %v3959_v15 }
 0x85c   :  { %4822 = vmatmul.msk.f32.gmra.mxu2 %vm4030_vm7, %v3960_v27 }
 0x864   :  { %4823 = vmatmul.msk.f32.gmra.mxu2 %vm4030_vm7, %v3961_v53 }
 0x86c   :  { %4824 = vmatmul.msk.f32.gmra.mxu2 %vm4030_vm7, %v3962_v50 }
 0x874   :  { %4825 = vmatmul.msk.f32.gmra.mxu2 %vm4030_vm7, %v3963_v61 }
 0x8a7   :  { %v4081_v12 = vpop.f32.mrf.mxu2 }
 0x8a8   :  { %v4082_v63 = vadd.f32 %v4081_v12, %v3978_v35 }
 0x8aa   :  { %v4114_v16 = vmax.f32 %v4082_v63, 0.0 }
 0x8af   :  { %v4084_v52 = vpop.f32.mrf.mxu2 }
 0x8b0   :  { %v4085_v4 = vadd.f32 %v4084_v52, %v3983_v24 }
 0x8b2   :  { %v4115_v49 = vmax.f32 %v4085_v4, 0.0 }
 0x8b7   :  { %v4087_v22 = vpop.f32.mrf.mxu2 }
 0x8b8   :  { %v4088_v37 = vadd.f32 %v4087_v22, %v3988_v47 }
 0x8ba   :  { %v4116_v42 = vmax.f32 %v4088_v37, 0.0 }
 0x8bf   :  { %v4090_v45 = vpop.f32.mrf.mxu2 }
 0x8c0   :  { %v4091_v33 = vadd.f32 %v4090_v45, %v3993_v10 }
 0x8c2   :  { %v4117_v3 = vmax.f32 %v4091_v33, 0.0 }
 0x8c7   :  { %v4093_v26 = vpop.f32.mrf.mxu2 }
 0x8c8   :  { %v4094_v55 = vadd.f32 %v4093_v26, %v3998_v59 }
 0x8ca   :  { %v4118_v9 = vmax.f32 %v4094_v55, 0.0 }
 0x8cf   :  { %v4096_v46 = vpop.f32.mrf.mxu2 }
 0x8d0   :  { %v4097_v29 = vadd.f32 %v4096_v46, %v4003_v32 }
 0x8d2   :  { %v4119_v6 = vmax.f32 %v4097_v29, 0.0 }
 0x8d7   :  { %v4099_v8 = vpop.f32.mrf.mxu2 }
 0x8d8   :  { %v4100_v14 = vadd.f32 %v4099_v8, %v4008_v23 }
 0x8da   :  { %v4120_v1 = vmax.f32 %v4100_v14, 0.0 }
 0x8df   :  { %v4102_v36 = vpop.f32.mrf.mxu2 }
 0x8e0   :  { %v4103_v17 = vadd.f32 %v4102_v36, %v4013_v2 }
 0x8e2   :  { %v4121_v57 = vmax.f32 %v4103_v17, 0.0 }
 0x8e7   :  { %v4105_v20 = vpop.f32.mrf.mxu2 }
 0x8e8   :  { %v4106_v56 = vadd.f32 %v4105_v20, %v4018_v13 }
 0x8ea   :  { %v4122_v41 = vmax.f32 %v4106_v56, 0.0 }
 0x8ef   :  { %v4108_v25 = vpop.f32.mrf.mxu2 }
 0x8f0   :  { %v4109_v38 = vadd.f32 %v4108_v25, %v4023_v28 }
 0x8f2   :  { %v4123_v44 = vmax.f32 %v4109_v38, 0.0 }
 0x8f7   :  { %v4111_v51 = vpop.f32.mrf.mxu2 }
 0x8f8   :  { %v4112_v54 = vadd.f32 %v4111_v51, %v4028_v48 }
 0x8fa   :  { %v4124_v7 = vmax.f32 %v4112_v54, 0.0 }
 0x8fc   :  { %4826 = vmatpush.msk.msra.mxu0 %vm1303_vm1, %v4124_v7 }
 0x8fe   :  { %4154 = vmatpush.msra.mxu0 %v4123_v44 }
 0x900   :  { %4155 = vmatpush.msra.mxu0 %v4122_v41 }
 0x902   :  { %4156 = vmatpush.msra.mxu0 %v4121_v57 }
 0x904   :  { %4157 = vmatpush.msra.mxu0 %v4120_v1 }
 0x906   :  { %4158 = vmatpush.msra.mxu0 %v4119_v6 }
 0x908   :  { %4159 = vmatpush.msra.mxu0 %v4118_v9 }
 0x90a   :  { %4160 = vmatpush.msra.mxu0 %v4117_v3 }
 0x90c   :  { %4161 = vmatpush.msra.mxu0 %v4116_v42 }
 0x90e   :  { %4162 = vmatpush.msra.mxu0 %v4115_v49 }
 0x910   :  { %4163 = vmatpush.msra.mxu0 %v4114_v16 }
 0x911   :  { %4827 = vmatmul.msk.f32.vlgmr.msra.gmra.mxu0 %vm1599_vm3, %v4125_v40 }
 0x919   :  { %4828 = vmatmul.msk.f32.gmra.mxu0 %vm1599_vm3, %v4126_v39 }
 0x98e   :  { %v4165_v11 = vpop.f32.mrf.mxu0 }
 0x98f   :  { %v4166_v0 = vadd.f32 %v4165_v11, %v4132_v30 }
 0x991   :  { %4172 = vst.msk [vmem:[%s7617_s18] sm:$0xff] %vm4171_vm8, %v4166_v0 }
 0x996   :  { %v4168_v21 = vpop.f32.mrf.mxu0 }
 0x997   :  { %v4169_v34 = vadd.f32 %v4168_v21, %v4137_v62 }
 0x999   :  { %4174 = vst.msk [vmem:[%s7617_s18 + $0x8] sm:$0x3] %vm4173_vm9, %v4169_v34 }

</bundles_post_ra>
